<compile_context>
chip_gen: v6e
topology: v6e:2x2x1
jax: 0.10.0
libtpu: 0.0.40
codegen_flags: <defaults>
</compile_context>

<pallas_src>
import functools

import jax
import jax.numpy as jnp
from jax.experimental import pallas as pl
from jax.experimental.pallas import tpu as pltpu


def autopad(k, p=None):
    if p is None:
        p = k // 2 if isinstance(k, int) else [x // 2 for x in k]
    return p


def _round_up(x, m):
    return (x + m - 1) // m * m


def _pick_th(hout, wout, max_rows=2048):
    """Largest divisor of Hout with TH * Wout <= max_rows output rows / tile."""
    start = min(hout, max(1, max_rows // max(wout, 1)))
    for cand in range(start, 0, -1):
        if hout % cand == 0:
            return cand
    return 1


# ----------------------------------------------------------------------------
# Pallas kernel: fused conv (k*k shifted matmuls) + BN bias + SiLU
# ----------------------------------------------------------------------------
def _conv_bn_silu_kernel(x_ref, w_ref, b_ref, o_ref, *, k, s, th, wout):
    # x_ref: (1, Hp, Wp, C1p) bf16  -- full padded image, resident across ht
    # w_ref: (k*k, C1p, C2p) bf16   -- BN-scale-folded weights
    # b_ref: (1, C2p) f32           -- folded BN bias
    # o_ref: (1, th, wout, C2p) f32 -- lane-dense output tile
    ht = pl.program_id(1)
    c1p = x_ref.shape[-1]
    c2p = o_ref.shape[-1]
    m = th * wout
    h_base = ht * (th * s)

    acc = jnp.zeros((m, c2p), jnp.float32)
    for kh in range(k):            # static unroll over the k*k taps
        for kw in range(k):
            if s == 1:
                lhs = x_ref[0, pl.ds(h_base + kh, th), pl.ds(kw, wout), :]
            else:
                lhs = x_ref[0, pl.ds(h_base + kh, th, stride=s),
                            pl.ds(kw, wout, stride=s), :]
            lhs = lhs.reshape(m, c1p)                      # (rows, C1p) bf16
            acc = acc + jnp.dot(lhs, w_ref[kh * k + kw],
                                preferred_element_type=jnp.float32)

    y = acc + b_ref[...]                                   # BatchNorm (folded)
    y = y * jax.nn.sigmoid(y)                              # SiLU
    o_ref[...] = y.reshape(1, th, wout, c2p).astype(o_ref.dtype)


# ----------------------------------------------------------------------------
# Wrapper
# ----------------------------------------------------------------------------
def conv_bn_silu_pallas(x, weight, gamma, beta, running_mean, running_var,
                        *, k, s, p, eps=1e-5, max_rows_per_tile=2048):
    """x: (N, C1, H, W) f32.  weight: (C2, C1, k, k) f32.  Returns NCHW f32."""
    N, C1, H, W = x.shape
    C2 = weight.shape[0]
    Hout = (H + 2 * p - k) // s + 1
    Wout = (W + 2 * p - k) // s + 1
    Hp, Wp = H + 2 * p, W + 2 * p

    C1p = _round_up(C1, 8)        # sublane-friendly contraction dim
    C2p = _round_up(C2, 128)      # lane-dense output channels

    # ---- input: NCHW -> padded NHWC bf16 (no k^2 im2col inflation) ----
    x_nhwc = jnp.transpose(x, (0, 2, 3, 1))
    xp = jnp.pad(x_nhwc, ((0, 0), (p, p), (p, p), (0, C1p - C1)))
    xp = xp.astype(jnp.bfloat16)

    # ---- fold BN (inference running stats) into weight scale / bias ----
    scale = gamma / jnp.sqrt(running_var + eps)                 # (C2,)
    bias = beta - running_mean * scale                          # (C2,)
    w = weight * scale[:, None, None, None]                     # (C2, C1, k, k)
    w = jnp.transpose(w, (2, 3, 1, 0)).reshape(k * k, C1, C2)   # (k*k, C1, C2)
    w = jnp.pad(w, ((0, 0), (0, C1p - C1), (0, C2p - C2))).astype(jnp.bfloat16)
    b = jnp.pad(bias, (0, C2p - C2)).reshape(1, C2p).astype(jnp.float32)

    th = _pick_th(Hout, Wout, max_rows_per_tile)
    grid = (N, Hout // th)

    kernel = functools.partial(_conv_bn_silu_kernel, k=k, s=s, th=th, wout=Wout)

    out = pl.pallas_call(
        kernel,
        out_shape=jax.ShapeDtypeStruct((N, Hout, Wout, C2p), jnp.float32),
        grid_spec=pltpu.PrefetchScalarGridSpec(
            num_scalar_prefetch=0,
            grid=grid,
            in_specs=[
                # Full padded image: block index depends only on n, so it is
                # fetched once per image and stays resident across ht.
                pl.BlockSpec((1, Hp, Wp, C1p), lambda n, ht: (n, 0, 0, 0)),
                # Weights / bias: constant block index -> resident.
                pl.BlockSpec((k * k, C1p, C2p), lambda n, ht: (0, 0, 0)),
                pl.BlockSpec((1, C2p), lambda n, ht: (0, 0)),
            ],
            out_specs=pl.BlockSpec((1, th, Wout, C2p),
                                   lambda n, ht: (n, ht, 0, 0)),
        ),
        compiler_params=pltpu.CompilerParams(
            dimension_semantics=("parallel", "parallel")),
        # NOTE: for very large layers/tiles, raise vmem_limit_bytes here.
    )(xp, w, b)

    # ---- back to the PyTorch NCHW interface ----
    # TODO(synk): in an NHWC end-to-end pipeline this slice + transpose would
    #             be elided (the kernel output is already lane-dense NHWC).
    out = out[..., :C2]
    return jnp.transpose(out, (0, 3, 1, 2))


# ----------------------------------------------------------------------------
# Pure-JAX reference (mirrors PyTorch Conv.forward in eval mode, f32)
# ----------------------------------------------------------------------------
def conv_bn_silu_ref(x, weight, gamma, beta, running_mean, running_var,
                     *, k, s, p, eps=1e-5):
    y = jax.lax.conv_general_dilated(
        x, weight, window_strides=(s, s), padding=[(p, p), (p, p)],
        dimension_numbers=("NCHW", "OIHW", "NCHW"))
    sc = (gamma / jnp.sqrt(running_var + eps))[None, :, None, None]
    bs = (beta - running_mean * gamma / jnp.sqrt(running_var + eps))[None, :, None, None]
    y = y * sc + bs
    return y * jax.nn.sigmoid(y)


if __name__ == "__main__":
    # Conv(c1=4, c2=8, k=3, s=1) -> autopad p = 1
    N, C1, H, W = 2, 4, 16, 16
    C2, k, s = 8, 3, 1
    p = autopad(k)

    key = jax.random.PRNGKey(0)
    kx, kw, kg, kb, km, kv = jax.random.split(key, 6)
    x = jax.random.normal(kx, (N, C1, H, W), dtype=jnp.float32)
    weight = jax.random.normal(kw, (C2, C1, k, k), dtype=jnp.float32) * 0.1
    gamma = jax.random.normal(kg, (C2,), dtype=jnp.float32) * 0.1 + 1.0
    beta = jax.random.normal(kb, (C2,), dtype=jnp.float32) * 0.1
    running_mean = jax.random.normal(km, (C2,), dtype=jnp.float32) * 0.1
    running_var = jax.random.uniform(kv, (C2,), dtype=jnp.float32,
                                     minval=0.5, maxval=1.5)

    out = conv_bn_silu_pallas(x, weight, gamma, beta, running_mean, running_var,
                              k=k, s=s, p=p)
    out = jax.block_until_ready(out)

    ref = conv_bn_silu_ref(x, weight, gamma, beta, running_mean, running_var,
                           k=k, s=s, p=p)
    assert out.shape == (N, C2, H, W), out.shape
    max_err = float(jnp.max(jnp.abs(out - ref)))
    # bf16 MXU operands (f32 accumulation) -> low-order-bit differences only.
    assert jnp.allclose(out, ref, atol=3e-2, rtol=3e-2), max_err
    print("KERNEL_OK")
</pallas_src>

<mosaic_0001>
module attributes {stable_mosaic.version = 11 : i64} {
  func.func @_conv_bn_silu_kernel(%arg0: i32, %arg1: i32, %arg2: memref<1x18x18x8xbf16, #tpu.memory_space<vmem>>, %arg3: memref<9x8x128xbf16, #tpu.memory_space<vmem>>, %arg4: memref<1x128xf32, #tpu.memory_space<vmem>>, %arg5: memref<1x16x16x128xf32, #tpu.memory_space<vmem>>) attributes {dimension_semantics = [#tpu.dimension_semantics<parallel>, #tpu.dimension_semantics<parallel>], iteration_bounds = array<i64: 2, 1>, scalar_prefetch = 0 : i64, scratch_operands = 0 : i64, tpu.core_type = #tpu.core_type<tc>, window_params = [{transform_indices = @transform_0, window_bounds = array<i64: 1, 18, 18, 8>}, {pipeline_mode = #tpu.pipeline_mode<synchronous>, transform_indices = @transform_1, window_bounds = array<i64: 9, 8, 128>}, {pipeline_mode = #tpu.pipeline_mode<synchronous>, transform_indices = @transform_2, window_bounds = array<i64: 1, 128>}, {transform_indices = @transform_3, window_bounds = array<i64: 1, 16, 16, 128>}]} {
    %c16_i32 = arith.constant 16 : i32
    %0 = arith.muli %arg1, %c16_i32 : i32
    %cst = arith.constant 0.000000e+00 : f32
    %1 = vector.broadcast %cst : f32 to vector<256x128xf32>
    %c0_i32 = arith.constant 0 : i32
    %2 = arith.addi %0, %c0_i32 : i32
    %c0 = arith.constant 0 : index
    %3 = arith.index_cast %2 : i32 to index
    %c0_0 = arith.constant 0 : index
    %c0_1 = arith.constant 0 : index
    %4 = vector.load %arg2[%c0, %3, %c0_0, %c0_1] : memref<1x18x18x8xbf16, #tpu.memory_space<vmem>>, vector<1x16x16x8xbf16>
    %5 = vector.shape_cast %4 : vector<1x16x16x8xbf16> to vector<16x16x8xbf16>
    %6 = vector.shape_cast %5 : vector<16x16x8xbf16> to vector<256x8xbf16>
    %c0_2 = arith.constant 0 : index
    %c0_3 = arith.constant 0 : index
    %c0_4 = arith.constant 0 : index
    %7 = vector.load %arg3[%c0_2, %c0_3, %c0_4] : memref<9x8x128xbf16, #tpu.memory_space<vmem>>, vector<1x8x128xbf16>
    %8 = vector.shape_cast %7 : vector<1x8x128xbf16> to vector<8x128xbf16>
    %cst_5 = arith.constant dense<0.000000e+00> : vector<256x128xf32>
    %9 = tpu.matmul %6, %8, %cst_5 {dimension_numbers = #tpu.dot_dimension_numbers<[1], [0], [0], [1], [0, 0, 1, 1], [], []>} : vector<256x8xbf16>, vector<8x128xbf16>, vector<256x128xf32> -> vector<256x128xf32>
    %10 = arith.addf %1, %9 : vector<256x128xf32>
    %c0_i32_6 = arith.constant 0 : i32
    %11 = arith.addi %0, %c0_i32_6 : i32
    %c0_7 = arith.constant 0 : index
    %12 = arith.index_cast %11 : i32 to index
    %c1 = arith.constant 1 : index
    %c0_8 = arith.constant 0 : index
    %13 = vector.load %arg2[%c0_7, %12, %c1, %c0_8] : memref<1x18x18x8xbf16, #tpu.memory_space<vmem>>, vector<1x16x16x8xbf16>
    %14 = vector.shape_cast %13 : vector<1x16x16x8xbf16> to vector<16x16x8xbf16>
    %15 = vector.shape_cast %14 : vector<16x16x8xbf16> to vector<256x8xbf16>
    %c1_9 = arith.constant 1 : index
    %c0_10 = arith.constant 0 : index
    %c0_11 = arith.constant 0 : index
    %16 = vector.load %arg3[%c1_9, %c0_10, %c0_11] : memref<9x8x128xbf16, #tpu.memory_space<vmem>>, vector<1x8x128xbf16>
    %17 = vector.shape_cast %16 : vector<1x8x128xbf16> to vector<8x128xbf16>
    %cst_12 = arith.constant dense<0.000000e+00> : vector<256x128xf32>
    %18 = tpu.matmul %15, %17, %cst_12 {dimension_numbers = #tpu.dot_dimension_numbers<[1], [0], [0], [1], [0, 0, 1, 1], [], []>} : vector<256x8xbf16>, vector<8x128xbf16>, vector<256x128xf32> -> vector<256x128xf32>
    %19 = arith.addf %10, %18 : vector<256x128xf32>
    %c0_i32_13 = arith.constant 0 : i32
    %20 = arith.addi %0, %c0_i32_13 : i32
    %c0_14 = arith.constant 0 : index
    %21 = arith.index_cast %20 : i32 to index
    %c2 = arith.constant 2 : index
    %c0_15 = arith.constant 0 : index
    %22 = vector.load %arg2[%c0_14, %21, %c2, %c0_15] : memref<1x18x18x8xbf16, #tpu.memory_space<vmem>>, vector<1x16x16x8xbf16>
    %23 = vector.shape_cast %22 : vector<1x16x16x8xbf16> to vector<16x16x8xbf16>
    %24 = vector.shape_cast %23 : vector<16x16x8xbf16> to vector<256x8xbf16>
    %c2_16 = arith.constant 2 : index
    %c0_17 = arith.constant 0 : index
    %c0_18 = arith.constant 0 : index
    %25 = vector.load %arg3[%c2_16, %c0_17, %c0_18] : memref<9x8x128xbf16, #tpu.memory_space<vmem>>, vector<1x8x128xbf16>
    %26 = vector.shape_cast %25 : vector<1x8x128xbf16> to vector<8x128xbf16>
    %cst_19 = arith.constant dense<0.000000e+00> : vector<256x128xf32>
    %27 = tpu.matmul %24, %26, %cst_19 {dimension_numbers = #tpu.dot_dimension_numbers<[1], [0], [0], [1], [0, 0, 1, 1], [], []>} : vector<256x8xbf16>, vector<8x128xbf16>, vector<256x128xf32> -> vector<256x128xf32>
    %28 = arith.addf %19, %27 : vector<256x128xf32>
    %c1_i32 = arith.constant 1 : i32
    %29 = arith.addi %0, %c1_i32 : i32
    %c0_20 = arith.constant 0 : index
    %30 = arith.index_cast %29 : i32 to index
    %c0_21 = arith.constant 0 : index
    %c0_22 = arith.constant 0 : index
    %31 = vector.load %arg2[%c0_20, %30, %c0_21, %c0_22] : memref<1x18x18x8xbf16, #tpu.memory_space<vmem>>, vector<1x16x16x8xbf16>
    %32 = vector.shape_cast %31 : vector<1x16x16x8xbf16> to vector<16x16x8xbf16>
    %33 = vector.shape_cast %32 : vector<16x16x8xbf16> to vector<256x8xbf16>
    %c3 = arith.constant 3 : index
    %c0_23 = arith.constant 0 : index
    %c0_24 = arith.constant 0 : index
    %34 = vector.load %arg3[%c3, %c0_23, %c0_24] : memref<9x8x128xbf16, #tpu.memory_space<vmem>>, vector<1x8x128xbf16>
    %35 = vector.shape_cast %34 : vector<1x8x128xbf16> to vector<8x128xbf16>
    %cst_25 = arith.constant dense<0.000000e+00> : vector<256x128xf32>
    %36 = tpu.matmul %33, %35, %cst_25 {dimension_numbers = #tpu.dot_dimension_numbers<[1], [0], [0], [1], [0, 0, 1, 1], [], []>} : vector<256x8xbf16>, vector<8x128xbf16>, vector<256x128xf32> -> vector<256x128xf32>
    %37 = arith.addf %28, %36 : vector<256x128xf32>
    %c1_i32_26 = arith.constant 1 : i32
    %38 = arith.addi %0, %c1_i32_26 : i32
    %c0_27 = arith.constant 0 : index
    %39 = arith.index_cast %38 : i32 to index
    %c1_28 = arith.constant 1 : index
    %c0_29 = arith.constant 0 : index
    %40 = vector.load %arg2[%c0_27, %39, %c1_28, %c0_29] : memref<1x18x18x8xbf16, #tpu.memory_space<vmem>>, vector<1x16x16x8xbf16>
    %41 = vector.shape_cast %40 : vector<1x16x16x8xbf16> to vector<16x16x8xbf16>
    %42 = vector.shape_cast %41 : vector<16x16x8xbf16> to vector<256x8xbf16>
    %c4 = arith.constant 4 : index
    %c0_30 = arith.constant 0 : index
    %c0_31 = arith.constant 0 : index
    %43 = vector.load %arg3[%c4, %c0_30, %c0_31] : memref<9x8x128xbf16, #tpu.memory_space<vmem>>, vector<1x8x128xbf16>
    %44 = vector.shape_cast %43 : vector<1x8x128xbf16> to vector<8x128xbf16>
    %cst_32 = arith.constant dense<0.000000e+00> : vector<256x128xf32>
    %45 = tpu.matmul %42, %44, %cst_32 {dimension_numbers = #tpu.dot_dimension_numbers<[1], [0], [0], [1], [0, 0, 1, 1], [], []>} : vector<256x8xbf16>, vector<8x128xbf16>, vector<256x128xf32> -> vector<256x128xf32>
    %46 = arith.addf %37, %45 : vector<256x128xf32>
    %c1_i32_33 = arith.constant 1 : i32
    %47 = arith.addi %0, %c1_i32_33 : i32
    %c0_34 = arith.constant 0 : index
    %48 = arith.index_cast %47 : i32 to index
    %c2_35 = arith.constant 2 : index
    %c0_36 = arith.constant 0 : index
    %49 = vector.load %arg2[%c0_34, %48, %c2_35, %c0_36] : memref<1x18x18x8xbf16, #tpu.memory_space<vmem>>, vector<1x16x16x8xbf16>
    %50 = vector.shape_cast %49 : vector<1x16x16x8xbf16> to vector<16x16x8xbf16>
    %51 = vector.shape_cast %50 : vector<16x16x8xbf16> to vector<256x8xbf16>
    %c5 = arith.constant 5 : index
    %c0_37 = arith.constant 0 : index
    %c0_38 = arith.constant 0 : index
    %52 = vector.load %arg3[%c5, %c0_37, %c0_38] : memref<9x8x128xbf16, #tpu.memory_space<vmem>>, vector<1x8x128xbf16>
    %53 = vector.shape_cast %52 : vector<1x8x128xbf16> to vector<8x128xbf16>
    %cst_39 = arith.constant dense<0.000000e+00> : vector<256x128xf32>
    %54 = tpu.matmul %51, %53, %cst_39 {dimension_numbers = #tpu.dot_dimension_numbers<[1], [0], [0], [1], [0, 0, 1, 1], [], []>} : vector<256x8xbf16>, vector<8x128xbf16>, vector<256x128xf32> -> vector<256x128xf32>
    %55 = arith.addf %46, %54 : vector<256x128xf32>
    %c2_i32 = arith.constant 2 : i32
    %56 = arith.addi %0, %c2_i32 : i32
    %c0_40 = arith.constant 0 : index
    %57 = arith.index_cast %56 : i32 to index
    %c0_41 = arith.constant 0 : index
    %c0_42 = arith.constant 0 : index
    %58 = vector.load %arg2[%c0_40, %57, %c0_41, %c0_42] : memref<1x18x18x8xbf16, #tpu.memory_space<vmem>>, vector<1x16x16x8xbf16>
    %59 = vector.shape_cast %58 : vector<1x16x16x8xbf16> to vector<16x16x8xbf16>
    %60 = vector.shape_cast %59 : vector<16x16x8xbf16> to vector<256x8xbf16>
    %c6 = arith.constant 6 : index
    %c0_43 = arith.constant 0 : index
    %c0_44 = arith.constant 0 : index
    %61 = vector.load %arg3[%c6, %c0_43, %c0_44] : memref<9x8x128xbf16, #tpu.memory_space<vmem>>, vector<1x8x128xbf16>
    %62 = vector.shape_cast %61 : vector<1x8x128xbf16> to vector<8x128xbf16>
    %cst_45 = arith.constant dense<0.000000e+00> : vector<256x128xf32>
    %63 = tpu.matmul %60, %62, %cst_45 {dimension_numbers = #tpu.dot_dimension_numbers<[1], [0], [0], [1], [0, 0, 1, 1], [], []>} : vector<256x8xbf16>, vector<8x128xbf16>, vector<256x128xf32> -> vector<256x128xf32>
    %64 = arith.addf %55, %63 : vector<256x128xf32>
    %c2_i32_46 = arith.constant 2 : i32
    %65 = arith.addi %0, %c2_i32_46 : i32
    %c0_47 = arith.constant 0 : index
    %66 = arith.index_cast %65 : i32 to index
    %c1_48 = arith.constant 1 : index
    %c0_49 = arith.constant 0 : index
    %67 = vector.load %arg2[%c0_47, %66, %c1_48, %c0_49] : memref<1x18x18x8xbf16, #tpu.memory_space<vmem>>, vector<1x16x16x8xbf16>
    %68 = vector.shape_cast %67 : vector<1x16x16x8xbf16> to vector<16x16x8xbf16>
    %69 = vector.shape_cast %68 : vector<16x16x8xbf16> to vector<256x8xbf16>
    %c7 = arith.constant 7 : index
    %c0_50 = arith.constant 0 : index
    %c0_51 = arith.constant 0 : index
    %70 = vector.load %arg3[%c7, %c0_50, %c0_51] : memref<9x8x128xbf16, #tpu.memory_space<vmem>>, vector<1x8x128xbf16>
    %71 = vector.shape_cast %70 : vector<1x8x128xbf16> to vector<8x128xbf16>
    %cst_52 = arith.constant dense<0.000000e+00> : vector<256x128xf32>
    %72 = tpu.matmul %69, %71, %cst_52 {dimension_numbers = #tpu.dot_dimension_numbers<[1], [0], [0], [1], [0, 0, 1, 1], [], []>} : vector<256x8xbf16>, vector<8x128xbf16>, vector<256x128xf32> -> vector<256x128xf32>
    %73 = arith.addf %64, %72 : vector<256x128xf32>
    %c2_i32_53 = arith.constant 2 : i32
    %74 = arith.addi %0, %c2_i32_53 : i32
    %c0_54 = arith.constant 0 : index
    %75 = arith.index_cast %74 : i32 to index
    %c2_55 = arith.constant 2 : index
    %c0_56 = arith.constant 0 : index
    %76 = vector.load %arg2[%c0_54, %75, %c2_55, %c0_56] : memref<1x18x18x8xbf16, #tpu.memory_space<vmem>>, vector<1x16x16x8xbf16>
    %77 = vector.shape_cast %76 : vector<1x16x16x8xbf16> to vector<16x16x8xbf16>
    %78 = vector.shape_cast %77 : vector<16x16x8xbf16> to vector<256x8xbf16>
    %c8 = arith.constant 8 : index
    %c0_57 = arith.constant 0 : index
    %c0_58 = arith.constant 0 : index
    %79 = vector.load %arg3[%c8, %c0_57, %c0_58] : memref<9x8x128xbf16, #tpu.memory_space<vmem>>, vector<1x8x128xbf16>
    %80 = vector.shape_cast %79 : vector<1x8x128xbf16> to vector<8x128xbf16>
    %cst_59 = arith.constant dense<0.000000e+00> : vector<256x128xf32>
    %81 = tpu.matmul %78, %80, %cst_59 {dimension_numbers = #tpu.dot_dimension_numbers<[1], [0], [0], [1], [0, 0, 1, 1], [], []>} : vector<256x8xbf16>, vector<8x128xbf16>, vector<256x128xf32> -> vector<256x128xf32>
    %82 = arith.addf %73, %81 : vector<256x128xf32>
    %c0_60 = arith.constant 0 : index
    %c0_61 = arith.constant 0 : index
    %83 = vector.load %arg4[%c0_60, %c0_61] : memref<1x128xf32, #tpu.memory_space<vmem>>, vector<1x128xf32>
    %84 = vector.broadcast %83 : vector<1x128xf32> to vector<256x128xf32>
    %85 = arith.addf %82, %84 : vector<256x128xf32>
    %86 = arith.negf %85 : vector<256x128xf32>
    %87 = math.exp %86 : vector<256x128xf32>
    %cst_62 = arith.constant 1.000000e+00 : f32
    %88 = vector.broadcast %cst_62 : f32 to vector<256x128xf32>
    %89 = arith.addf %88, %87 : vector<256x128xf32>
    %90 = arith.divf %88, %89 : vector<256x128xf32>
    %91 = arith.mulf %85, %90 : vector<256x128xf32>
    %92 = vector.shape_cast %91 : vector<256x128xf32> to vector<1x16x16x128xf32>
    %c0_63 = arith.constant 0 : index
    %c0_64 = arith.constant 0 : index
    %c0_65 = arith.constant 0 : index
    %c0_66 = arith.constant 0 : index
    %93 = vector.load %arg5[%c0_63, %c0_64, %c0_65, %c0_66] : memref<1x16x16x128xf32, #tpu.memory_space<vmem>>, vector<1x16x16x128xf32>
    tpu.vector_store %arg5[%c0_63, %c0_64, %c0_65, %c0_66], %92 {strides = array<i32>} : memref<1x16x16x128xf32, #tpu.memory_space<vmem>>, vector<1x16x16x128xf32>,
    return
  }
  func.func @transform_0(%arg0: i32, %arg1: i32) -> (i32, i32, i32, i32) {
    %c0_i32 = arith.constant 0 : i32
    %c0_i32_0 = arith.constant 0 : i32
    %c0_i32_1 = arith.constant 0 : i32
    %c0_i32_2 = arith.constant 0 : i32
    return %arg0, %c0_i32, %c0_i32_0, %c0_i32_1 : i32, i32, i32, i32
  }
  func.func @transform_1(%arg0: i32, %arg1: i32) -> (i32, i32, i32) {
    %c0_i32 = arith.constant 0 : i32
    %c0_i32_0 = arith.constant 0 : i32
    %c0_i32_1 = arith.constant 0 : i32
    %c0_i32_2 = arith.constant 0 : i32
    return %c0_i32, %c0_i32_0, %c0_i32_1 : i32, i32, i32
  }
  func.func @transform_2(%arg0: i32, %arg1: i32) -> (i32, i32) {
    %c0_i32 = arith.constant 0 : i32
    %c0_i32_0 = arith.constant 0 : i32
    %c0_i32_1 = arith.constant 0 : i32
    return %c0_i32, %c0_i32_0 : i32, i32
  }
  func.func @transform_3(%arg0: i32, %arg1: i32) -> (i32, i32, i32, i32) {
    %c0_i32 = arith.constant 0 : i32
    %c0_i32_0 = arith.constant 0 : i32
    %c0_i32_1 = arith.constant 0 : i32
    return %arg0, %arg1, %c0_i32, %c0_i32_0 : i32, i32, i32, i32
  }
}

</mosaic_0001>

<bundles_post_ra>
// kernel: tpu_custom_call.1
= control target key start
LH: loop header
LB: loop body
LE: loop exit
PB: predicated region body
PF: predicated region fallthrough
CT: control target
= control target key end

     0   :  { %8 = vsyncpa [#allocation3], 0  ;;  %s9455_s0 = inlined_call_operand.vmem [shape: bf16[2,18,18,8], index: 0, kind: input, shape index: {}]   ;;  %s9456_s1 = inlined_call_operand.vmem [shape: bf16[9,8,128], index: 1, kind: input, shape index: {}]   ;;  %s9457_s2 = inlined_call_operand.vmem [shape: f32[1,128], index: 2, kind: input, shape index: {}]   ;;  %s9458_s3 = inlined_call_operand.hbm [shape: f32[2,16,16,128], index: 3, kind: output, shape index: {}]  }
   0x1   :  { %10 = vsyncpa [#allocation3 + $0x1], 0  ;;  %s6539_s12 = smov 0   ;;  %s6541_s13 = smov 0  }
   0x2   :  { %s6543_s14 = smov 0   ;;  %s6545_s15 = smov 0  }
   0x3   :  { %s6547_s16 = smov 0   ;;  %s6549_s17 = smov 0  }
   0x4 LB: > { %s5149_s18 = sadd.s32 4294967295, %s6514_s17   ;;  %s5150_s19 = sadd.s32 4294967294, %s6514_s17   ;;  %s6514_s17 = sphi %s6549_s17, %s16_s17   ;;  %s6510_s16 = sphi %s6547_s16, %s9739_s16   ;;  %s6506_s15 = sphi %s6545_s15, %s9738_s15   ;;  %s6502_s14 = sphi %s6543_s14, %s9737_s14   ;;  %s6498_s13 = sphi %s6541_s13, %s9736_s13   ;;  %s6494_s12 = sphi %s6539_s12, %s9735_s12  }
   0x5   : > { %s28_s20 = sadd.s32 1, %s6510_s16  ;;  %s105_s21 = sadd.s32 1, %s6502_s14 }
   0x6   : > { %p30_p0 = scmp.ge.s32.totalorder %s28_s20, 2  ;;  %p115_p1 = scmp.ne.s32.totalorder %s6502_s14, %s6498_s13 }
   0x7   : > { %p116_p2 = scmp.eq.s32.totalorder %s5149_s18, 1  ;;  %p121_p3 = scmp.ne.s32.totalorder %s6498_s13, %s6494_s12 }
   0x8   : > { %s9741_s20 = smov (%p30_p0, %s28_s20), 0  ;;  %p122_p5 = scmp.eq.s32.totalorder %s5150_s19, 1 }
   0x9   : > { %p6579_p4 = por %p116_p2, %p115_p1  ;;  %s100_s23 = ssub.s32 %s6510_s16, %s9741_s20 }
   0xa   : > { %p5153_p6 = scmp.ge.s32.totalorder %s6514_s17, 1  ;;  %p103_p7 = scmp.eq.s32.totalorder %s100_s23, 0 }
   0xb   : > { %p6586_p8 = por %p122_p5, %p121_p3  ;;  %p154_p9 = scmp.lt.s32.totalorder %s6514_s17, 3 }
   0xc   : > { %s6592_s25 = scalar_select %p103_p7, %s6502_s14, %s105_s21  }
   0xd   : > { %p155_p10 = pnand %p5153_p6, %p154_p9 }
   0xf   : > { %158 = sbr.rel (%p155_p10) target bundleno = 616 (0x268), region = 32 }
  0x14   : > { %v5156_v0 = vld [vmem:[%s9456_s1 + $0x4] sm:$0xf]  ;;  %vm724_vm0 = vcmask 1043456   ;;  %p178_p11 = scmp.lt.s32.totalorder %s6506_s15, 1  ;;  %v221_v2 = vld [vmem:[%s9456_s1] sm:$0xf] }
  0x15   : > { %6193 = vmatprep.subr.msk.bf16.mxu1 %vm724_vm0, %v5156_v0  ;;  %6192 = vmatprep.subr.msk.bf16.mxu0 %vm724_vm0, %v5156_v0  ;;  %v726_v1 = vsel %vm724_vm0, %v5156_v0, 0  ;;  %v5237_v3 = vld [vmem:[%s9456_s1 + $0x8] sm:$0xf]  ;;  %vm238_vm1 = vsmask.f32 3328  ;;  %v6616_v4 = vsel %vm724_vm0, %v221_v2, 0 }
  0x16   : > { %6191 = vmatpush3.bf16.msra.mxu1 %v726_v1  ;;  %5885 = vmatpush3.bf16.msra.mxu0 %v726_v1  ;;  %s179_s30 = scalar_select %p178_p11, %s6506_s15, 1  ;;  %vm239_vm2 = vsmask.f32 7440  ;;  %vm675_vm3 = vcmask 64512   ;;  %v6642_v16 = vsel %vm724_vm0, %v5237_v3, 0  ;;  %vm1229_vm5 = vcmask 1042432  }
  0x17   : > { %6194 = vmatprep.subr.msk.bf16.mxu1 %vm724_vm0, %v221_v2  ;;  %6195 = vmatprep.subr.msk.bf16.mxu0 %vm724_vm0, %v5237_v3  ;;  %vm6657_vm4 = vmor %vm238_vm1, %vm239_vm2  ;;  %vm1230_vm6 = vcmask 1046532   ;;  %s175_s7 = sand.u32 1, %s6498_s13   ;;  %s5730_s10 = sshll.u32 %s6506_s15, 12 }
  0x18   : > { %s6202_s6 = smul.u32 216, %s179_s30  ;;  %vm6943_vm7 = vmor %vm1229_vm5, %vm1230_vm6  ;;  %s9235_s8 = sshll.u32 %s175_s7, 8 }
  0x19   : > { %s9402_s21 = scalar_lea.hbm %s9458_s3, %s5730_s10  ;;  %s9410_s15 = scalar_lea.sflag [#allocation3], %s175_s7 }
  0x1a   : > { %s6613_s9 = scalar_lea.vmem %s9455_s0, %s6202_s6  ;;  %s6516_s26 = smov [#allocation2]  }
  0x1b   : > { %v6619_v5 = vld [vmem:[%s6613_s9] sm:$0xf]  ;;  %v6622_v6 = vld [vmem:[%s6613_s9 + $0x4] sm:$0xf]  ;;  %v6625_v7 = vld [vmem:[%s6613_s9 + $0x8] sm:$0x1] }
  0x1c   : > { %v242_v8 = vshrl.u32 %v6619_v5, 16  ;;  %v245_v9 = vshll.u32 %v6619_v5, 16  ;;  %v251_v10 = vshll.u32 %v6622_v6, 16  ;;  %v255_v11 = vshrl.u32 %v6622_v6, 16  ;;  %v6632_v12 = vld [vmem:[%s6613_s9 + $0x60] sm:$0xf] }
  0x1d   : > { %v261_v13 = vshll.u32 %v6625_v7, 16  ;;  %v6636_v14 = vld [vmem:[%s6613_s9 + $0x64] sm:$0xf]  ;;  %v6639_v15 = vld [vmem:[%s6613_s9 + $0x68] sm:$0x1]  ;;  %v434_v22 = vshrl.u32 %v6632_v12, 16 }
  0x1e   : > { %v244_v17 = vrot.slane %v242_v8, 4  ;;  %v247_v18 = vrot.slane %v245_v9, 5  ;;  %v253_v19 = vrot.slane %v251_v10, 5  ;;  %v257_v20 = vrot.slane %v255_v11, 4  ;;  %v6650_v29 = vld [vmem:[%s6613_s9 + $0xc] sm:$0xf] }
  0x1f   : > { %v263_v21 = vrot.slane %v261_v13, 5  ;;  %v437_v23 = vshll.u32 %v6632_v12, 16  ;;  %v443_v24 = vshll.u32 %v6636_v14, 16  ;;  %v447_v27 = vshrl.u32 %v6636_v14, 16  ;;  %v6653_v30 = vld [vmem:[%s6613_s9 + $0x10] sm:$0xf] }
  0x20   : > { %v248_v25 = vor.u32 %v247_v18, %v244_v17  ;;  %v258_v26 = vor.u32 %v257_v20, %v253_v19  ;;  %v453_v28 = vshll.u32 %v6639_v15, 16  ;;  %v436_v33 = vrot.slane %v434_v22, 4  ;;  %v6663_v41 = vld [vmem:[%s6613_s9 + $0x14] sm:$0x1]  ;;  %v6674_v53 = vld [vmem:[%s6613_s9 + $0x6c] sm:$0xf] }
  0x21   : > { %v439_v34 = vrot.slane %v437_v23, 5  ;;  %v445_v35 = vrot.slane %v443_v24, 5  ;;  %v449_v38 = vrot.slane %v447_v27, 4  ;;  %v266_v42 = vshrl.u32 %v6650_v29, 16  ;;  %v6678_v58 = vld [vmem:[%s6613_s9 + $0x70] sm:$0xf] }
  0x22   : > { %v249_v36 = vrot.slane %v248_v25, 4  ;;  %v259_v37 = vrot.slane %v258_v26, 4  ;;  %v455_v39 = vrot.slane %v453_v28, 5  ;;  %v269_v43 = vshll.u32 %v6650_v29, 16  ;;  %v6686_v63 = vld [vmem:[%s6613_s9 + $0x74] sm:$0x1] }
  0x23   : > { %v440_v40 = vor.u32 %v439_v34, %v436_v33  ;;  %v275_v44 = vshll.u32 %v6653_v30, 16  ;;  %v450_v47 = vor.u32 %v449_v38, %v445_v35  ;;  %v279_v48 = vshrl.u32 %v6653_v30, 16  ;;  %v6692_v8 = vld [vmem:[%s6613_s9 + $0x18] sm:$0xf]  ;;  %v6705_v25 = vld [vmem:[%s6613_s9 + $0x20] sm:$0x1] }
  0x24   : > { %v254_v45 = vsel %vm6657_vm4, %v249_v36, %v253_v19  ;;  %v264_v46 = vsel %vm6657_vm4, %v259_v37, %v263_v21  ;;  %v268_v51 = vrot.slane %v266_v42, 4  ;;  %v271_v52 = vrot.slane %v269_v43, 5  ;;  %v6699_v21 = vld [vmem:[%s6613_s9 + $0x1c] sm:$0xf]  ;;  %s6442_s27 = sshll.u32 %s6516_s26, 4  ;;  %s6443_s27 = int_to_ptr.vmem [resolvable:$false] %s6442_s27 }
  0x25   : > { %v5157_v49 = vcombine.low %v254_v45, %v264_v46  ;;  %v441_v50 = vrot.slane %v440_v40, 4  ;;  %v451_v54 = vrot.slane %v450_v47, 4  ;;  %v277_v55 = vrot.slane %v275_v44, 5  ;;  %v6718_v40 = vld [vmem:[%s9456_s1 + $0x10] sm:$0xf]  ;;  %s6444_s28 = scalar_lea.vmem %s6443_s27, 8192 }
  0x26   : > { %v281_v56 = vrot.slane %v279_v48, 4  ;;  %v285_v57 = vshll.u32 %v6663_v41, 16  ;;  %v272_v60 = vor.u32 %v271_v52, %v268_v51  ;;  %v458_v3 = vshrl.u32 %v6674_v53, 16  ;;  %v6723_v46 = vld [vmem:[%s6613_s9 + $0x7c] sm:$0xf] }
  0x27   : > { %5886 = vmatprep.mubr.msk.bf16.mxu0 %vm675_vm3, %v5157_v49  ;;  %v446_v59 = vsel %vm6657_vm4, %v441_v50, %v445_v35  ;;  %v456_v0 = vsel %vm6657_vm4, %v451_v54, %v455_v39  ;;  %v461_v11 = vshll.u32 %v6674_v53, 16  ;;  %v467_v13 = vshll.u32 %v6678_v58, 16  ;;  %v6712_v35 = vld [vmem:[%s6613_s9 + $0x78] sm:$0xf] }
  0x28   : > { %v282_v1 = vor.u32 %v281_v56, %v277_v55  ;;  %v287_v2 = vrot.slane %v285_v57, 5  ;;  %v5165_v9 = vcombine.low %v446_v59, %v456_v0  ;;  %v273_v10 = vrot.slane %v272_v60, 4  ;;  %v6730_v56 = vld [vmem:[%s6613_s9 + $0x80] sm:$0x1] }
  0x29   : > { %v460_v18 = vrot.slane %v458_v3, 4  ;;  %v471_v19 = vshrl.u32 %v6678_v58, 16  ;;  %v477_v20 = vshll.u32 %v6686_v63, 16  ;;  %v463_v23 = vrot.slane %v461_v11, 5  ;;  %9496 = vst [vmem:[#allocation5_spill] sm:$0xff] %v6730_v56 }
  0x2a   : > { %v283_v17 = vrot.slane %v282_v1, 4  ;;  %5902 = vmatprep.mubr.msk.bf16.mxu1 %vm675_vm3, %v5165_v9  ;;  %v278_v22 = vsel %vm6657_vm4, %v273_v10, %v277_v55  ;;  %v469_v24 = vrot.slane %v467_v13, 5  ;;  %v290_v26 = vshrl.u32 %v6692_v8, 16  ;;  %v6736_v1 = vld [vmem:[%s6613_s9 + $0x24] sm:$0xf] }
  0x2b   : > { %v473_v28 = vrot.slane %v471_v19, 4  ;;  %v479_v33 = vrot.slane %v477_v20, 5  ;;  %v293_v34 = vshll.u32 %v6692_v8, 16  ;;  %v464_v37 = vor.u32 %v463_v23, %v460_v18  ;;  %v6744_v10 = vld [vmem:[%s6613_s9 + $0x28] sm:$0xf] }
  0x2c   : > { %v288_v27 = vsel %vm6657_vm4, %v283_v17, %v287_v2  ;;  %v292_v38 = vrot.slane %v290_v26, 4  ;;  %v299_v39 = vshll.u32 %v6699_v21, 16  ;;  %v303_v44 = vshrl.u32 %v6699_v21, 16  ;;  %v6750_v19 = vld [vmem:[%s9456_s1 + $0xc] sm:$0xf] }
  0x2d   : > { %v5158_v36 = vcombine.low %v278_v22, %v288_v27  ;;  %v474_v42 = vor.u32 %v473_v28, %v469_v24  ;;  %v295_v43 = vrot.slane %v293_v34, 5  ;;  %v309_v45 = vshll.u32 %v6705_v25, 16 }
  0x2e   : > { %v465_v47 = vrot.slane %v464_v37, 4  ;;  %v301_v48 = vrot.slane %v299_v39, 5  ;;  %v482_v49 = vshrl.u32 %v6712_v35, 16  ;;  %v485_v50 = vshll.u32 %v6712_v35, 16 }
  0x2f   : > { %5887 = vmatmul.mubr.msk.bf16.vlgmr.msra.gmra.mxu0 %vm675_vm3, %v5158_v36  ;;  %v475_v51 = vrot.slane %v474_v42, 4  ;;  %v296_v52 = vor.u32 %v295_v43, %v292_v38  ;;  %v305_v54 = vrot.slane %v303_v44, 4  ;;  %v311_v55 = vrot.slane %v309_v45, 5  ;;  %v6762_v36 = vld [vmem:[%s6613_s9 + $0x84] sm:$0xf] }
  0x30   : > { %5953 = vmatpush3.bf16.msra.mxu0 %v6642_v16  ;;  %v470_v57 = vsel %vm6657_vm4, %v465_v47, %v469_v24  ;;  %v484_v59 = vrot.slane %v482_v49, 4  ;;  %v487_v60 = vrot.slane %v485_v50, 5  ;;  %v491_v0 = vshll.u32 %v6723_v46, 16  ;;  %v6755_v24 = vld [vmem:[%s6613_s9 + $0x2c] sm:$0x1] }
  0x31   : > { %6197 = vmatprep.subr.msk.bf16.mxu0 %vm724_vm0, %v6718_v40  ;;  %v480_v16 = vsel %vm6657_vm4, %v475_v51, %v479_v33  ;;  %v297_v2 = vrot.slane %v296_v52, 4  ;;  %v306_v3 = vor.u32 %v305_v54, %v301_v48  ;;  %v495_v9 = vshrl.u32 %v6723_v46, 16  ;;  %v6769_v43 = vld [vmem:[%s6613_s9 + $0x88] sm:$0xf]  ;;  %v6777_v51 = vld [vmem:[%s6613_s9 + $0x8c] sm:$0x1] }
  0x32   : > { %v5166_v11 = vcombine.low %v470_v57, %v480_v16  ;;  %v488_v13 = vor.u32 %v487_v60, %v484_v59  ;;  %v493_v17 = vrot.slane %v491_v0, 5  ;;  %v501_v18 = vshll.u32 %v6730_v56, 16  ;;  %9497 = vst [vmem:[#allocation6_spill] sm:$0xff] %v6777_v51  ;;  %v6785_v60 = vld [vmem:[%s6613_s9 + $0x30] sm:$0xf] }
  0x33   : > { %v302_v20 = vsel %vm6657_vm4, %v297_v2, %v301_v48  ;;  %v307_v22 = vrot.slane %v306_v3, 4  ;;  %v497_v23 = vrot.slane %v495_v9, 4  ;;  %v314_v26 = vshrl.u32 %v6736_v1, 16  ;;  %v6790_v9 = vld [vmem:[%s6613_s9 + $0x34] sm:$0xf] }
  0x34   : > { %5903 = vmatmul.mubr.msk.bf16.vlgmr.msra.gmra.mxu1 %vm675_vm3, %v5166_v11  ;;  %v489_v27 = vrot.slane %v488_v13, 4  ;;  %v503_v28 = vrot.slane %v501_v18, 5  ;;  %v317_v33 = vshll.u32 %v6736_v1, 16  ;;  %v323_v34 = vshll.u32 %v6744_v10, 16 }
  0x35   : > { %5919 = vmatpush3.bf16.msra.mxu1 %v6616_v4  ;;  %v312_v37 = vsel %vm6657_vm4, %v307_v22, %v311_v55  ;;  %v498_v38 = vor.u32 %v497_v23, %v493_v17  ;;  %v316_v39 = vrot.slane %v314_v26, 4  ;;  %v327_v42 = vshrl.u32 %v6744_v10, 16 }
  0x36   : > { %v5159_v44 = vcombine.low %v302_v20, %v312_v37  ;;  %v494_v45 = vsel %vm6657_vm4, %v489_v27, %v493_v17  ;;  %v319_v47 = vrot.slane %v317_v33, 5  ;;  %v325_v48 = vrot.slane %v323_v34, 5  ;;  %6196 = vmatprep.subr.msk.bf16.mxu1 %vm724_vm0, %v6750_v19  ;;  %v6798_v33 = vld [vmem:[%s6613_s9 + $0x38] sm:$0x1] }
  0x37   : > { %v499_v4 = vrot.slane %v498_v38, 4  ;;  %v329_v49 = vrot.slane %v327_v42, 4  ;;  %v333_v50 = vshll.u32 %v6755_v24, 16  ;;  %v506_v52 = vshrl.u32 %v6762_v36, 16  ;;  %v6803_v38 = vld [vmem:[%s6613_s9 + $0x90] sm:$0xf] }
  0x38   : > { %5890 = vmatprep.mubr.msk.bf16.mxu0 %vm675_vm3, %v5159_v44  ;;  %v320_v54 = vor.u32 %v319_v47, %v316_v39  ;;  %v509_v55 = vshll.u32 %v6762_v36, 16  ;;  %v515_v57 = vshll.u32 %v6769_v43, 16  ;;  %v519_v59 = vshrl.u32 %v6769_v43, 16  ;;  %9498 = vst [vmem:[#allocation7_spill] sm:$0xff] %v6803_v38  ;;  %v6808_v47 = vld [vmem:[%s6613_s9 + $0x94] sm:$0xf] }
  0x39   : > { %v504_v0 = vsel %vm6657_vm4, %v499_v4, %v503_v28  ;;  %v330_v16 = vor.u32 %v329_v49, %v325_v48  ;;  %v335_v2 = vrot.slane %v333_v50, 5  ;;  %v508_v3 = vrot.slane %v506_v52, 4  ;;  %9499 = vst [vmem:[#allocation8_spill] sm:$0xff] %v6808_v47 }
  0x3a   : > { %v5167_v11 = vcombine.low %v494_v45, %v504_v0  ;;  %v321_v13 = vrot.slane %v320_v54, 4  ;;  %v511_v17 = vrot.slane %v509_v55, 5  ;;  %v517_v18 = vrot.slane %v515_v57, 5 }
  0x3b   : > { %v331_v20 = vrot.slane %v330_v16, 4  ;;  %v521_v22 = vrot.slane %v519_v59, 4  ;;  %v525_v23 = vshll.u32 %v6777_v51, 16  ;;  %v338_v26 = vshrl.u32 %v6785_v60, 16  ;;  %v6817_v16 = vld [vmem:[%s6613_s9 + $0x98] sm:$0x1] }
  0x3c   : > { %5906 = vmatprep.mubr.msk.bf16.mxu1 %vm675_vm3, %v5167_v11  ;;  %v326_v27 = vsel %vm6657_vm4, %v321_v13, %v325_v48  ;;  %v512_v28 = vor.u32 %v511_v17, %v508_v3  ;;  %v341_v34 = vshll.u32 %v6785_v60, 16  ;;  %v347_v37 = vshll.u32 %v6790_v9, 16  ;;  %9500 = vst [vmem:[#allocation9_spill] sm:$0xff] %v6817_v16  ;;  %v6822_v11 = vld [vmem:[%s6613_s9 + $0x3c] sm:$0xf] }
  0x3d   : > { %v336_v39 = vsel %vm6657_vm4, %v331_v20, %v335_v2  ;;  %v522_v42 = vor.u32 %v521_v22, %v517_v18  ;;  %v527_v44 = vrot.slane %v525_v23, 5  ;;  %v340_v45 = vrot.slane %v338_v26, 4  ;;  %v6827_v23 = vld [vmem:[%s6613_s9 + $0x40] sm:$0xf]  ;;  %v1182_v51 = vld [vmem:[%s6613_s9 + $0xc] sm:$0xe] }
  0x3e   : > { %v5160_v48 = vcombine.low %v326_v27, %v336_v39  ;;  %v513_v4 = vrot.slane %v512_v28, 4  ;;  %v343_v49 = vrot.slane %v341_v34, 5  ;;  %v349_v50 = vrot.slane %v347_v37, 5 }
  0x3f   : > { %v523_v52 = vrot.slane %v522_v42, 4  ;;  %v351_v54 = vshrl.u32 %v6790_v9, 16  ;;  %v357_v55 = vshll.u32 %v6798_v33, 16  ;;  %v530_v57 = vshrl.u32 %v6803_v38, 16 }
  0x40   : > { %5891 = vmatmul.mubr.msk.bf16.gmra.mxu0 %vm675_vm3, %v5160_v48  ;;  %v518_v59 = vsel %vm6657_vm4, %v513_v4, %v517_v18  ;;  %v344_v0 = vor.u32 %v343_v49, %v340_v45  ;;  %v533_v2 = vshll.u32 %v6803_v38, 16  ;;  %v539_v3 = vshll.u32 %v6808_v47, 16  ;;  %v6836_v48 = vld [vmem:[%s6613_s9 + $0x44] sm:$0x1] }
  0x41   : > { %v528_v13 = vsel %vm6657_vm4, %v523_v52, %v527_v44  ;;  %v353_v17 = vrot.slane %v351_v54, 4  ;;  %v359_v20 = vrot.slane %v357_v55, 5  ;;  %v532_v22 = vrot.slane %v530_v57, 4  ;;  %v6841_v52 = vld [vmem:[%s6613_s9 + $0x9c] sm:$0xf] }
  0x42   : > { %v5168_v18 = vcombine.low %v518_v59, %v528_v13  ;;  %v345_v26 = vrot.slane %v344_v0, 4  ;;  %v535_v27 = vrot.slane %v533_v2, 5  ;;  %v541_v28 = vrot.slane %v539_v3, 5  ;;  %9501 = vst [vmem:[#allocation10_spill] sm:$0xff] %v6841_v52  ;;  %v6845_v13 = vld [vmem:[%s6613_s9 + $0xa0] sm:$0xf] }
  0x43   : > { %v354_v34 = vor.u32 %v353_v17, %v349_v50  ;;  %v543_v37 = vshrl.u32 %v6808_v47, 16  ;;  %v549_v39 = vshll.u32 %v6817_v16, 16  ;;  %v362_v42 = vshrl.u32 %v6822_v11, 16  ;;  %9502 = vst [vmem:[#allocation11_spill] sm:$0xff] %v6845_v13 }
  0x44   : > { %5907 = vmatmul.mubr.msk.bf16.gmra.mxu1 %vm675_vm3, %v5168_v18  ;;  %v350_v44 = vsel %vm6657_vm4, %v345_v26, %v349_v50  ;;  %v536_v45 = vor.u32 %v535_v27, %v532_v22  ;;  %v365_v4 = vshll.u32 %v6822_v11, 16  ;;  %v371_v49 = vshll.u32 %v6827_v23, 16  ;;  %v6851_v26 = vld [vmem:[%s6613_s9 + $0xa4] sm:$0x1] }
  0x45   : > { %v355_v54 = vrot.slane %v354_v34, 4  ;;  %v545_v55 = vrot.slane %v543_v37, 4  ;;  %v551_v57 = vrot.slane %v549_v39, 5  ;;  %v364_v59 = vrot.slane %v362_v42, 4  ;;  %9503 = vst [vmem:[#allocation12_spill] sm:$0xff] %v6851_v26 }
  0x46   : > { %v537_v0 = vrot.slane %v536_v45, 4  ;;  %v367_v2 = vrot.slane %v365_v4, 5  ;;  %v373_v3 = vrot.slane %v371_v49, 5  ;;  %v375_v50 = vshrl.u32 %v6827_v23, 16  ;;  %v6855_v34 = vld [vmem:[%s6613_s9 + $0x48] sm:$0xf] }
  0x47   : > { %v360_v17 = vsel %vm6657_vm4, %v355_v54, %v359_v20  ;;  %v546_v22 = vor.u32 %v545_v55, %v541_v28  ;;  %v381_v18 = vshll.u32 %v6836_v48, 16  ;;  %v554_v27 = vshrl.u32 %v6841_v52, 16 }
  0x48   : > { %v5161_v37 = vcombine.low %v350_v44, %v360_v17  ;;  %v542_v39 = vsel %vm6657_vm4, %v537_v0, %v541_v28  ;;  %v368_v42 = vor.u32 %v367_v2, %v364_v59  ;;  %v377_v45 = vrot.slane %v375_v50, 4  ;;  %v6864_v17 = vld [vmem:[%s6613_s9 + $0x4c] sm:$0xf]  ;;  %v6870_v2 = vld [vmem:[%s6613_s9 + $0x50] sm:$0x1] }
  0x49   : > { %v547_v4 = vrot.slane %v546_v22, 4  ;;  %v383_v49 = vrot.slane %v381_v18, 5  ;;  %v556_v20 = vrot.slane %v554_v27, 4  ;;  %v557_v54 = vshll.u32 %v6841_v52, 16 }
  0x4a   : > { %5894 = vmatprep.mubr.msk.bf16.mxu0 %vm675_vm3, %v5161_v37  ;;  %v369_v55 = vrot.slane %v368_v42, 4  ;;  %v378_v62 = vor.u32 %v377_v45, %v373_v3  ;;  %v563_v32 = vshll.u32 %v6845_v13, 16  ;;  %v567_v44 = vshrl.u32 %v6845_v13, 16  ;;  %v6876_v42 = vld [vmem:[%s6613_s9 + $0xa8] sm:$0xf] }
  0x4b   : > { %v552_v28 = vsel %vm6657_vm4, %v547_v4, %v551_v57  ;;  %v559_v59 = vrot.slane %v557_v54, 5  ;;  %v573_v0 = vshll.u32 %v6851_v26, 16  ;;  %v386_v50 = vshrl.u32 %v6855_v34, 16  ;;  %9504 = vst [vmem:[#allocation13_spill] sm:$0xff] %v6876_v42 }
  0x4c   : > { %v5169_v22 = vcombine.low %v542_v39, %v552_v28  ;;  %v374_v18 = vsel %vm6657_vm4, %v369_v55, %v373_v3  ;;  %v379_v27 = vrot.slane %v378_v62, 4  ;;  %v565_v37 = vrot.slane %v563_v32, 5 }
  0x4d   : > { %v560_v45 = vor.u32 %v559_v59, %v556_v20  ;;  %v569_v61 = vrot.slane %v567_v44, 4  ;;  %v575_v57 = vrot.slane %v573_v0, 5  ;;  %v388_v4 = vrot.slane %v386_v50, 4  ;;  %v6886_v44 = vld [vmem:[%s6613_s9 + $0xac] sm:$0xf] }
  0x4e   : > { %5910 = vmatprep.mubr.msk.bf16.mxu1 %vm675_vm3, %v5169_v22  ;;  %v384_v54 = vsel %vm6657_vm4, %v379_v27, %v383_v49  ;;  %v389_v39 = vshll.u32 %v6855_v34, 16  ;;  %v395_v28 = vshll.u32 %v6864_v17, 16  ;;  %v399_v62 = vshrl.u32 %v6864_v17, 16  ;;  %9505 = vst [vmem:[#allocation14_spill] sm:$0xff] %v6886_v44  ;;  %v6889_v22 = vld [vmem:[%s6613_s9 + $0xb0] sm:$0x1] }
  0x4f   : > { %v5162_v3 = vcombine.low %v374_v18, %v384_v54  ;;  %v561_v32 = vrot.slane %v560_v45, 4  ;;  %v570_v55 = vor.u32 %v569_v61, %v565_v37  ;;  %v405_v20 = vshll.u32 %v6870_v2, 16  ;;  %9506 = vst [vmem:[#allocation15_spill] sm:$0xff] %v6889_v22 }
  0x50   : > { %v391_v59 = vrot.slane %v389_v39, 5  ;;  %v397_v0 = vrot.slane %v395_v28, 5  ;;  %v401_v50 = vrot.slane %v399_v62, 4  ;;  %v578_v49 = vshrl.u32 %v6876_v42, 16  ;;  %v6898_v62 = vld [vmem:[%s6613_s9 + $0x54] sm:$0xf] }
  0x51   : > { %5895 = vmatmul.mubr.msk.bf16.gmra.mxu0 %vm675_vm3, %v5162_v3  ;;  %v566_v18 = vsel %vm6657_vm4, %v561_v32, %v565_v37  ;;  %v571_v27 = vrot.slane %v570_v55, 4  ;;  %v407_v61 = vrot.slane %v405_v20, 5  ;;  %v581_v45 = vshll.u32 %v6876_v42, 16  ;;  %v6905_v55 = vld [vmem:[%s6613_s9 + $0x58] sm:$0xf] }
  0x52   : > { %v392_v54 = vor.u32 %v391_v59, %v388_v4  ;;  %v402_v56 = vor.u32 %v401_v50, %v397_v0  ;;  %v580_v39 = vrot.slane %v578_v49, 4  ;;  %v587_v28 = vshll.u32 %v6886_v44, 16  ;;  %v6908_v49 = vld [vmem:[%s6613_s9 + $0x5c] sm:$0x1] }
  0x53   : > { %v576_v3 = vsel %vm6657_vm4, %v571_v27, %v575_v57  ;;  %v583_v26 = vrot.slane %v581_v45, 5  ;;  %v591_v37 = vshrl.u32 %v6886_v44, 16  ;;  %v597_v32 = vshll.u32 %v6889_v22, 16  ;;  %v1181_v22 = vld [vmem:[%s6613_s9] sm:$0xe] }
  0x54   : > { %v5170_v4 = vcombine.low %v566_v18, %v576_v3  ;;  %v393_v20 = vrot.slane %v392_v54, 4  ;;  %v403_v59 = vrot.slane %v402_v56, 4  ;;  %v589_v50 = vrot.slane %v587_v28, 5  ;;  %v6919_v54 = vld [vmem:[%s6613_s9 + $0xb4] sm:$0xf] }
  0x55   : > { %v584_v42 = vor.u32 %v583_v26, %v580_v39  ;;  %v593_v52 = vrot.slane %v591_v37, 4  ;;  %v599_v13 = vrot.slane %v597_v32, 5  ;;  %v410_v57 = vshrl.u32 %v6898_v62, 16  ;;  %9507 = vst [vmem:[#allocation16_spill] sm:$0xff] %v6919_v54  ;;  %v6922_v37 = vld [vmem:[%s6613_s9 + $0xb8] sm:$0xf] }
  0x56   : > { %5911 = vmatmul.mubr.msk.bf16.gmra.mxu1 %vm675_vm3, %v5170_v4  ;;  %v398_v27 = vsel %vm6657_vm4, %v393_v20, %v397_v0  ;;  %v408_v18 = vsel %vm6657_vm4, %v403_v59, %v407_v61  ;;  %v413_v56 = vshll.u32 %v6898_v62, 16  ;;  %v419_v45 = vshll.u32 %v6905_v55, 16  ;;  %v6927_v61 = vld [vmem:[%s6613_s9 + $0xbc] sm:$0x1] }
  0x57   : > { %v5163_v26 = vcombine.low %v398_v27, %v408_v18  ;;  %v585_v39 = vrot.slane %v584_v42, 4  ;;  %v594_v28 = vor.u32 %v593_v52, %v589_v50  ;;  %v412_v3 = vrot.slane %v410_v57, 4 }
  0x58   : > { %v415_v32 = vrot.slane %v413_v56, 5  ;;  %v421_v4 = vrot.slane %v419_v45, 5  ;;  %v423_v0 = vshrl.u32 %v6905_v55, 16  ;;  %v429_v20 = vshll.u32 %v6908_v49, 16 }
  0x59   : > { %5898 = vmatprep.mubr.msk.bf16.mxu0 %vm675_vm3, %v5163_v26  ;;  %v590_v59 = vsel %vm6657_vm4, %v585_v39, %v589_v50  ;;  %v595_v27 = vrot.slane %v594_v28, 4  ;;  %v602_v52 = vshrl.u32 %v6919_v54, 16  ;;  %v605_v42 = vshll.u32 %v6919_v54, 16 }
  0x5a   : > { %v416_v57 = vor.u32 %v415_v32, %v412_v3  ;;  %v425_v18 = vrot.slane %v423_v0, 4  ;;  %v431_v56 = vrot.slane %v429_v20, 5  ;;  %v611_v45 = vshll.u32 %v6922_v37, 16 }
  0x5b   : > { %v600_v44 = vsel %vm6657_vm4, %v595_v27, %v599_v13  ;;  %v604_v16 = vrot.slane %v602_v52, 4  ;;  %v607_v26 = vrot.slane %v605_v42, 5  ;;  %v615_v38 = vshrl.u32 %v6922_v37, 16 }
  0x5c   : > { %v5171_v50 = vcombine.low %v590_v59, %v600_v44  ;;  %v417_v39 = vrot.slane %v416_v57, 4  ;;  %v426_v28 = vor.u32 %v425_v18, %v421_v4  ;;  %v613_v47 = vrot.slane %v611_v45, 5  ;;  %v1183_v57 = vld [vmem:[%s6613_s9 + $0x18] sm:$0xe] }
  0x5d   : > { %v608_v54 = vor.u32 %v607_v26, %v604_v16  ;;  %v617_v3 = vrot.slane %v615_v38, 4  ;;  %v621_v32 = vshll.u32 %v6927_v61, 16  ;;  %v5221_v13 = vrot.slane %v1181_v22, 9 }
  0x5e   : > { %5914 = vmatprep.mubr.msk.bf16.mxu1 %vm675_vm3, %v5171_v50  ;;  %v422_v44 = vsel %vm6657_vm4, %v417_v39, %v421_v4  ;;  %v427_v20 = vrot.slane %v426_v28, 4  ;;  %v1234_v59 = vrot.slane %v6622_v6, 5  ;;  %v5190_v38 = vcombine.low %v6650_v29, %v6653_v30 }
  0x5f   : > { %v609_v16 = vrot.slane %v608_v54, 4  ;;  %v618_v27 = vor.u32 %v617_v3, %v613_v47  ;;  %v623_v52 = vrot.slane %v621_v32, 5  ;;  %v5222_v42 = vrot.slane %v1182_v51, 9 }
  0x60   : > { %v432_v18 = vsel %vm6657_vm4, %v427_v20, %v431_v56  ;;  %v1235_v22 = vsel %vm6943_vm7, %v5221_v13, %v1234_v59  ;;  %v1236_v45 = vrot.slane %v1234_v59, 4  ;;  %v9510_v4 = vrot.slane %v6653_v30, 5 }
  0x61   : > { %v5164_v50 = vcombine.low %v422_v44, %v432_v18  ;;  %v614_v54 = vsel %vm6657_vm4, %v609_v16, %v613_v47  ;;  %v619_v39 = vrot.slane %v618_v27, 4  ;;  %v5189_v51 = vcombine.low %v6619_v5, %v6622_v6  ;;  %v1184_v27 = vld [vmem:[%s6613_s9 + $0x24] sm:$0xe] }
  0x62   : > { %v1243_v26 = vrot.slane %v9510_v4, 4  ;;  %v9511_v28 = vrot.slane %v6625_v7, 5  ;;  %v9512_v3 = vmov %v9510_v4  ;;  %v5191_v13 = vcombine.low %v6692_v8, %v6699_v21  ;;  %v1186_v4 = vld [vmem:[%s6613_s9 + $0x3c] sm:$0xe] }
  0x63   : > { %v1242_v32 = vsel %vm6943_vm7, %v5222_v42, %v9512_v3  ;;  %v5223_v44 = vrot.slane %v1183_v57, 9  ;;  %5899 = vmatmul.mubr.msk.bf16.gmra.mxu0 %vm675_vm3, %v5164_v50  ;;  %v624_v47 = vsel %vm6657_vm4, %v619_v39, %v623_v52  ;;  %v9513_v6 = vrot.slane %v6663_v41, 5  ;;  %v1185_v42 = vld [vmem:[%s6613_s9 + $0x30] sm:$0xe]  ;;  %v1187_v39 = vld [vmem:[%s6613_s9 + $0x48] sm:$0xe] }
  0x64   : > { %v1238_v56 = vsel %vm6943_vm7, %v1236_v45, %v9511_v28  ;;  %v1248_v20 = vrot.slane %v6699_v21, 5  ;;  %v5172_v59 = vcombine.low %v614_v54, %v624_v47  ;;  %v1251_v16 = vrot.slane %v6705_v25, 5  ;;  %v1188_v47 = vld [vmem:[%s6613_s9 + $0x54] sm:$0xe]  ;;  %v7238_v21 = vld [vmem:[%s6613_s9 + $0x2c] sm:$0x1] }
  0x65   : > { %v5238_v5 = vcombine.low %v1235_v22, %v1238_v56  ;;  %v1245_v7 = vsel %vm6943_vm7, %v1243_v26, %v9513_v6  ;;  %v1805_v52 = vsel %vm724_vm0, %v6750_v19, 0  ;;  %v1255_v18 = vrot.slane %v6744_v10, 5 }
  0x66   : > { %v1249_v41 = vsel %vm6943_vm7, %v5223_v44, %v1248_v20  ;;  %v1250_v57 = vrot.slane %v1248_v20, 4  ;;  %5915 = vmatmul.mubr.msk.bf16.gmra.mxu1 %vm675_vm3, %v5172_v59  ;;  %v5239_v22 = vcombine.low %v1242_v32, %v1245_v7  ;;  %v2531_v25 = vsel %vm724_vm0, %v6718_v40, 0 }
  0x67   : > { %5954 = vmatprep.mubr.msk.bf16.mxu0 %vm675_vm3, %v5238_v5  ;;  %v1262_v45 = vrot.slane %v6790_v9, 5  ;;  %5920 = vmatprep.mubr.msk.bf16.mxu1 %vm675_vm3, %v5189_v51  ;;  %v5224_v26 = vrot.slane %v1184_v27, 9  ;;  %v1258_v50 = vrot.slane %v6755_v24, 5  ;;  %v5225_v54 = vrot.slane %v1185_v42, 9  ;;  %v7010_v24 = vld [vmem:[%s9456_s1 + $0x18] sm:$0xf] }
  0x68   : > { %v1252_v19 = vsel %vm6943_vm7, %v1250_v57, %v1251_v16  ;;  %v1257_v56 = vrot.slane %v1255_v18, 4  ;;  %v1265_v32 = vrot.slane %v6798_v33, 5  ;;  %v5226_v44 = vrot.slane %v1186_v4, 9 }
  0x69   : > { %v5240_v28 = vcombine.low %v1249_v41, %v1252_v19  ;;  %v1264_v3 = vrot.slane %v1262_v45, 4  ;;  %v1269_v40 = vrot.slane %v6827_v23, 5  ;;  %v1293_v5 = vrot.slane %v6639_v15, 5 }
  0x6a   : > { %v1272_v51 = vrot.slane %v6836_v48, 5  ;;  %v5227_v6 = vrot.slane %v1187_v39, 9  ;;  %v1276_v7 = vrot.slane %v6864_v17, 5  ;;  %v5192_v33 = vcombine.low %v6736_v1, %v6744_v10  ;;  %v1189_v1 = vld [vmem:[%s6613_s9 + $0x60] sm:$0xe] }
  0x6b   : > { %5955 = vmatmul.mubr.msk.bf16.vlgmr.msra.gmra.mxu0 %vm675_vm3, %v5239_v22  ;;  %v1256_v20 = vsel %vm6943_vm7, %v5224_v26, %v1255_v18  ;;  %v1271_v59 = vrot.slane %v1269_v40, 4  ;;  %v1279_v16 = vrot.slane %v6870_v2, 5  ;;  %v1259_v48 = vsel %vm6943_vm7, %v1257_v56, %v1258_v50  ;;  %v7038_v22 = vld [vmem:[%s9456_s1 + $0x14] sm:$0xf]  ;;  %v7063_v50 = vld [vmem:[%s6613_s9 + $0x6c] sm:$0xe] }
  0x6c   : > { %6021 = vmatpush3.bf16.msra.mxu0 %v2531_v25  ;;  %5958 = vmatprep.mubr.msk.bf16.mxu0 %vm675_vm3, %v5240_v28  ;;  %v1263_v27 = vsel %vm6943_vm7, %v5225_v54, %v1262_v45  ;;  %v1266_v42 = vsel %vm6943_vm7, %v1264_v3, %v1265_v32  ;;  %v1278_v41 = vrot.slane %v1276_v7, 4  ;;  %v7028_v10 = vsel %vm6943_vm7, %v5226_v44, %v1269_v40  ;;  %v1192_v39 = vld [vmem:[%s6613_s9 + $0x84] sm:$0xe]  ;;  %v7092_v44 = vld [vmem:[%s6613_s9 + $0x78] sm:$0xe] }
  0x6d   : > { %v7032_v2 = vsel %vm6943_vm7, %v5227_v6, %v1276_v7  ;;  %v5228_v57 = vrot.slane %v1188_v47, 9  ;;  %v1283_v18 = vrot.slane %v6905_v55, 5  ;;  %6199 = vmatprep.subr.msk.bf16.mxu0 %vm724_vm0, %v7010_v24  ;;  %v7048_v25 = vsel %vm6943_vm7, %v1271_v59, %v1272_v51  ;;  %v1193_v40 = vld [vmem:[%s6613_s9 + $0x90] sm:$0xe] }
  0x6e   : > { %5921 = vmatmul.mubr.msk.bf16.vlgmr.msra.gmra.mxu1 %vm675_vm3, %v5190_v38  ;;  %v7052_v45 = vsel %vm6943_vm7, %v1278_v41, %v1279_v16  ;;  %v1286_v4 = vrot.slane %v6908_v49, 5  ;;  %v1290_v19 = vrot.slane %v6636_v14, 5  ;;  %v5241_v29 = vcombine.low %v1256_v20, %v1259_v48  ;;  %v9514_v48 = vld [vmem:[#allocation6_spill] sm:$0xff] }
  0x6f   : > { %5987 = vmatpush3.bf16.msra.mxu1 %v1805_v52  ;;  %5924 = vmatprep.mubr.msk.bf16.mxu1 %vm675_vm3, %v5191_v13  ;;  %v5193_v30 = vcombine.low %v6785_v60, %v6790_v9  ;;  %v1285_v38 = vrot.slane %v1283_v18, 4  ;;  %v5229_v26 = vrot.slane %v1189_v1, 9  ;;  %v5242_v49 = vcombine.low %v1263_v27, %v1266_v42  ;;  %v1194_v42 = vld [vmem:[%s6613_s9 + $0x9c] sm:$0xe] }
  0x70   : > { %v5194_v52 = vcombine.low %v6822_v11, %v6827_v23  ;;  %v5195_v8 = vcombine.low %v6855_v34, %v6864_v17  ;;  %6198 = vmatprep.subr.msk.bf16.mxu1 %vm724_vm0, %v7038_v22  ;;  %v5243_v60 = vcombine.low %v7028_v10, %v7048_v25  ;;  %v5244_v9 = vcombine.low %v7032_v2, %v7052_v45  ;;  %v9515_v10 = vld [vmem:[#allocation8_spill] sm:$0xff]  ;;  %v9516_v2 = vld [vmem:[#allocation7_spill] sm:$0xff] }
  0x71   : > { %v1292_v54 = vrot.slane %v1290_v19, 4  ;;  %v7082_v28 = vsel %vm6943_vm7, %v5228_v57, %v1283_v18  ;;  %v7086_v56 = vsel %vm6943_vm7, %v1285_v38, %v1286_v4  ;;  %v5230_v32 = vrot.slane %v7063_v50, 9  ;;  %v1195_v18 = vld [vmem:[%s6613_s9 + $0xa8] sm:$0xe]  ;;  %v9518_v38 = vld [vmem:[#allocation11_spill] sm:$0xff] }
  0x72   : > { %v7098_v47 = vsel %vm6943_vm7, %v5229_v26, %v1290_v19  ;;  %v1297_v51 = vrot.slane %v6678_v58, 5  ;;  %v1300_v6 = vrot.slane %v6686_v63, 5  ;;  %v5232_v59 = vrot.slane %v1192_v39, 9  ;;  %v9517_v19 = vld [vmem:[#allocation9_spill] sm:$0xff]  ;;  %v9519_v26 = vld [vmem:[#allocation10_spill] sm:$0xff] }
  0x73   : > { %5959 = vmatmul.mubr.msk.bf16.gmra.mxu0 %vm675_vm3, %v5241_v29  ;;  %v1311_v16 = vrot.slane %v6769_v43, 5  ;;  %v1314_v27 = vrot.slane %v9514_v48, 5  ;;  %v5245_v41 = vcombine.low %v7082_v28, %v7086_v56  ;;  %v7116_v63 = vsel %vm6943_vm7, %v1292_v54, %v1293_v5  ;;  %v9521_v48 = vld [vmem:[#allocation14_spill] sm:$0xff] }
  0x74   : > { %5962 = vmatprep.mubr.msk.bf16.mxu0 %vm675_vm3, %v5242_v49  ;;  %v5231_v1 = vrot.slane %v7092_v44, 9  ;;  %v5233_v4 = vrot.slane %v1193_v40, 9  ;;  %v1318_v15 = vrot.slane %v9515_v10, 5  ;;  %v1299_v5 = vrot.slane %v1297_v51, 4  ;;  %v5335_v57 = vld [vmem:[%s6613_s9 + $0xc] sm:$0xf] }
  0x75   : > { %v7125_v25 = vsel %vm6943_vm7, %v5232_v59, %v1311_v16  ;;  %v1313_v45 = vrot.slane %v1311_v16, 4  ;;  %v1321_v29 = vrot.slane %v9517_v19, 5  ;;  %v5234_v49 = vrot.slane %v1194_v42, 9  ;;  %v9520_v59 = vld [vmem:[#allocation12_spill] sm:$0xff]  ;;  %v9522_v42 = vld [vmem:[#allocation13_spill] sm:$0xff] }
  0x76   : > { %5925 = vmatmul.mubr.msk.bf16.gmra.mxu1 %vm675_vm3, %v5192_v33  ;;  %v1304_v33 = vrot.slane %v6723_v46, 5  ;;  %v7139_v39 = vsel %vm6943_vm7, %v5233_v4, %v1318_v15  ;;  %v1320_v44 = vrot.slane %v1318_v15, 4  ;;  %v1325_v40 = vrot.slane %v9518_v38, 5  ;;  %v9523_v15 = vld [vmem:[#allocation15_spill] sm:$0xff] }
  0x77   : > { %5928 = vmatprep.mubr.msk.bf16.mxu1 %vm675_vm3, %v5193_v30  ;;  %v7135_v54 = vsel %vm6943_vm7, %v1313_v45, %v1314_v27  ;;  %v1328_v16 = vrot.slane %v9520_v59, 5  ;;  %v5235_v45 = vrot.slane %v1195_v18, 9  ;;  %v1332_v4 = vrot.slane %v9521_v48, 5 }
  0x78   : > { %v7149_v27 = vsel %vm6943_vm7, %v1320_v44, %v1321_v29  ;;  %v1335_v50 = vrot.slane %v9523_v15, 5  ;;  %v7159_v19 = vsel %vm6943_vm7, %v5234_v49, %v1325_v40  ;;  %v1327_v7 = vrot.slane %v1325_v40, 4  ;;  %v9524_v29 = vld [vmem:[#allocation16_spill] sm:$0xff]  ;;  %v9525_v15 = vld [vmem:[#allocation5_spill] sm:$0xff]  ;;  %v7174_v49 = vld [vmem:[%s6613_s9 + $0x10] sm:$0xf] }
  0x79   : > { %v7166_v18 = vsel %vm6943_vm7, %v5230_v32, %v1297_v51  ;;  %v7171_v59 = vsel %vm6943_vm7, %v5235_v45, %v1332_v4  ;;  %v1334_v30 = vrot.slane %v1332_v4, 4  ;;  %v5338_v40 = vld [vmem:[%s6613_s9 + $0x18] sm:$0xf]  ;;  %v1306_v20 = vrot.slane %v1304_v33, 4 }
  0x7a   : > { %v2049_v44 = vshrl.u32 %v5335_v57, 16  ;;  %v2052_v32 = vshll.u32 %v5335_v57, 16  ;;  %v5246_v51 = vcombine.low %v7098_v47, %v7116_v63  ;;  %v7189_v45 = vsel %vm6943_vm7, %v1299_v5, %v1300_v6  ;;  %v1196_v57 = vld [vmem:[%s6613_s9 + $0xb4] sm:$0xe]  ;;  %v7210_v47 = vld [vmem:[%s6613_s9 + $0x14] sm:$0x1] }
  0x7b   : > { %5963 = vmatmul.mubr.msk.bf16.gmra.mxu0 %vm675_vm3, %v5243_v60  ;;  %v1307_v60 = vrot.slane %v9525_v15, 5  ;;  %v7204_v11 = vsel %vm6943_vm7, %v5231_v1, %v1304_v33  ;;  %v2058_v6 = vshll.u32 %v7174_v49, 16  ;;  %v5339_v63 = vld [vmem:[%s6613_s9 + $0x1c] sm:$0xf]  ;;  %v2062_v17 = vshrl.u32 %v7174_v49, 16 }
  0x7c   : > { %5966 = vmatprep.mubr.msk.bf16.mxu0 %vm675_vm3, %v5244_v9  ;;  %v7179_v9 = vsel %vm6943_vm7, %v1327_v7, %v1328_v16  ;;  %v7195_v7 = vsel %vm6943_vm7, %v1334_v30, %v1335_v50  ;;  %v2051_v5 = vrot.slane %v2049_v44, 4  ;;  %v2054_v34 = vrot.slane %v2052_v32, 5  ;;  %v5341_v15 = vld [vmem:[%s6613_s9 + $0x24] sm:$0xf]  ;;  %v7223_v44 = vld [vmem:[%s6613_s9 + $0x28] sm:$0xf] }
  0x7d   : > { %v2073_v50 = vshrl.u32 %v5338_v40, 16  ;;  %v1308_v1 = vsel %vm6943_vm7, %v1306_v20, %v1307_v60  ;;  %v5236_v33 = vrot.slane %v1196_v57, 9  ;;  %v7218_v30 = vrot.slane %v2058_v6, 5 }
  0x7e   : > { %5929 = vmatmul.mubr.msk.bf16.gmra.mxu1 %vm675_vm3, %v5194_v52  ;;  %v1339_v52 = vrot.slane %v6922_v37, 5  ;;  %v2076_v16 = vshll.u32 %v5338_v40, 16  ;;  %v1342_v23 = vrot.slane %v6927_v61, 5  ;;  %v2064_v4 = vrot.slane %v2062_v17, 4 }
  0x7f   : > { %5932 = vmatprep.mubr.msk.bf16.mxu1 %vm675_vm3, %v5195_v8  ;;  %v5340_v8 = vld [vmem:[%s6613_s9 + $0x20] sm:$0x1]  ;;  %v2075_v3 = vrot.slane %v2073_v50, 4  ;;  %v2082_v13 = vshll.u32 %v5339_v63, 16  ;;  %v2068_v20 = vshll.u32 %v7210_v47, 16  ;;  %v2086_v57 = vshrl.u32 %v5339_v63, 16 }
  0x80   : > { %v1341_v32 = vrot.slane %v1339_v52, 4  ;;  %v2078_v60 = vrot.slane %v2076_v16, 5  ;;  %v5247_v61 = vcombine.low %v7166_v18, %v7189_v45  ;;  %v5248_v40 = vcombine.low %v7204_v11, %v1308_v1 }
  0x81   : > { %v2055_v6 = vor.u32 %v2054_v34, %v2051_v5  ;;  %v7234_v17 = vrot.slane %v2082_v13, 5  ;;  %v2065_v28 = vor.u32 %v2064_v4, %v7218_v30  ;;  %v2092_v50 = vshll.u32 %v5340_v8, 16  ;;  %v7261_v5 = vld [vmem:[%s6613_s9 + $0x34] sm:$0xf] }
  0x82   : > { %v2079_v56 = vor.u32 %v2078_v60, %v2075_v3  ;;  %v7246_v18 = vsel %vm6943_vm7, %v5236_v33, %v1339_v52  ;;  %v2097_v13 = vshrl.u32 %v5341_v15, 16  ;;  %v2100_v45 = vshll.u32 %v5341_v15, 16  ;;  %v5344_v52 = vld [vmem:[%s6613_s9 + $0x30] sm:$0xf] }
  0x83   : > { %5967 = vmatmul.mubr.msk.bf16.gmra.mxu0 %vm675_vm3, %v5245_v41  ;;  %v2088_v41 = vrot.slane %v2086_v57, 4  ;;  %v2106_v11 = vshll.u32 %v7223_v44, 16  ;;  %v9527_v3 = vcombine.low %v6632_v12, %v6636_v14  ;;  %v7255_v4 = vsel %vm6943_vm7, %v1341_v32, %v1342_v23 }
  0x84   : > { %5970 = vmatprep.mubr.msk.bf16.mxu0 %vm675_vm3, %v5246_v51  ;;  %v9526_v51 = vcombine.low %v6898_v62, %v6905_v55  ;;  %v2070_v62 = vrot.slane %v2068_v20, 5  ;;  %v2110_v63 = vshrl.u32 %v7223_v44, 16  ;;  %v2056_v34 = vrot.slane %v2055_v6, 4 }
  0x85   : > { %v2089_v55 = vor.u32 %v2088_v41, %v7234_v17  ;;  %v2099_v8 = vrot.slane %v2097_v13, 4  ;;  %v2102_v1 = vrot.slane %v2100_v45, 5  ;;  %v7263_v33 = vrot.slane %v2106_v11, 5  ;;  %v7269_v41 = vld [vmem:[%s6613_s9 + $0x38] sm:$0x1] }
  0x86   : > { %5933 = vmatmul.mubr.msk.bf16.gmra.mxu1 %vm675_vm3, %v9526_v51  ;;  %v2066_v12 = vrot.slane %v2065_v28, 4  ;;  %v2080_v14 = vrot.slane %v2079_v56, 4  ;;  %v2094_v16 = vrot.slane %v2092_v50, 5  ;;  %v2112_v23 = vrot.slane %v2110_v63, 4  ;;  %v5347_v13 = vld [vmem:[%s6613_s9 + $0x3c] sm:$0xf] }
  0x87   : > { %5936 = vmatprep.mubr.msk.bf16.mxu1 %vm675_vm3, %v9527_v3  ;;  %v2090_v15 = vrot.slane %v2089_v55, 4  ;;  %v2116_v32 = vshll.u32 %v7238_v21, 16  ;;  %v2121_v20 = vshrl.u32 %v5344_v52, 16  ;;  %v2124_v60 = vshll.u32 %v5344_v52, 16 }
  0x88   : > { %v2103_v57 = vor.u32 %v2102_v1, %v2099_v8  ;;  %v2113_v6 = vor.u32 %v2112_v23, %v7263_v33  ;;  %v2130_v28 = vshll.u32 %v7261_v5, 16  ;;  %v2134_v56 = vshrl.u32 %v7261_v5, 16  ;;  %v5350_v8 = vld [vmem:[%s6613_s9 + $0x48] sm:$0xf]  ;;  %v7296_v1 = vld [vmem:[%s6613_s9 + $0x4c] sm:$0xf] }
  0x89   : > { %v2123_v50 = vrot.slane %v2121_v20, 4  ;;  %v2126_v51 = vrot.slane %v2124_v60, 5  ;;  %v9528_v3 = vcombine.low %v6674_v53, %v6678_v58  ;;  %v5253_v55 = vcombine.low %v7246_v18, %v7255_v4 }
  0x8a   : > { %v7275_v45 = vrot.slane %v2130_v28, 5  ;;  %v2136_v11 = vrot.slane %v2134_v56, 4  ;;  %v2071_v63 = vsel %vm6657_vm4, %v2066_v12, %v2070_v62  ;;  %v2085_v52 = vsel %vm6657_vm4, %v2080_v14, %v7234_v17 }
  0x8b   : > { %5971 = vmatmul.mubr.msk.bf16.gmra.mxu0 %vm675_vm3, %v5247_v61  ;;  %v7278_v61 = vld [vmem:[%s6613_s9 + $0x40] sm:$0xf]  ;;  %v9529_v53 = vcombine.low %v6712_v35, %v6723_v46  ;;  %v2095_v58 = vsel %vm6657_vm4, %v2090_v15, %v2094_v16  ;;  %v2104_v23 = vrot.slane %v2103_v57, 4  ;;  %v2127_v20 = vor.u32 %v2126_v51, %v2123_v50  ;;  %v7330_v50 = vld [vmem:[%s6613_s9 + $0x44] sm:$0x1] }
  0x8c   : > { %5974 = vmatprep.mubr.msk.bf16.mxu0 %vm675_vm3, %v5248_v40  ;;  %v2061_v40 = vsel %vm6657_vm4, %v2056_v34, %v7218_v30  ;;  %v2114_v30 = vrot.slane %v2113_v6, 4  ;;  %v2118_v34 = vrot.slane %v2116_v32, 5  ;;  %v2140_v62 = vshll.u32 %v7269_v41, 16  ;;  %v5353_v51 = vld [vmem:[%s6613_s9 + $0x54] sm:$0xf] }
  0x8d   : > { %v2145_v12 = vshrl.u32 %v5347_v13, 16  ;;  %v2148_v17 = vshll.u32 %v5347_v13, 16  ;;  %v7307_v14 = vsel %vm724_vm0, %v7038_v22, 0  ;;  %v2137_v35 = vor.u32 %v2136_v11, %v7275_v45 }
  0x8e   : > { %5937 = vmatmul.mubr.msk.bf16.gmra.mxu1 %vm675_vm3, %v9528_v3  ;;  %v2154_v46 = vshll.u32 %v7278_v61, 16  ;;  %v2158_v16 = vshrl.u32 %v7278_v61, 16  ;;  %v7312_v15 = vcombine.low %v2061_v40, %v2071_v63  ;;  %v7316_v32 = vsel %vm724_vm0, %v7010_v24, 0  ;;  %v7339_v40 = vld [vmem:[%s6613_s9 + $0x58] sm:$0xf] }
  0x8f   : > { %5940 = vmatprep.mubr.msk.bf16.mxu1 %vm675_vm3, %v9529_v53  ;;  %v2169_v60 = vshrl.u32 %v5350_v8, 16  ;;  %v2172_v57 = vshll.u32 %v5350_v8, 16  ;;  %v9530_v6 = vcombine.low %v7125_v25, %v7135_v54  ;;  %v7322_v22 = vcombine.low %v2085_v52, %v2095_v58  ;;  %v7344_v8 = vld [vmem:[%s6613_s9 + $0x50] sm:$0x1] }
  0x90   : > { %v2109_v28 = vsel %vm6657_vm4, %v2104_v23, %v7263_v33  ;;  %v2119_v56 = vsel %vm6657_vm4, %v2114_v30, %v2118_v34  ;;  %v2178_v24 = vshll.u32 %v7296_v1, 16  ;;  %v9531_v25 = vcombine.low %v7139_v39, %v7149_v27  ;;  %v5356_v34 = vld [vmem:[%s6613_s9 + $0x60] sm:$0xf] }
  0x91   : > { %v2128_v54 = vrot.slane %v2127_v20, 4  ;;  %v2142_v13 = vrot.slane %v2140_v62, 5  ;;  %v2147_v11 = vrot.slane %v2145_v12, 4  ;;  %v2150_v3 = vrot.slane %v2148_v17, 5 }
  0x92   : > { %v2138_v33 = vrot.slane %v2137_v35, 4  ;;  %v7341_v63 = vrot.slane %v2154_v46, 5  ;;  %v2160_v52 = vrot.slane %v2158_v16, 4  ;;  %v2182_v53 = vshrl.u32 %v7296_v1, 16  ;;  %v7361_v35 = vld [vmem:[%s6613_s9 + $0x5c] sm:$0x1] }
  0x93   : > { %5975 = vmatmul.mubr.msk.bf16.gmra.mxu0 %vm675_vm3, %v9530_v6  ;;  %v9532_v39 = vcombine.low %v6762_v36, %v6769_v43  ;;  %v2171_v27 = vrot.slane %v2169_v60, 4  ;;  %v2174_v58 = vrot.slane %v2172_v57, 5  ;;  %v2193_v23 = vshrl.u32 %v5353_v51, 16 }
  0x94   : > { %5978 = vmatprep.mubr.msk.bf16.mxu0 %vm675_vm3, %v9531_v25  ;;  %v2196_v30 = vshll.u32 %v5353_v51, 16  ;;  %v9533_v20 = vcombine.low %v9516_v2, %v9515_v10  ;;  %v7356_v62 = vcombine.low %v2109_v28, %v2119_v56  ;;  %v7358_v12 = vrot.slane %v2178_v24, 5  ;;  %v7374_v28 = vld [vmem:[%s6613_s9 + $0x64] sm:$0xf] }
  0x95   : > { %v2184_v17 = vrot.slane %v2182_v53, 4  ;;  %v2202_v36 = vshll.u32 %v7339_v40, 16  ;;  %v2164_v43 = vshll.u32 %v7330_v50, 16  ;;  %v2195_v46 = vrot.slane %v2193_v23, 4 }
  0x96   : > { %5941 = vmatmul.mubr.msk.bf16.gmra.mxu1 %vm675_vm3, %v9532_v39  ;;  %v2198_v16 = vrot.slane %v2196_v30, 5  ;;  %v2206_v60 = vshrl.u32 %v7339_v40, 16  ;;  %v2133_v10 = vsel %vm6657_vm4, %v2128_v54, %v7275_v45  ;;  %v2143_v2 = vsel %vm6657_vm4, %v2138_v33, %v2142_v13  ;;  %v7396_v30 = vld [vmem:[%s6613_s9 + $0x68] sm:$0x1] }
  0x97   : > { %5944 = vmatprep.mubr.msk.bf16.mxu1 %vm675_vm3, %v9533_v20  ;;  %v2151_v57 = vor.u32 %v2150_v3, %v2147_v11  ;;  %v7371_v6 = vrot.slane %v2202_v36, 5  ;;  %v2161_v56 = vor.u32 %v2160_v52, %v7341_v63  ;;  %v2175_v24 = vor.u32 %v2174_v58, %v2171_v27  ;;  %v5359_v3 = vld [vmem:[%s6613_s9 + $0x6c] sm:$0xf]  ;;  %v7393_v27 = vld [vmem:[%s6613_s9 + $0x70] sm:$0xf] }
  0x98   : > { %v2188_v51 = vshll.u32 %v7344_v8, 16  ;;  %v2208_v25 = vrot.slane %v2206_v60, 4  ;;  %v9534_v53 = vcombine.low %v7159_v19, %v7179_v9  ;;  %v2185_v45 = vor.u32 %v2184_v17, %v7358_v12 }
  0x99   : > { %v2199_v54 = vor.u32 %v2198_v16, %v2195_v46  ;;  %v2217_v13 = vshrl.u32 %v5356_v34, 16  ;;  %v2220_v11 = vshll.u32 %v5356_v34, 16  ;;  %v9535_v33 = vcombine.low %v7171_v59, %v7195_v7  ;;  %v5362_v16 = vld [vmem:[%s6613_s9 + $0x78] sm:$0xf] }
  0x9a   : > { %v2209_v52 = vor.u32 %v2208_v25, %v7371_v6  ;;  %v2212_v39 = vshll.u32 %v7361_v35, 16  ;;  %v2226_v19 = vshll.u32 %v7374_v28, 16  ;;  %v2230_v9 = vshrl.u32 %v7374_v28, 16 }
  0x9b   : > { %5979 = vmatmul.mubr.msk.bf16.gmra.mxu0 %vm675_vm3, %v9534_v53  ;;  %v2152_v58 = vrot.slane %v2151_v57, 4  ;;  %v2166_v23 = vrot.slane %v2164_v43, 5  ;;  %v2219_v34 = vrot.slane %v2217_v13, 4  ;;  %v2222_v20 = vrot.slane %v2220_v11, 5 }
  0x9c   : > { %5982 = vmatprep.mubr.msk.bf16.mxu0 %vm675_vm3, %v9535_v33  ;;  %v9536_v59 = vcombine.low %v9519_v26, %v9518_v38  ;;  %v7402_v7 = vcombine.low %v2133_v10, %v2143_v2  ;;  %v2162_v17 = vrot.slane %v2161_v56, 4  ;;  %v2176_v36 = vrot.slane %v2175_v24, 4  ;;  %v7412_v2 = vld [vmem:[%s6613_s9 + $0x7c] sm:$0xf] }
  0x9d   : > { %v7404_v46 = vrot.slane %v2226_v19, 5  ;;  %v9537_v43 = vcombine.low %v9522_v42, %v9521_v48  ;;  %v2186_v60 = vrot.slane %v2185_v45, 4  ;;  %v2190_v57 = vrot.slane %v2188_v51, 5  ;;  %9538 = vst [vmem:[#allocation6_spill] sm:$0xff] %v7412_v2  ;;  %v5365_v19 = vld [vmem:[%s6613_s9 + $0x84] sm:$0xf] }
  0x9e   : > { %5945 = vmatmul.mubr.msk.bf16.gmra.mxu1 %vm675_vm3, %v9536_v59  ;;  %v2200_v25 = vrot.slane %v2199_v54, 4  ;;  %v2232_v38 = vrot.slane %v2230_v9, 4  ;;  %v2210_v26 = vrot.slane %v2209_v52, 4  ;;  %v2214_v53 = vrot.slane %v2212_v39, 5 }
  0x9f   : > { %5948 = vmatprep.mubr.msk.bf16.mxu1 %vm675_vm3, %v9537_v43  ;;  %v2223_v13 = vor.u32 %v2222_v20, %v2219_v34  ;;  %v2241_v10 = vshrl.u32 %v5359_v3, 16  ;;  %v2157_v56 = vsel %vm6657_vm4, %v2152_v58, %v7341_v63  ;;  %v2244_v24 = vshll.u32 %v5359_v3, 16  ;;  %v6276_v63 = vld [vmem:[%s6613_s9 + $0xc] sm:$0xff]   ;;  %v7446_v34 = vld [vmem:[%s6613_s9 + $0x88] sm:$0xf] }
  0xa0   : > { %v2250_v48 = vshll.u32 %v7393_v27, 16  ;;  %v2254_v42 = vshrl.u32 %v7393_v27, 16  ;;  %v2167_v51 = vsel %vm6657_vm4, %v2162_v17, %v2166_v23  ;;  %v2181_v45 = vsel %vm6657_vm4, %v2176_v36, %v7358_v12  ;;  %9539 = vst [vmem:[#allocation8_spill] sm:$0xff] %v7446_v34  ;;  %v7455_v36 = vld [vmem:[%s6613_s9 + $0x74] sm:$0x1] }
  0xa1   : > { %v2233_v54 = vor.u32 %v2232_v38, %v7404_v46  ;;  %v2236_v11 = vshll.u32 %v7396_v30, 16  ;;  %v2191_v3 = vsel %vm6657_vm4, %v2186_v60, %v2190_v57  ;;  %v2205_v33 = vsel %vm6657_vm4, %v2200_v25, %v7371_v6  ;;  %9541 = vst [vmem:[#allocation7_spill] sm:$0xff] %v7455_v36  ;;  %v7465_v38 = vld [vmem:[%s6613_s9 + $0x80] sm:$0x1] }
  0xa2   : > { %v2265_v52 = vshrl.u32 %v5362_v16, 16  ;;  %v2268_v12 = vshll.u32 %v5362_v16, 16  ;;  %v2215_v18 = vsel %vm6657_vm4, %v2210_v26, %v2214_v53  ;;  %v2224_v4 = vrot.slane %v2223_v13, 4  ;;  %9542 = vst [vmem:[#allocation9_spill] sm:$0xff] %v7465_v38  ;;  %v7468_v26 = vld [vmem:[%s6613_s9 + $0x8c] sm:$0x1] }
  0xa3   : > { %5983 = vmatmul.mubr.msk.bf16.gmra.mxu0 %vm675_vm3, %v5253_v55  ;;  %v2243_v55 = vrot.slane %v2241_v10, 4  ;;  %v2274_v39 = vshll.u32 %v7412_v2, 16  ;;  %v2246_v9 = vrot.slane %v2244_v24, 5  ;;  %v7442_v58 = vrot.slane %v2250_v48, 5  ;;  %9543 = vst [vmem:[#allocation11_spill] sm:$0xff] %v7468_v26  ;;  %v6277_v10 = vld [vmem:[%s6613_s9 + $0x18] sm:$0xff]  }
  0xa4   : > { %6022 = vmatprep.mubr.msk.bf16.mxu0 %vm675_vm3, %v7312_v15  ;;  %v2256_v23 = vrot.slane %v2254_v42, 4  ;;  %v2278_v6 = vshrl.u32 %v7412_v2, 16  ;;  %v9540_v15 = vcombine.low %v9524_v29, %v6922_v37  ;;  %v7452_v20 = vcombine.low %v2157_v56, %v2167_v51  ;;  %v5368_v51 = vld [vmem:[%s6613_s9 + $0x90] sm:$0xf] }
  0xa5   : > { %v2234_v59 = vrot.slane %v2233_v54, 4  ;;  %v2238_v17 = vrot.slane %v2236_v11, 5  ;;  %v2267_v16 = vrot.slane %v2265_v52, 4  ;;  %v2270_v43 = vrot.slane %v2268_v12, 5 }
  0xa6   : > { %5949 = vmatmul.mubr.msk.bf16.gmra.mxu1 %vm675_vm3, %v9540_v15  ;;  %v7458_v60 = vrot.slane %v2274_v39, 5  ;;  %v2280_v57 = vrot.slane %v2278_v6, 4  ;;  %v2289_v25 = vshrl.u32 %v5365_v19, 16  ;;  %v7460_v37 = vcombine.low %v2181_v45, %v2191_v3  ;;  %v7479_v45 = vld [vmem:[%s6613_s9 + $0x94] sm:$0xf] }
  0xa7   : > { %5988 = vmatprep.mubr.msk.bf16.mxu1 %vm675_vm3, %v6276_v63  ;;  %v7462_v29 = vcombine.low %v2205_v33, %v2215_v18  ;;  %v2292_v53 = vshll.u32 %v5365_v19, 16  ;;  %v2298_v13 = vshll.u32 %v7446_v34, 16  ;;  %v2229_v56 = vsel %vm6657_vm4, %v2224_v4, %v7404_v46  ;;  %9544 = vst [vmem:[#allocation10_spill] sm:$0xff] %v7479_v45  ;;  %v7487_v33 = vld [vmem:[%s9456_s1 + $0x20] sm:$0xf]  ;;  %v6278_v46 = vld [vmem:[%s6613_s9 + $0x24] sm:$0xff]  }
  0xa8   : > { %v2247_v24 = vor.u32 %v2246_v9, %v2243_v55  ;;  %v2257_v48 = vor.u32 %v2256_v23, %v7442_v58  ;;  %v2260_v42 = vshll.u32 %v7455_v36, 16  ;;  %v2291_v54 = vrot.slane %v2289_v25, 4  ;;  %9545 = vst [vmem:[#allocation12_spill] sm:$0xff] %v7487_v33 }
  0xa9   : > { %v2294_v11 = vrot.slane %v2292_v53, 5  ;;  %v7481_v63 = vrot.slane %v2298_v13, 5  ;;  %v2302_v3 = vshrl.u32 %v7446_v34, 16  ;;  %v2239_v52 = vsel %vm6657_vm4, %v2234_v59, %v2238_v17 }
  0xaa   : > { %v2271_v12 = vor.u32 %v2270_v43, %v2267_v16  ;;  %v2281_v18 = vor.u32 %v2280_v57, %v7458_v60  ;;  %v2284_v4 = vshll.u32 %v7465_v38, 16  ;;  %v2313_v19 = vshrl.u32 %v5368_v51, 16  ;;  %v7521_v57 = vld [vmem:[%s6613_s9 + $0xa0] sm:$0xf] }
  0xab   : > { %6023 = vmatmul.mubr.msk.bf16.vlgmr.msra.gmra.mxu0 %vm675_vm3, %v7322_v22  ;;  %v2295_v55 = vor.u32 %v2294_v11, %v2291_v54  ;;  %v2304_v39 = vrot.slane %v2302_v3, 4  ;;  %v2316_v9 = vshll.u32 %v5368_v51, 16  ;;  %v5371_v22 = vld [vmem:[%s6613_s9 + $0x9c] sm:$0xf]  ;;  %v7500_v23 = vrot.slane %v2247_v24, 4  ;;  %9547 = vst [vmem:[#allocation13_spill] sm:$0xff] %v7521_v57 }
  0xac   : > { %6089 = vmatpush3.bf16.msra.mxu0 %v7316_v32  ;;  %6026 = vmatprep.mubr.msk.bf16.mxu0 %vm675_vm3, %v7356_v62  ;;  %v7502_v6 = vrot.slane %v2260_v42, 5  ;;  %v2308_v15 = vshll.u32 %v7468_v26, 16  ;;  %v2322_v59 = vshll.u32 %v7479_v45, 16  ;;  %v7509_v32 = vld [vmem:[%s9456_s1 + $0x1c] sm:$0xf]  ;;  %v7514_v62 = vcombine.low %v2229_v56, %v2239_v52 }
  0xad   : > { %9546 = vst [vmem:[#allocation14_spill] sm:$0xff] %v7509_v32  ;;  %6201 = vmatprep.subr.msk.bf16.mxu0 %vm724_vm0, %v7487_v33  ;;  %v7516_v17 = vrot.slane %v2257_v48, 4  ;;  %v2305_v16 = vor.u32 %v2304_v39, %v7481_v63  ;;  %v2326_v43 = vshrl.u32 %v7479_v45, 16  ;;  %v7525_v25 = vrot.slane %v2271_v12, 4  ;;  %v7534_v56 = vld [vmem:[%s6613_s9 + $0x98] sm:$0x1] }
  0xae   : > { %5989 = vmatmul.mubr.msk.bf16.vlgmr.msra.gmra.mxu1 %vm675_vm3, %v6277_v10  ;;  %v7527_v53 = vrot.slane %v2281_v18, 4  ;;  %v7529_v13 = vrot.slane %v2284_v4, 5  ;;  %v7531_v10 = vrot.slane %v2295_v55, 4  ;;  %9548 = vst [vmem:[#allocation15_spill] sm:$0xff] %v7534_v56  ;;  %v2315_v24 = vrot.slane %v2313_v19, 4  ;;  %v6280_v19 = vld [vmem:[%s6613_s9 + $0x3c] sm:$0xff]  }
  0xaf   : > { %6055 = vmatpush3.bf16.msra.mxu1 %v7307_v14  ;;  %5992 = vmatprep.mubr.msk.bf16.mxu1 %vm675_vm3, %v6278_v46  ;;  %v2318_v48 = vrot.slane %v2316_v9, 5  ;;  %v2337_v42 = vshrl.u32 %v5371_v22, 16  ;;  %v2340_v51 = vshll.u32 %v5371_v22, 16  ;;  %v6279_v14 = vld [vmem:[%s6613_s9 + $0x30] sm:$0xff]   ;;  %v7543_v11 = vrot.slane %v2308_v15, 5 }
  0xb0   : > { %6200 = vmatprep.subr.msk.bf16.mxu1 %vm724_vm0, %v7509_v32  ;;  %v7545_v3 = vrot.slane %v2322_v59, 5  ;;  %v2346_v46 = vshll.u32 %v7521_v57, 16  ;;  %v5374_v52 = vld [vmem:[%s6613_s9 + $0xa8] sm:$0xf]  ;;  %v7549_v12 = vrot.slane %v2305_v16, 4  ;;  %v2328_v18 = vrot.slane %v2326_v43, 4 }
  0xb1   : > { %v2332_v4 = vshll.u32 %v7534_v56, 16  ;;  %v2350_v55 = vshrl.u32 %v7521_v57, 16  ;;  %v7554_v39 = vld [vmem:[%s6613_s9 + $0xac] sm:$0xf]  ;;  %v2319_v59 = vor.u32 %v2318_v48, %v2315_v24  ;;  %v7578_v16 = vld [vmem:[%s6613_s9 + $0xa4] sm:$0x1] }
  0xb2   : > { %9549 = vst [vmem:[#allocation16_spill] sm:$0xff] %v7554_v39  ;;  %9550 = vst [vmem:[#allocation5_spill] sm:$0xff] %v7578_v16  ;;  %v2339_v43 = vrot.slane %v2337_v42, 4  ;;  %v2342_v22 = vrot.slane %v2340_v51, 5  ;;  %v2361_v54 = vshrl.u32 %v5374_v52, 16  ;;  %v7580_v9 = vrot.slane %v2346_v46, 5 }
  0xb3   : > { %6027 = vmatmul.mubr.msk.bf16.gmra.mxu0 %vm675_vm3, %v7402_v7  ;;  %v2352_v32 = vrot.slane %v2350_v55, 4  ;;  %v2364_v15 = vshll.u32 %v5374_v52, 16  ;;  %v2370_v33 = vshll.u32 %v7554_v39, 16  ;;  %v5377_v57 = vld [vmem:[%s6613_s9 + $0xb4] sm:$0xf]  ;;  %v2329_v24 = vor.u32 %v2328_v18, %v7545_v3 }
  0xb4   : > { %6030 = vmatprep.mubr.msk.bf16.mxu0 %vm675_vm3, %v7452_v20  ;;  %v2311_v20 = vsel %vm6657_vm4, %v7549_v12, %v7543_v11  ;;  %v7590_v48 = vrot.slane %v2332_v4, 5  ;;  %v7593_v42 = vld [vmem:[%s6613_s9 + $0xb0] sm:$0x1]  ;;  %v2363_v51 = vrot.slane %v2361_v54, 4  ;;  %v7596_v46 = vld [vmem:[%s6613_s9 + $0xb8] sm:$0xf]  ;;  %v2343_v18 = vor.u32 %v2342_v22, %v2339_v43 }
  0xb5   : > { %9551 = vst [vmem:[#allocation17_spill] sm:$0xff] %v7593_v42  ;;  %9552 = vst [vmem:[#allocation18_spill] sm:$0xff] %v7596_v46  ;;  %v2366_v52 = vrot.slane %v2364_v15, 5  ;;  %v7600_v55 = vrot.slane %v2370_v33, 5  ;;  %v2374_v11 = vshrl.u32 %v7554_v39, 16  ;;  %v7603_v12 = vrot.slane %v2319_v59, 4 }
  0xb6   : > { %5993 = vmatmul.mubr.msk.bf16.gmra.mxu1 %vm675_vm3, %v6279_v14  ;;  %v2356_v14 = vshll.u32 %v7578_v16, 16  ;;  %v7606_v4 = vld [vmem:[%s6613_s9 + $0xbc] sm:$0x1]  ;;  %v2385_v54 = vshrl.u32 %v5377_v57, 16  ;;  %v2388_v7 = vshll.u32 %v5377_v57, 16  ;;  %v2353_v56 = vor.u32 %v2352_v32, %v7580_v9  ;;  %v6281_v16 = vld [vmem:[%s6613_s9 + $0x48] sm:$0xff]  }
  0xb7   : > { %5996 = vmatprep.mubr.msk.bf16.mxu1 %vm675_vm3, %v6280_v19  ;;  %v2376_v45 = vrot.slane %v2374_v11, 4  ;;  %v2380_v19 = vshll.u32 %v7593_v42, 16  ;;  %v2394_v15 = vshll.u32 %v7596_v46, 16  ;;  %v5380_v33 = vld [vmem:[%s6613_s9 + $0xc0] sm:$0xf]  ;;  %v2367_v26 = vor.u32 %v2366_v52, %v2363_v51  ;;  %v6282_v57 = vld [vmem:[%s6613_s9 + $0x54] sm:$0xff]  }
  0xb8   : > { %v2387_v39 = vrot.slane %v2385_v54, 4  ;;  %v2390_v34 = vrot.slane %v2388_v7, 5  ;;  %v2398_v59 = vshrl.u32 %v7596_v46, 16  ;;  %v7615_v22 = vld [vmem:[%s6613_s9 + $0xc4] sm:$0xf]  ;;  %v2330_v43 = vrot.slane %v2329_v24, 4 }
  0xb9   : > { %v2358_v32 = vrot.slane %v2356_v14, 5  ;;  %v2377_v11 = vor.u32 %v2376_v45, %v7600_v55  ;;  %v2396_v42 = vrot.slane %v2394_v15, 5  ;;  %v2404_v7 = vshll.u32 %v7606_v4, 16  ;;  %v7627_v45 = vld [vmem:[%s6613_s9 + $0xc8] sm:$0x1] }
  0xba   : > { %v2391_v51 = vor.u32 %v2390_v34, %v2387_v39  ;;  %v2400_v52 = vrot.slane %v2398_v59, 4  ;;  %v2409_v54 = vshrl.u32 %v5380_v33, 16  ;;  %v2344_v46 = vrot.slane %v2343_v18, 4 }
  0xbb   : > { %6031 = vmatmul.mubr.msk.bf16.gmra.mxu0 %vm675_vm3, %v7460_v37  ;;  %v2354_v38 = vrot.slane %v2353_v56, 4  ;;  %v2412_v2 = vshll.u32 %v5380_v33, 16  ;;  %v2418_v37 = vshll.u32 %v7615_v22, 16  ;;  %v2368_v24 = vrot.slane %v2367_v26, 4 }
  0xbc   : > { %6034 = vmatprep.mubr.msk.bf16.mxu0 %vm675_vm3, %v7462_v29  ;;  %v2382_v14 = vrot.slane %v2380_v19, 5  ;;  %v2401_v36 = vor.u32 %v2400_v52, %v2396_v42  ;;  %v2411_v15 = vrot.slane %v2409_v54, 4  ;;  %v2378_v34 = vrot.slane %v2377_v11, 4 }
  0xbd   : > { %v2414_v29 = vrot.slane %v2412_v2, 5  ;;  %v7630_v39 = vrot.slane %v2418_v37, 5  ;;  %v2422_v56 = vshrl.u32 %v7615_v22, 16  ;;  %v9553_v26 = vsel %vm6657_vm4, %v7516_v17, %v7502_v6 }
  0xbe   : > { %5997 = vmatmul.mubr.msk.bf16.gmra.mxu1 %vm675_vm3, %v6281_v16  ;;  %v9554_v16 = vsel %vm6657_vm4, %v7500_v23, %v7442_v58  ;;  %v2392_v19 = vrot.slane %v2391_v51, 4  ;;  %v2402_v33 = vrot.slane %v2401_v36, 4  ;;  %v2406_v2 = vrot.slane %v2404_v7, 5  ;;  %v6283_v23 = vld [vmem:[%s6613_s9 + $0x60] sm:$0xff]  }
  0xbf   : > { %6000 = vmatprep.mubr.msk.bf16.mxu1 %vm675_vm3, %v6282_v57  ;;  %v5392_v18 = vcombine.low %v9554_v16, %v9553_v26  ;;  %v9555_v59 = vsel %vm6657_vm4, %v7527_v53, %v7529_v13  ;;  %v9556_v6 = vsel %vm6657_vm4, %v7525_v25, %v7458_v60  ;;  %v2415_v57 = vor.u32 %v2414_v29, %v2411_v15  ;;  %v5418_v13 = vld [vmem:[%s6613_s9 + $0x24] sm:$0xe]  ;;  %v5421_v26 = vld [vmem:[%s6613_s9 + $0x48] sm:$0xe] }
  0xc0   : > { %v5393_v17 = vcombine.low %v9556_v6, %v9555_v59  ;;  %v2424_v11 = vrot.slane %v2422_v56, 4  ;;  %v2428_v58 = vshll.u32 %v7627_v45, 16  ;;  %v9557_v36 = vsel %vm6657_vm4, %v7531_v10, %v7481_v63  ;;  %v6284_v63 = vld [vmem:[%s6613_s9 + $0x6c] sm:$0xff]   ;;  %v5422_v6 = vld [vmem:[%s6613_s9 + $0x54] sm:$0xe] }
  0xc1   : > { %v5394_v51 = vcombine.low %v9557_v36, %v2311_v20  ;;  %v2325_v53 = vsel %vm6657_vm4, %v7603_v12, %v7545_v3  ;;  %v2335_v60 = vsel %vm6657_vm4, %v2330_v43, %v7590_v48  ;;  %v2349_v25 = vsel %vm6657_vm4, %v2344_v46, %v7580_v9  ;;  %v7683_v12 = vld [vmem:[%s6613_s9 + $0xc] sm:$0xe] }
  0xc2   : > { %v2359_v10 = vsel %vm6657_vm4, %v2354_v38, %v2358_v32  ;;  %v2373_v3 = vsel %vm6657_vm4, %v2368_v24, %v7600_v55  ;;  %v2383_v20 = vsel %vm6657_vm4, %v2378_v34, %v2382_v14  ;;  %v2425_v48 = vor.u32 %v2424_v11, %v7630_v39  ;;  %v5419_v55 = vld [vmem:[%s6613_s9 + $0x30] sm:$0xe]  ;;  %v5420_v14 = vld [vmem:[%s6613_s9 + $0x3c] sm:$0xe] }
  0xc3   : > { %6035 = vmatmul.mubr.msk.bf16.gmra.mxu0 %vm675_vm3, %v7514_v62  ;;  %v2397_v62 = vsel %vm6657_vm4, %v2392_v19, %v2396_v42  ;;  %v2407_v38 = vsel %vm6657_vm4, %v2402_v33, %v2406_v2  ;;  %v7690_v9 = vrot.slane %v2415_v57, 4  ;;  %v2792_v46 = vrot.slane %v7174_v49, 5  ;;  %v6285_v57 = vld [vmem:[%s6613_s9 + $0x78] sm:$0xff]  }
  0xc4   : > { %6038 = vmatprep.mubr.msk.bf16.mxu0 %vm675_vm3, %v5392_v18  ;;  %v7694_v43 = vcombine.low %v2325_v53, %v2335_v60  ;;  %v7696_v32 = vrot.slane %v2425_v48, 4  ;;  %v7698_v52 = vrot.slane %v2428_v58, 5  ;;  %v5434_v7 = vrot.slane %v5418_v13, 9  ;;  %v6286_v53 = vld [vmem:[%s6613_s9 + $0x84] sm:$0xff]   ;;  %v5423_v13 = vld [vmem:[%s6613_s9 + $0x60] sm:$0xe] }
  0xc5   : > { %v7701_v54 = vcombine.low %v2349_v25, %v2359_v10  ;;  %v7703_v42 = vcombine.low %v2373_v3, %v2383_v20  ;;  %v5432_v37 = vrot.slane %v7683_v12, 9  ;;  %v2806_v24 = vrot.slane %v7223_v44, 5  ;;  %v6292_v49 = vld [vmem:[%s6613_s9 + $0x18] sm:$0xff]  }
  0xc6   : > { %6001 = vmatmul.mubr.msk.bf16.gmra.mxu1 %vm675_vm3, %v6283_v23  ;;  %v7709_v15 = vcombine.low %v2397_v62, %v2407_v38  ;;  %v2795_v34 = vrot.slane %v7210_v47, 5  ;;  %v2809_v29 = vrot.slane %v7238_v21, 5  ;;  %v5435_v56 = vrot.slane %v5419_v55, 9  ;;  %v5425_v55 = vld [vmem:[%s6613_s9 + $0x78] sm:$0xe] }
  0xc7   : > { %6004 = vmatprep.mubr.msk.bf16.mxu1 %vm675_vm3, %v6284_v63  ;;  %v2421_v16 = vsel %vm6657_vm4, %v7690_v9, %v7630_v39  ;;  %v7720_v44 = vrot.slane %v2792_v46, 4  ;;  %v7724_v18 = vsel %vm6943_vm7, %v5434_v7, %v2806_v24  ;;  %v2808_v19 = vrot.slane %v2806_v24, 4 }
  0xc8   : > { %v2431_v21 = vsel %vm6657_vm4, %v7696_v32, %v7698_v52  ;;  %v2813_v33 = vrot.slane %v7261_v5, 5  ;;  %v2816_v2 = vrot.slane %v7269_v41, 5  ;;  %v5436_v59 = vrot.slane %v5420_v14, 9  ;;  %v6291_v52 = vld [vmem:[%s6613_s9 + $0xc0] sm:$0xff]  }
  0xc9   : > { %v7736_v11 = vsel %vm6943_vm7, %v2808_v19, %v2809_v29  ;;  %v2820_v58 = vrot.slane %v7278_v61, 5  ;;  %v2823_v23 = vrot.slane %v7330_v50, 5  ;;  %v5437_v36 = vrot.slane %v5421_v26, 9  ;;  %v5426_v19 = vld [vmem:[%s6613_s9 + $0x84] sm:$0xe] }
  0xca   : > { %v5451_v5 = vcombine.low %v7724_v18, %v7736_v11  ;;  %v7746_v41 = vsel %vm6943_vm7, %v5435_v56, %v2813_v33  ;;  %v2815_v60 = vrot.slane %v2813_v33, 4  ;;  %v2827_v25 = vrot.slane %v7296_v1, 5 }
  0xcb   : > { %6039 = vmatmul.mubr.msk.bf16.gmra.mxu0 %vm675_vm3, %v5393_v17  ;;  %v7753_v61 = vsel %vm6943_vm7, %v5436_v59, %v2820_v58  ;;  %v2822_v50 = vrot.slane %v2820_v58, 4  ;;  %v2830_v17 = vrot.slane %v7344_v8, 5  ;;  %v5438_v63 = vrot.slane %v5422_v6, 9  ;;  %v9558_v59 = vld [vmem:[#allocation7_spill] sm:$0xff] }
  0xcc   : > { %6042 = vmatprep.mubr.msk.bf16.mxu0 %vm675_vm3, %v5394_v51  ;;  %v7758_v10 = vsel %vm6943_vm7, %v2815_v60, %v2816_v2  ;;  %v7762_v3 = vsel %vm6943_vm7, %v5437_v36, %v2827_v25  ;;  %v2829_v1 = vrot.slane %v2827_v25, 4  ;;  %v2834_v20 = vrot.slane %v7339_v40, 5  ;;  %v5424_v51 = vld [vmem:[%s6613_s9 + $0x6c] sm:$0xe]  ;;  %v6287_v58 = vld [vmem:[%s6613_s9 + $0x90] sm:$0xff]  }
  0xcd   : > { %v5452_v48 = vcombine.low %v7746_v41, %v7758_v10  ;;  %v7771_v8 = vsel %vm6943_vm7, %v2822_v50, %v2823_v23  ;;  %v2837_v62 = vrot.slane %v7361_v35, 5  ;;  %v5439_v38 = vrot.slane %v5423_v13, 9  ;;  %v9559_v36 = vld [vmem:[#allocation6_spill] sm:$0xff]  ;;  %v5427_v60 = vld [vmem:[%s6613_s9 + $0x90] sm:$0xe]  ;;  %v9560_v50 = vld [vmem:[#allocation9_spill] sm:$0xff] }
  0xce   : > { %6005 = vmatmul.mubr.msk.bf16.gmra.mxu1 %vm675_vm3, %v6285_v57  ;;  %v5453_v40 = vcombine.low %v7753_v61, %v7771_v8  ;;  %v7780_v7 = vsel %vm6943_vm7, %v2829_v1, %v2830_v17  ;;  %v7784_v24 = vsel %vm6943_vm7, %v5438_v63, %v2834_v20  ;;  %v2836_v14 = vrot.slane %v2834_v20, 4 }
  0xcf   : > { %6008 = vmatprep.mubr.msk.bf16.mxu1 %vm675_vm3, %v6286_v53  ;;  %v5454_v35 = vcombine.low %v7762_v3, %v7780_v7  ;;  %v2841_v29 = vrot.slane %v7374_v28, 5  ;;  %v2844_v56 = vrot.slane %v7396_v30, 5  ;;  %v5440_v26 = vrot.slane %v5424_v51, 9  ;;  %v9561_v51 = vld [vmem:[#allocation8_spill] sm:$0xff]  ;;  %v5558_v3 = vld [vmem:[%s6613_s9 + $0x48] sm:$0xf] }
  0xd0   : > { %v7793_v33 = vsel %vm6943_vm7, %v2836_v14, %v2837_v62  ;;  %v2848_v2 = vrot.slane %v7393_v27, 5  ;;  %v2851_v6 = vrot.slane %v9558_v59, 5  ;;  %v5441_v57 = vrot.slane %v5425_v55, 9  ;;  %v6288_v27 = vld [vmem:[%s6613_s9 + $0x9c] sm:$0xff]   ;;  %v9569_v55 = vld [vmem:[#allocation18_spill] sm:$0xff] }
  0xd1   : > { %v5455_v23 = vcombine.low %v7784_v24, %v7793_v33  ;;  %v7802_v28 = vsel %vm6943_vm7, %v5439_v38, %v2841_v29  ;;  %v2843_v30 = vrot.slane %v2841_v29, 4  ;;  %v2855_v53 = vrot.slane %v9559_v36, 5  ;;  %v5428_v38 = vld [vmem:[%s6613_s9 + $0x9c] sm:$0xe]  ;;  %v9564_v36 = vld [vmem:[#allocation15_spill] sm:$0xff] }
  0xd2   : > { %v7811_v25 = vsel %vm6943_vm7, %v5440_v26, %v2848_v2  ;;  %v2850_v13 = vrot.slane %v2848_v2, 4  ;;  %v2858_v17 = vrot.slane %v9560_v50, 5  ;;  %v5442_v63 = vrot.slane %v5426_v19, 9  ;;  %v5429_v26 = vld [vmem:[%s6613_s9 + $0xa8] sm:$0xe] }
  0xd3   : > { %6043 = vmatmul.mubr.msk.bf16.gmra.mxu0 %vm675_vm3, %v7694_v43  ;;  %v7818_v1 = vsel %vm6943_vm7, %v2843_v30, %v2844_v56  ;;  %v7822_v43 = vsel %vm6943_vm7, %v5441_v57, %v2855_v53  ;;  %v2857_v20 = vrot.slane %v2855_v53, 4  ;;  %v2862_v62 = vrot.slane %v9561_v51, 5  ;;  %v5431_v57 = vld [vmem:[%s6613_s9 + $0xc0] sm:$0xe]  ;;  %v6289_v19 = vld [vmem:[%s6613_s9 + $0xa8] sm:$0xff]  }
  0xd4   : > { %6046 = vmatprep.mubr.msk.bf16.mxu0 %vm675_vm3, %v7701_v54  ;;  %v7830_v14 = vsel %vm6943_vm7, %v2850_v13, %v2851_v6  ;;  %v9562_v54 = vld [vmem:[#allocation11_spill] sm:$0xff]  ;;  %v5443_v56 = vrot.slane %v5427_v60, 9  ;;  %v2872_v53 = vrot.slane %v9564_v36, 5  ;;  %v5444_v60 = vrot.slane %v5428_v38, 9  ;;  %v9567_v38 = vld [vmem:[#allocation16_spill] sm:$0xff] }
  0xd5   : > { %v2865_v29 = vrot.slane %v9562_v54, 5  ;;  %v7839_v2 = vsel %vm6943_vm7, %v2857_v20, %v2858_v17  ;;  %v7843_v59 = vsel %vm6943_vm7, %v5442_v63, %v2862_v62  ;;  %v2864_v6 = vrot.slane %v2862_v62, 4  ;;  %v5430_v13 = vld [vmem:[%s6613_s9 + $0xb4] sm:$0xe]  ;;  %v9565_v17 = vld [vmem:[#allocation13_spill] sm:$0xff] }
  0xd6   : > { %6009 = vmatmul.mubr.msk.bf16.gmra.mxu1 %vm675_vm3, %v6287_v58  ;;  %v9563_v58 = vld [vmem:[#allocation10_spill] sm:$0xff]  ;;  %v2876_v63 = vrot.slane %v9565_v17, 5  ;;  %v9566_v20 = vld [vmem:[#allocation5_spill] sm:$0xff]  ;;  %v5445_v62 = vrot.slane %v5429_v26, 9  ;;  %v2883_v36 = vrot.slane %v9567_v38, 5  ;;  %v5446_v26 = vrot.slane %v5430_v13, 9 }
  0xd7   : > { %6012 = vmatprep.mubr.msk.bf16.mxu1 %vm675_vm3, %v6288_v27  ;;  %v2869_v30 = vrot.slane %v9563_v58, 5  ;;  %v7853_v50 = vsel %vm6943_vm7, %v2864_v6, %v2865_v29  ;;  %v2879_v51 = vrot.slane %v9566_v20, 5  ;;  %v9568_v17 = vld [vmem:[#allocation17_spill] sm:$0xff]  ;;  %v6290_v27 = vld [vmem:[%s6613_s9 + $0xb4] sm:$0xff]   ;;  %v2796_v39 = vsel %vm6943_vm7, %v7720_v44, %v2795_v34  ;;  %v8070_v7 = vld [vmem:[%s6613_s9 + $0x4c] sm:$0xf] }
  0xd8   : > { %v7868_v29 = vsel %vm6943_vm7, %v5444_v60, %v2876_v63  ;;  %v2878_v6 = vrot.slane %v2876_v63, 4  ;;  %v2886_v20 = vrot.slane %v9568_v17, 5  ;;  %v2885_v38 = vrot.slane %v2883_v36, 4  ;;  %v6437_v44 = vld [vmem:[%s6613_s9 + $0x20] sm:$0x1] }
  0xd9   : > { %v7861_v54 = vsel %vm6943_vm7, %v5443_v56, %v2869_v30  ;;  %v2871_v58 = vrot.slane %v2869_v30, 4  ;;  %v7880_v30 = vsel %vm6943_vm7, %v5445_v62, %v2883_v36  ;;  %v2890_v60 = vrot.slane %v9569_v55, 5 }
  0xda   : > { %v5447_v63 = vrot.slane %v5431_v57, 9  ;;  %v7896_v55 = vsel %vm6943_vm7, %v2885_v38, %v2886_v20  ;;  %v2897_v57 = vrot.slane %v7615_v22, 5  ;;  %v2793_v22 = vsel %vm6943_vm7, %v5432_v37, %v2792_v46  ;;  %v6294_v38 = vld [vmem:[%s6613_s9 + $0x30] sm:$0xff]  }
  0xdb   : > { %6047 = vmatmul.mubr.msk.bf16.gmra.mxu0 %vm675_vm3, %v7703_v42  ;;  %v7876_v56 = vsel %vm6943_vm7, %v2871_v58, %v2872_v53  ;;  %v7889_v42 = vsel %vm6943_vm7, %v2878_v6, %v2879_v51  ;;  %v2893_v53 = vrot.slane %v7606_v4, 5  ;;  %v2892_v58 = vrot.slane %v2890_v60, 4 }
  0xdc   : > { %6050 = vmatprep.mubr.msk.bf16.mxu0 %vm675_vm3, %v7709_v15  ;;  %v7900_v15 = vsel %vm6943_vm7, %v5446_v26, %v2890_v60  ;;  %v2900_v51 = vrot.slane %v7627_v45, 5  ;;  %v5417_v45 = vld [vmem:[%s6613_s9 + $0x18] sm:$0xe]  ;;  %v7940_v9 = vsel %vm6943_vm7, %v5447_v63, %v2897_v57  ;;  %v2899_v46 = vrot.slane %v2897_v57, 4  ;;  %v6293_v26 = vld [vmem:[%s6613_s9 + $0x24] sm:$0xff]  }
  0xdd   : > { %v7928_v32 = vsel %vm6943_vm7, %v2892_v58, %v2893_v53  ;;  %v5433_v37 = vrot.slane %v5417_v45, 9  ;;  %v5449_v34 = vcombine.low %v2793_v22, %v2796_v39  ;;  %v9570_v60 = vld [vmem:[#allocation12_spill] sm:$0xff] }
  0xde   : > { %6013 = vmatmul.mubr.msk.bf16.gmra.mxu1 %vm675_vm3, %v6289_v19  ;;  %v5399_v19 = vcombine.low %v2421_v16, %v2431_v21  ;;  %v7945_v47 = vsel %vm6943_vm7, %v2899_v46, %v2900_v51  ;;  %v2802_v21 = vrot.slane %v6437_v44, 5  ;;  %v4559_v53 = vsel %vm724_vm0, %v9570_v60, 0  ;;  %v5546_v63 = vld [vmem:[%s6613_s9 + $0x18] sm:$0xf]  ;;  %v5547_v57 = vld [vmem:[%s6613_s9 + $0x1c] sm:$0xf] }
  0xdf   : > { %6016 = vmatprep.mubr.msk.bf16.mxu1 %vm675_vm3, %v6290_v27  ;;  %v6436_v27 = vld [vmem:[%s6613_s9 + $0x1c] sm:$0xf]  ;;  %v5549_v51 = vld [vmem:[%s6613_s9 + $0x24] sm:$0xf]  ;;  %v3607_v45 = vshrl.u32 %v5546_v63, 16  ;;  %v3616_v39 = vshll.u32 %v5547_v57, 16 }
  0xe0   : > { %v2799_v36 = vrot.slane %v6436_v27, 5  ;;  %v3610_v27 = vshll.u32 %v5546_v63, 16  ;;  %v3631_v46 = vshrl.u32 %v5549_v51, 16  ;;  %v6296_v44 = vld [vmem:[%s6613_s9 + $0x48] sm:$0xff]   ;;  %v5627_v60 = vld [vmem:[%s6613_s9 + $0x18] sm:$0xe] }
  0xe1   : > { %v7986_v63 = vld [vmem:[%s6613_s9 + $0x2c] sm:$0x1] }
  0xe2   : > { %v2801_v16 = vrot.slane %v2799_v36, 4  ;;  %v2800_v17 = vsel %vm6943_vm7, %v5433_v37, %v2799_v36  ;;  %v7970_v36 = vld [vmem:[%s6613_s9 + $0x28] sm:$0xf]  ;;  %v6295_v37 = vld [vmem:[%s6613_s9 + $0x3c] sm:$0xff]   ;;  %v3633_v18 = vrot.slane %v3631_v46, 4 }
  0xe3   : > { %6051 = vmatmul.mubr.msk.bf16.gmra.mxu0 %vm675_vm3, %v5399_v19  ;;  %v9571_v19 = vld [vmem:[#allocation14_spill] sm:$0xff] }
  0xe4   : > { %6090 = vmatprep.mubr.msk.bf16.mxu0 %vm675_vm3, %v6292_v49  ;;  %v2803_v20 = vsel %vm6943_vm7, %v2801_v16, %v2802_v21  ;;  %v4089_v22 = vsel %vm724_vm0, %v9571_v19, 0  ;;  %v3620_v49 = vshrl.u32 %v5547_v57, 16  ;;  %v3644_v16 = vshrl.u32 %v7970_v36, 16  ;;  %v5548_v21 = vld [vmem:[%s6613_s9 + $0x20] sm:$0x1] }
  0xe5   : > { %v5450_v58 = vcombine.low %v2800_v17, %v2803_v20  ;;  %v3609_v17 = vrot.slane %v3607_v45, 4  ;;  %v3612_v20 = vrot.slane %v3610_v27, 5  ;;  %v5552_v19 = vld [vmem:[%s6613_s9 + $0x30] sm:$0xf]  ;;  %v3626_v45 = vshll.u32 %v5548_v21, 16 }
  0xe6   : > { %6017 = vmatmul.mubr.msk.bf16.gmra.mxu1 %vm675_vm3, %v6291_v52  ;;  %v3634_v52 = vshll.u32 %v5549_v51, 16  ;;  %v3646_v51 = vrot.slane %v3644_v16, 4  ;;  %v5643_v27 = vrot.slane %v5627_v60, 9  ;;  %v4353_v46 = vrot.slane %v5548_v21, 5  ;;  %v5628_v16 = vld [vmem:[%s6613_s9 + $0x24] sm:$0xe] }
  0xe7   : > { %6056 = vmatprep.mubr.msk.bf16.mxu1 %vm675_vm3, %v5449_v34  ;;  %v3640_v34 = vshll.u32 %v7970_v36, 16  ;;  %v6297_v21 = vld [vmem:[%s6613_s9 + $0x54] sm:$0xff]   ;;  %v3658_v10 = vshll.u32 %v5552_v19, 16  ;;  %v6298_v60 = vld [vmem:[%s6613_s9 + $0x60] sm:$0xff]  }
  0xe8   : > { %v3636_v11 = vrot.slane %v3634_v52, 5  ;;  %v3650_v52 = vshll.u32 %v7986_v63, 16 }
  0xeb   : > { %6091 = vmatmul.mubr.msk.bf16.vlgmr.msra.gmra.mxu0 %vm675_vm3, %v6293_v26  ;;  %v7982_v26 = vrot.slane %v3616_v39, 5 }
  0xec   : > { %6157 = vmatpush3.bf16.msra.mxu0 %v4559_v53  ;;  %6094 = vmatprep.mubr.msk.bf16.mxu0 %vm675_vm3, %v6294_v38  ;;  %v3622_v38 = vrot.slane %v3620_v49, 4  ;;  %v4350_v53 = vrot.slane %v5547_v57, 5  ;;  %v7996_v57 = vld [vmem:[%s6613_s9 + $0x34] sm:$0xf] }
  0xee   : > { %6057 = vmatmul.mubr.msk.bf16.vlgmr.msra.gmra.mxu1 %vm675_vm3, %v5450_v58  ;;  %v7991_v58 = vrot.slane %v3640_v34, 5  ;;  %v3623_v39 = vor.u32 %v3622_v38, %v7982_v26  ;;  %v4352_v49 = vrot.slane %v4350_v53, 4  ;;  %v3637_v34 = vor.u32 %v3636_v11, %v3633_v18 }
  0xef   : > { %6123 = vmatpush3.bf16.msra.mxu1 %v4089_v22  ;;  %6060 = vmatprep.mubr.msk.bf16.mxu1 %vm675_vm3, %v5451_v5  ;;  %v7989_v5 = vpop.f32.mrf.mxu0  ;;  %v3613_v22 = vor.u32 %v3612_v20, %v3609_v17  ;;  %v3655_v17 = vshrl.u32 %v5552_v19, 16  ;;  %v3668_v38 = vshrl.u32 %v7996_v57, 16  ;;  %v8021_v61 = vsel %vm6943_vm7, %v5643_v27, %v4350_v53  ;;  %v5555_v19 = vld [vmem:[%s6613_s9 + $0x3c] sm:$0xf] }
  0xf0   : > { %v3647_v41 = vor.u32 %v3646_v51, %v7991_v58  ;;  %v3624_v8 = vrot.slane %v3623_v39, 4  ;;  %v3652_v11 = vrot.slane %v3650_v52, 5  ;;  %v5644_v51 = vrot.slane %v5628_v16, 9  ;;  %v8035_v39 = vld [vmem:[%s6613_s9 + $0x38] sm:$0x1] }
  0xf1   : > { %v8013_v20 = vpop.f32.mrf.mxu0  ;;  %v3614_v18 = vrot.slane %v3613_v22, 4  ;;  %v3638_v12 = vrot.slane %v3637_v34, 4  ;;  %v4360_v22 = vrot.slane %v7986_v63, 5  ;;  %v3670_v52 = vrot.slane %v3668_v38, 4 }
  0xf2   : > { %v3648_v27 = vrot.slane %v3647_v41, 4  ;;  %v3679_v34 = vshrl.u32 %v5555_v19, 16  ;;  %v3682_v16 = vshll.u32 %v5555_v19, 16  ;;  %v8048_v41 = vld [vmem:[%s6613_s9 + $0x40] sm:$0xf] }
  0xf3   : > { %6095 = vmatmul.mubr.msk.bf16.gmra.mxu0 %vm675_vm3, %v6295_v37  ;;  %v8032_v53 = vpop.f32.mrf.mxu0  ;;  %v3619_v63 = vsel %vm6657_vm4, %v3614_v18, %v7982_v26  ;;  %v3643_v26 = vsel %vm6657_vm4, %v3638_v12, %v7991_v58  ;;  %v5629_v18 = vld [vmem:[%s6613_s9 + $0x30] sm:$0xe]  ;;  %v3688_v24 = vshll.u32 %v8048_v41, 16  ;;  %v3692_v33 = vshrl.u32 %v8048_v41, 16 }
  0xf4   : > { %6098 = vmatprep.mubr.msk.bf16.mxu0 %vm675_vm3, %v6296_v44  ;;  %v8004_v37 = vpop.f32.mrf.mxu1  ;;  %v4357_v44 = vrot.slane %v7970_v36, 5  ;;  %v3628_v36 = vrot.slane %v3626_v45, 5  ;;  %v3657_v45 = vrot.slane %v3655_v17, 4  ;;  %v3653_v58 = vsel %vm6657_vm4, %v3648_v27, %v3652_v11 }
  0xf5   : > { %9572 = vst [vmem:[#allocation7_spill] sm:$0xff] %v8004_v37  ;;  %v8077_v12 = vpop.f32.mrf.mxu0  ;;  %v3684_v19 = vrot.slane %v3682_v16, 5  ;;  %v3716_v11 = vshrl.u32 %v8070_v7, 16 }
  0xf6   : > { %6061 = vmatmul.mubr.msk.bf16.gmra.mxu1 %vm675_vm3, %v5452_v48  ;;  %v3664_v48 = vshll.u32 %v7996_v57, 16  ;;  %v8028_v6 = vpop.f32.mrf.mxu1  ;;  %v4359_v4 = vrot.slane %v4357_v44, 4  ;;  %v3629_v17 = vsel %vm6657_vm4, %v3624_v8, %v3628_v36  ;;  %v4364_v36 = vrot.slane %v7996_v57, 5  ;;  %v6300_v8 = vld [vmem:[%s6613_s9 + $0x78] sm:$0xff]  }
  0xf7   : > { %6064 = vmatprep.mubr.msk.bf16.mxu1 %vm675_vm3, %v5453_v40  ;;  %v8025_v40 = vsel %vm6943_vm7, %v4352_v49, %v4353_v46  ;;  %9573 = vst [vmem:[#allocation6_spill] sm:$0xff] %v8028_v6  ;;  %v3660_v49 = vrot.slane %v3658_v10, 5  ;;  %v8091_v27 = vcombine.low %v3619_v63, %v3629_v17  ;;  %v8093_v57 = vcombine.low %v3643_v26, %v3653_v58  ;;  %v8107_v17 = vld [vmem:[%s6613_s9 + $0x58] sm:$0xf]  ;;  %v8113_v58 = vld [vmem:[%s6613_s9 + $0x44] sm:$0x1] }
  0xf8   : > { %v8037_v46 = vrot.slane %v3664_v48, 5  ;;  %v8054_v10 = vpop.f32.mrf.mxu1  ;;  %v8061_v48 = vsel %vm6943_vm7, %v5644_v51, %v4357_v44  ;;  %v8065_v38 = vsel %vm6943_vm7, %v4359_v4, %v4360_v22  ;;  %v3681_v51 = vrot.slane %v3679_v34, 4  ;;  %v5561_v34 = vld [vmem:[%s6613_s9 + $0x54] sm:$0xf] }
  0xf9   : > { %9574 = vst [vmem:[#allocation9_spill] sm:$0xff] %v8054_v10  ;;  %v3661_v44 = vor.u32 %v3660_v49, %v3657_v45  ;;  %v3706_v22 = vshll.u32 %v5558_v3, 16  ;;  %v4366_v13 = vrot.slane %v4364_v36, 4  ;;  %v4367_v63 = vrot.slane %v8035_v39, 5  ;;  %v5630_v49 = vld [vmem:[%s6613_s9 + $0x3c] sm:$0xe] }
  0xfa   : > { %v3671_v4 = vor.u32 %v3670_v52, %v8037_v46  ;;  %v8089_v45 = vpop.f32.mrf.mxu1  ;;  %v5645_v52 = vrot.slane %v5629_v18, 9  ;;  %v3685_v18 = vor.u32 %v3684_v19, %v3681_v51  ;;  %v9577_v6 = vcombine.low %v7802_v28, %v7818_v1 }
  0xfb   : > { %6099 = vmatmul.mubr.msk.bf16.gmra.mxu0 %vm675_vm3, %v6297_v21  ;;  %v3712_v21 = vshll.u32 %v8070_v7, 16  ;;  %9575 = vst [vmem:[#allocation8_spill] sm:$0xff] %v8089_v45  ;;  %v3708_v45 = vrot.slane %v3706_v22, 5  ;;  %v3727_v51 = vshrl.u32 %v5561_v34, 16  ;;  %v3730_v19 = vshll.u32 %v5561_v34, 16 }
  0xfc   : > { %6102 = vmatprep.mubr.msk.bf16.mxu0 %vm675_vm3, %v6298_v60  ;;  %v3674_v60 = vshll.u32 %v8035_v39, 16  ;;  %v8110_v26 = vrot.slane %v3671_v4, 4  ;;  %v3718_v39 = vrot.slane %v3716_v11, 4  ;;  %v8148_v22 = vsel %vm6943_vm7, %v4366_v13, %v4367_v63 }
  0xfd   : > { %v8118_v10 = vrot.slane %v3712_v21, 5  ;;  %v9579_v21 = vcombine.low %v7811_v25, %v7830_v14  ;;  %v4371_v25 = vrot.slane %v8048_v41, 5  ;;  %v6302_v14 = vld [vmem:[%s6613_s9 + $0x90] sm:$0xff]   ;;  %v5646_v1 = vrot.slane %v5630_v49, 9  ;;  %v5564_v41 = vld [vmem:[%s6613_s9 + $0x60] sm:$0xf] }
  0xfe   : > { %6065 = vmatmul.mubr.msk.bf16.gmra.mxu1 %vm675_vm3, %v5454_v35  ;;  %v6299_v35 = vld [vmem:[%s6613_s9 + $0x6c] sm:$0xff]   ;;  %v8103_v62 = vrot.slane %v3674_v60, 5  ;;  %v3729_v37 = vrot.slane %v3727_v51, 4 }
  0xff   : > { %6068 = vmatprep.mubr.msk.bf16.mxu1 %vm675_vm3, %v5455_v23  ;;  %v3703_v23 = vshrl.u32 %v5558_v3, 16  ;;  %v8101_v3 = vrot.slane %v3661_v44, 4  ;;  %v3694_v44 = vrot.slane %v3692_v33, 4  ;;  %v3740_v33 = vshrl.u32 %v8107_v17, 16 }
 0x100   : > { %v8099_v16 = vpop.f32.mrf.mxu0  ;;  %v3719_v13 = vor.u32 %v3718_v39, %v8118_v10  ;;  %v4378_v39 = vrot.slane %v8070_v7, 5  ;;  %v9583_v7 = vcombine.low %v7822_v43, %v7839_v2  ;;  %v9585_v43 = vcombine.low %v7843_v59, %v7853_v50  ;;  %v6303_v2 = vld [vmem:[%s6613_s9 + $0x9c] sm:$0xff]  }
 0x101   : > { %9576 = vst [vmem:[#allocation11_spill] sm:$0xff] %v8099_v16  ;;  %v3705_v60 = vrot.slane %v3703_v23, 4  ;;  %v6301_v23 = vld [vmem:[%s6613_s9 + $0x84] sm:$0xff]   ;;  %v8175_v16 = vld [vmem:[%s6613_s9 + $0x5c] sm:$0x1]  ;;  %v4385_v59 = vrot.slane %v8107_v17, 5 }
 0x102   : > { %v8136_v28 = vpop.f32.mrf.mxu0 }
 0x103   : > { %6103 = vmatmul.mubr.msk.bf16.gmra.mxu0 %vm675_vm3, %v6299_v35  ;;  %v8115_v35 = vrot.slane %v3688_v24, 5  ;;  %v3736_v24 = vshll.u32 %v8107_v17, 16  ;;  %9580 = vst [vmem:[#allocation15_spill] sm:$0xff] %v8136_v28  ;;  %v3732_v28 = vrot.slane %v3730_v19, 5 }
 0x104   : > { %6106 = vmatprep.mubr.msk.bf16.mxu0 %vm675_vm3, %v6300_v8  ;;  %v8124_v4 = vpop.f32.mrf.mxu1  ;;  %v8127_v8 = vld [vmem:[%s6613_s9 + $0x50] sm:$0x1]  ;;  %v8168_v49 = vpop.f32.mrf.mxu0 }
 0x105   : > { %9578 = vst [vmem:[#allocation10_spill] sm:$0xff] %v8124_v4  ;;  %v3695_v34 = vor.u32 %v3694_v44, %v8115_v35  ;;  %v8158_v4 = vrot.slane %v3685_v18, 4  ;;  %v8165_v11 = vrot.slane %v3736_v24, 5  ;;  %v3742_v44 = vrot.slane %v3740_v33, 4  ;;  %9582 = vst [vmem:[#allocation5_spill] sm:$0xff] %v8168_v49 }
 0x106   : > { %6069 = vmatmul.mubr.msk.bf16.gmra.mxu1 %vm675_vm3, %v9577_v6  ;;  %v8144_v6 = vsel %vm6943_vm7, %v5645_v52, %v4364_v36  ;;  %v3709_v36 = vor.u32 %v3708_v45, %v3705_v60  ;;  %v3722_v52 = vshll.u32 %v8127_v8, 16  ;;  %v8163_v63 = vpop.f32.mrf.mxu1  ;;  %v4373_v18 = vrot.slane %v4371_v25, 4  ;;  %v5631_v24 = vld [vmem:[%s6613_s9 + $0x48] sm:$0xe] }
 0x107   : > { %6072 = vmatprep.mubr.msk.bf16.mxu1 %vm675_vm3, %v9579_v21  ;;  %v3698_v21 = vshll.u32 %v8113_v58, 16  ;;  %9581 = vst [vmem:[#allocation13_spill] sm:$0xff] %v8163_v63  ;;  %v4374_v60 = vrot.slane %v8113_v58, 5  ;;  %v3696_v51 = vrot.slane %v3695_v34, 4  ;;  %v3751_v33 = vshrl.u32 %v5564_v41, 16 }
 0x108   : > { %v8181_v63 = vsel %vm6943_vm7, %v5646_v1, %v4371_v25  ;;  %v3710_v45 = vrot.slane %v3709_v36, 4  ;;  %v3720_v49 = vrot.slane %v3719_v13, 4  ;;  %v3724_v58 = vrot.slane %v3722_v52, 5  ;;  %v8196_v36 = vld [vmem:[%s6613_s9 + $0x64] sm:$0xf]  ;;  %v8203_v13 = vpop.f32.mrf.mxu0 }
 0x109   : > { %v3700_v19 = vrot.slane %v3698_v21, 5  ;;  %v3691_v34 = vsel %vm6657_vm4, %v8158_v4, %v8115_v35  ;;  %v3733_v21 = vor.u32 %v3732_v28, %v3729_v37  ;;  %v3743_v1 = vor.u32 %v3742_v44, %v8165_v11  ;;  %9586 = vst [vmem:[#allocation17_spill] sm:$0xff] %v8203_v13  ;;  %v5632_v28 = vld [vmem:[%s6613_s9 + $0x54] sm:$0xe]  ;;  %v6307_v13 = vld [vmem:[%s6613_s9 + $0xcc] sm:$0xff]  }
 0x10a   : > { %v3746_v25 = vshll.u32 %v8175_v16, 16  ;;  %v8207_v52 = vsel %vm6943_vm7, %v4373_v18, %v4374_v60  ;;  %v5647_v35 = vrot.slane %v5631_v24, 9  ;;  %v4380_v37 = vrot.slane %v4378_v39, 4 }
 0x10b   : > { %6107 = vmatmul.mubr.msk.bf16.gmra.mxu0 %vm675_vm3, %v6301_v23  ;;  %v3754_v23 = vshll.u32 %v5564_v41, 16  ;;  %v4381_v4 = vrot.slane %v8127_v8, 5  ;;  %v6304_v41 = vld [vmem:[%s6613_s9 + $0xa8] sm:$0xff]   ;;  %v3701_v44 = vsel %vm6657_vm4, %v3696_v51, %v3700_v19  ;;  %v3753_v50 = vrot.slane %v3751_v33, 4 }
 0x10c   : > { %6110 = vmatprep.mubr.msk.bf16.mxu0 %vm675_vm3, %v6302_v14  ;;  %v8187_v14 = vpop.f32.mrf.mxu1  ;;  %v3725_v18 = vsel %vm6657_vm4, %v3720_v49, %v3724_v58  ;;  %v3760_v60 = vshll.u32 %v8196_v36, 16  ;;  %v3764_v8 = vshrl.u32 %v8196_v36, 16  ;;  %v3744_v51 = vrot.slane %v3743_v1, 4  ;;  %v8225_v33 = vld [vmem:[%s6613_s9 + $0x68] sm:$0x1] }
 0x10d   : > { %9584 = vst [vmem:[#allocation16_spill] sm:$0xff] %v8187_v14  ;;  %v3734_v14 = vrot.slane %v3733_v21, 4  ;;  %v3748_v17 = vrot.slane %v3746_v25, 5  ;;  %v5648_v19 = vrot.slane %v5632_v28, 9  ;;  %v9589_v49 = vsel %vm6657_vm4, %v8110_v26, %v8103_v62  ;;  %v5567_v25 = vld [vmem:[%s6613_s9 + $0x6c] sm:$0xf] }
 0x10e   : > { %6073 = vmatmul.mubr.msk.bf16.gmra.mxu1 %vm675_vm3, %v9583_v7  ;;  %v3756_v7 = vrot.slane %v3754_v23, 5  ;;  %v8222_v24 = vpop.f32.mrf.mxu1  ;;  %v8246_v21 = vsel %vm6943_vm7, %v5647_v35, %v4378_v39  ;;  %v8250_v1 = vsel %vm6943_vm7, %v4380_v37, %v4381_v4  ;;  %v8253_v62 = vcombine.low %v3691_v34, %v3701_v44  ;;  %v5633_v4 = vld [vmem:[%s6613_s9 + $0x60] sm:$0xe]  ;;  %v5573_v44 = vld [vmem:[%s6613_s9 + $0x84] sm:$0xf] }
 0x10f   : > { %6076 = vmatprep.mubr.msk.bf16.mxu1 %vm675_vm3, %v9585_v43  ;;  %v3715_v43 = vsel %vm6657_vm4, %v3710_v45, %v8118_v10  ;;  %9587 = vst [vmem:[#allocation18_spill] sm:$0xff] %v8222_v24  ;;  %v9590_v45 = vsel %vm6657_vm4, %v8101_v3, %v8037_v46  ;;  %v4387_v46 = vrot.slane %v4385_v59, 4  ;;  %v4388_v3 = vrot.slane %v8175_v16, 5 }
 0x110   : > { %v8240_v23 = vcombine.low %v9590_v45, %v9589_v49  ;;  %9591 = vst [vmem:[#allocation14_spill] sm:$0xff] %v8253_v62  ;;  %v3757_v26 = vor.u32 %v3756_v7, %v3753_v50  ;;  %v8260_v28 = vcombine.low %v3715_v43, %v3725_v18  ;;  %v8262_v39 = vrot.slane %v3760_v60, 5 }
 0x111   : > { %v8228_v10 = vpop.f32.mrf.mxu0  ;;  %v8264_v35 = vrot.slane %v3764_v8, 4  ;;  %v3770_v37 = vshll.u32 %v8225_v33, 16  ;;  %v9593_v34 = vcombine.low %v7861_v54, %v7876_v56  ;;  %v3739_v50 = vsel %vm6657_vm4, %v3734_v14, %v8165_v11  ;;  %v5570_v54 = vld [vmem:[%s6613_s9 + $0x78] sm:$0xf] }
 0x112   : > { %9588 = vst [vmem:[#allocation12_spill] sm:$0xff] %v8228_v10  ;;  %9592 = vst [vmem:[#allocation19_spill] sm:$0xff] %v8260_v28  ;;  %v3749_v7 = vsel %vm6657_vm4, %v3744_v51, %v3748_v17  ;;  %v8284_v43 = vsel %vm6943_vm7, %v5648_v19, %v4385_v59  ;;  %v9595_v56 = vcombine.low %v7868_v29, %v7889_v42  ;;  %v3775_v60 = vshrl.u32 %v5567_v25, 16  ;;  %v8296_v51 = vld [vmem:[%s6613_s9 + $0x7c] sm:$0xf]  ;;  %v6306_v59 = vld [vmem:[%s6613_s9 + $0xc0] sm:$0xff]  }
 0x113   : > { %6111 = vmatmul.mubr.msk.bf16.gmra.mxu0 %vm675_vm3, %v6303_v2  ;;  %v8258_v2 = vld [vmem:[%s6613_s9 + $0x70] sm:$0xf]  ;;  %v8291_v18 = vpop.f32.mrf.mxu0  ;;  %v3778_v8 = vshll.u32 %v5567_v25, 16  ;;  %v8301_v17 = vsel %vm6943_vm7, %v4387_v46, %v4388_v3  ;;  %v8303_v29 = vrot.slane %v3757_v26, 4  ;;  %v5649_v42 = vrot.slane %v5633_v4, 9 }
 0x114   : > { %6114 = vmatprep.mubr.msk.bf16.mxu0 %vm675_vm3, %v6304_v41  ;;  %v6305_v41 = vld [vmem:[%s6613_s9 + $0xb4] sm:$0xff]   ;;  %9596 = vst [vmem:[#allocation21_spill] sm:$0xff] %v8291_v18  ;;  %v3784_v11 = vshll.u32 %v8258_v2, 16  ;;  %v3788_v14 = vshrl.u32 %v8258_v2, 16  ;;  %v4392_v19 = vrot.slane %v8196_v36, 5  ;;  %v8306_v49 = vcombine.low %v3739_v50, %v3749_v7 }
 0x115   : > { %v3767_v45 = vor.u32 %v8264_v35, %v8262_v39  ;;  %v8310_v25 = vrot.slane %v3770_v37, 5  ;;  %v3799_v46 = vshrl.u32 %v5570_v54, 16  ;;  %v3802_v3 = vshll.u32 %v5570_v54, 16  ;;  %v8322_v4 = vld [vmem:[%s6613_s9 + $0x88] sm:$0xf]  ;;  %v8325_v35 = vpop.f32.mrf.mxu0 }
 0x116   : > { %6077 = vmatmul.mubr.msk.bf16.gmra.mxu1 %vm675_vm3, %v9593_v34  ;;  %v8272_v16 = vpop.f32.mrf.mxu1  ;;  %9597 = vst [vmem:[#allocation22_spill] sm:$0xff] %v8306_v49  ;;  %v4395_v34 = vrot.slane %v8225_v33, 5  ;;  %v3808_v36 = vshll.u32 %v8296_v51, 16  ;;  %v3812_v26 = vshrl.u32 %v8296_v51, 16  ;;  %9599 = vst [vmem:[#allocation24_spill] sm:$0xff] %v8325_v35  ;;  %v3777_v33 = vrot.slane %v3775_v60, 4 }
 0x117   : > { %9594 = vst [vmem:[#allocation20_spill] sm:$0xff] %v8272_v16  ;;  %6080 = vmatprep.mubr.msk.bf16.mxu1 %vm675_vm3, %v9595_v56  ;;  %v8314_v56 = vld [vmem:[%s6613_s9 + $0x74] sm:$0x1]  ;;  %v3780_v37 = vrot.slane %v3778_v8, 5  ;;  %v8327_v50 = vrot.slane %v3784_v11, 5  ;;  %v3790_v7 = vrot.slane %v3788_v14, 4  ;;  %v9600_v54 = vcombine.low %v7880_v30, %v7896_v55  ;;  %v8355_v49 = vpop.f32.mrf.mxu0 }
 0x118   : > { %v8317_v58 = vpop.f32.mrf.mxu1  ;;  %v4394_v16 = vrot.slane %v4392_v19, 4  ;;  %v8340_v60 = vld [vmem:[%s6613_s9 + $0x80] sm:$0x1]  ;;  %v8343_v8 = vld [vmem:[%s6613_s9 + $0x6c] sm:$0xe]  ;;  %v3823_v11 = vshrl.u32 %v5573_v44, 16 }
 0x119   : > { %9598 = vst [vmem:[#allocation23_spill] sm:$0xff] %v8317_v58  ;;  %v8336_v58 = vsel %vm6943_vm7, %v5649_v42, %v4392_v19  ;;  %v3826_v14 = vshll.u32 %v5573_v44, 16  ;;  %v3836_v24 = vshrl.u32 %v8322_v4, 16  ;;  %v3801_v19 = vrot.slane %v3799_v46, 4  ;;  %9602 = vst [vmem:[#allocation26_spill] sm:$0xff] %v8355_v49 }
 0x11a   : > { %v8351_v42 = vpop.f32.mrf.mxu1  ;;  %v3804_v35 = vrot.slane %v3802_v3, 5  ;;  %v8353_v18 = vrot.slane %v3808_v36, 5  ;;  %v3814_v10 = vrot.slane %v3812_v26, 4  ;;  %v9603_v44 = vcombine.low %v7900_v15, %v7928_v32  ;;  %v8374_v32 = vld [vmem:[%s6613_s9 + $0x8c] sm:$0x1] }
 0x11b   : > { %6115 = vmatmul.mubr.msk.bf16.gmra.mxu0 %vm675_vm3, %v6305_v41  ;;  %v3794_v41 = vshll.u32 %v8314_v56, 16  ;;  %9601 = vst [vmem:[#allocation25_spill] sm:$0xff] %v8351_v42  ;;  %v3781_v30 = vor.u32 %v3780_v37, %v3777_v33  ;;  %v3791_v55 = vor.u32 %v3790_v7, %v8327_v50  ;;  %v3818_v46 = vshll.u32 %v8340_v60, 16  ;;  %v5635_v33 = vld [vmem:[%s6613_s9 + $0x78] sm:$0xe] }
 0x11c   : > { %6118 = vmatprep.mubr.msk.bf16.mxu0 %vm675_vm3, %v6306_v59  ;;  %v3832_v59 = vshll.u32 %v8322_v4, 16  ;;  %v8365_v3 = vrot.slane %v3767_v45, 4  ;;  %v8369_v36 = vsel %vm6943_vm7, %v4394_v16, %v4395_v34  ;;  %v5650_v26 = vrot.slane %v8343_v8, 9  ;;  %v8379_v42 = vpop.f32.mrf.mxu1  ;;  %v5576_v8 = vld [vmem:[%s6613_s9 + $0x90] sm:$0xf] }
 0x11d   : > { %v4406_v15 = vrot.slane %v8296_v51, 5  ;;  %v3825_v37 = vrot.slane %v3823_v11, 4  ;;  %v3828_v7 = vrot.slane %v3826_v14, 5  ;;  %9604 = vst [vmem:[#allocation27_spill] sm:$0xff] %v8379_v42  ;;  %v3796_v45 = vrot.slane %v3794_v41, 5 }
 0x11e   : > { %6081 = vmatmul.mubr.msk.bf16.gmra.mxu1 %vm675_vm3, %v9600_v54  ;;  %v4399_v54 = vrot.slane %v8258_v2, 5  ;;  %v8377_v2 = vrot.slane %v3832_v59, 5  ;;  %v4402_v49 = vrot.slane %v8314_v56, 5  ;;  %v3805_v16 = vor.u32 %v3804_v35, %v3801_v19  ;;  %v8388_v59 = vld [vmem:[%s6613_s9 + $0x94] sm:$0xf] }
 0x11f   : > { %6084 = vmatprep.mubr.msk.bf16.mxu1 %vm675_vm3, %v9603_v44  ;;  %v3838_v44 = vrot.slane %v3836_v24, 4  ;;  %v3815_v34 = vor.u32 %v3814_v10, %v8353_v18  ;;  %v3782_v51 = vrot.slane %v3781_v30, 4  ;;  %v3792_v11 = vrot.slane %v3791_v55, 4 }
 0x120   : > { %v4401_v62 = vrot.slane %v4399_v54, 4  ;;  %v3820_v14 = vrot.slane %v3818_v46, 5  ;;  %v9605_v24 = vcombine.low %v8021_v61, %v8025_v40  ;;  %v5651_v56 = vrot.slane %v5635_v33, 9 }
 0x121   : > { %v4408_v35 = vrot.slane %v4406_v15, 4  ;;  %v4409_v10 = vrot.slane %v8340_v60, 5  ;;  %v3842_v41 = vshll.u32 %v8374_v32, 16  ;;  %v3839_v30 = vor.u32 %v3838_v44, %v8377_v2 }
 0x122   : > { %v3847_v55 = vshrl.u32 %v5576_v8, 16  ;;  %v3850_v46 = vshll.u32 %v5576_v8, 16  ;;  %v9607_v61 = vcombine.low %v7940_v9, %v7945_v47  ;;  %v3806_v40 = vrot.slane %v3805_v16, 4 }
 0x123   : > { %v8384_v28 = vpop.f32.mrf.mxu0  ;;  %6119 = vmatmul.mubr.msk.bf16.gmra.mxu0 %vm675_vm3, %v6307_v13  ;;  %v3829_v13 = vor.u32 %v3828_v7, %v3825_v37  ;;  %v3816_v33 = vrot.slane %v3815_v34, 4  ;;  %v3856_v60 = vshll.u32 %v8388_v59, 16  ;;  %v3773_v37 = vsel %vm6657_vm4, %v8365_v3, %v8310_v25 }
 0x124   : > { %6158 = vmatprep.mubr.msk.bf16.mxu0 %vm675_vm3, %v9605_v24  ;;  %v3860_v24 = vshrl.u32 %v8388_v59, 16  ;;  %v3787_v9 = vsel %vm6657_vm4, %v3782_v51, %v8327_v50  ;;  %v8420_v47 = vsel %vm6943_vm7, %v5650_v26, %v4399_v54  ;;  %v8424_v7 = vsel %vm6943_vm7, %v4401_v62, %v4402_v49  ;;  %v5636_v54 = vld [vmem:[%s6613_s9 + $0x84] sm:$0xe]  ;;  %v9646_v31 = vld [vmem:[#allocation27_spill] sm:$0xff] }
 0x125   : > { %v8396_v19 = vpop.f32.mrf.mxu0  ;;  %v8432_v25 = vsel %vm6943_vm7, %v5651_v56, %v4406_v15  ;;  %v8436_v50 = vsel %vm6943_vm7, %v4408_v35, %v4409_v10  ;;  %v3844_v3 = vrot.slane %v3842_v41, 5  ;;  %v3830_v62 = vrot.slane %v3829_v13, 4  ;;  %v8460_v13 = vld [vmem:[%s6613_s9 + $0x98] sm:$0x1] }
 0x126   : > { %9606 = vst [vmem:[#allocation28_spill] sm:$0xff] %v8396_v19  ;;  %v8399_v42 = vpop.f32.mrf.mxu1  ;;  %6085 = vmatmul.mubr.msk.bf16.gmra.mxu1 %vm675_vm3, %v9607_v61  ;;  %v3840_v49 = vrot.slane %v3839_v30, 4  ;;  %v3849_v16 = vrot.slane %v3847_v55, 4  ;;  %v3852_v34 = vrot.slane %v3850_v46, 5  ;;  %v3811_v15 = vsel %vm6657_vm4, %v3806_v40, %v8353_v18  ;;  %v5579_v30 = vld [vmem:[%s6613_s9 + $0x9c] sm:$0xf] }
 0x127   : > { %v8407_v19 = vpop.f32.mrf.mxu0  ;;  %6124 = vmatprep.mubr.msk.bf16.mxu1 %vm675_vm3, %v8091_v27  ;;  %v3797_v27 = vsel %vm6657_vm4, %v3792_v11, %v3796_v45  ;;  %v3821_v45 = vsel %vm6657_vm4, %v3816_v33, %v3820_v14  ;;  %v8448_v51 = vrot.slane %v3856_v60, 5  ;;  %v3862_v11 = vrot.slane %v3860_v24, 4  ;;  %v8491_v24 = vld [vmem:[%s6613_s9 + $0xa0] sm:$0xf] }
 0x128   : > { %v8426_v44 = vpop.f32.mrf.mxu1  ;;  %v9608_v35 = vcombine.low %v8061_v48, %v8065_v38  ;;  %v5665_v10 = vcombine.low %v8284_v43, %v8301_v17  ;;  %v5666_v41 = vcombine.low %v8336_v58, %v8369_v36  ;;  %v5652_v18 = vrot.slane %v5636_v54, 9 }
 0x129   : > { %v8439_v26 = vpop.f32.mrf.mxu0  ;;  %v4413_v14 = vrot.slane %v8322_v4, 5  ;;  %v9609_v48 = vcombine.low %v8144_v6, %v8148_v22  ;;  %v9610_v38 = vsel %vm6657_vm4, %v8303_v29, %v8262_v39  ;;  %v8476_v61 = vcombine.low %v3787_v9, %v3797_v27  ;;  %v5637_v29 = vld [vmem:[%s6613_s9 + $0x90] sm:$0xe]  ;;  %v9617_v4 = vld [vmem:[#allocation5_spill] sm:$0xff] }
 0x12a   : > { %v8441_v8 = vpop.f32.mrf.mxu1  ;;  %v8474_v46 = vcombine.low %v9610_v38, %v3773_v37  ;;  %v8482_v60 = vcombine.low %v3811_v15, %v3821_v45  ;;  %v3835_v6 = vsel %vm6657_vm4, %v3830_v62, %v8377_v2  ;;  %v3845_v22 = vsel %vm6657_vm4, %v3840_v49, %v3844_v3 }
 0x12b   : > { %v5956_v56 = vpop.f32.mrf.mxu0  ;;  %6159 = vmatmul.mubr.msk.bf16.vlgmr.msra.gmra.mxu0 %vm675_vm3, %v9608_v35  ;;  %v3853_v39 = vor.u32 %v3852_v34, %v3849_v16  ;;  %v3863_v9 = vor.u32 %v3862_v11, %v8448_v51  ;;  %v3866_v27 = vshll.u32 %v8460_v13, 16  ;;  %v3871_v54 = vshrl.u32 %v5579_v30, 16 }
 0x12c   : > { %v8463_v55 = vpop.f32.mrf.mxu1  ;;  %6162 = vmatprep.mubr.msk.bf16.mxu0 %vm675_vm3, %v9609_v48  ;;  %v3874_v15 = vshll.u32 %v5579_v30, 16  ;;  %v8502_v3 = vsel %vm6943_vm7, %v5652_v18, %v4413_v14  ;;  %v4415_v62 = vrot.slane %v4413_v14, 4  ;;  %v4416_v49 = vrot.slane %v8374_v32, 5 }
 0x12d   : > { %v1479_v33 = vpop.f32.mrf.mxu0  ;;  %v5653_v16 = vrot.slane %v5637_v29, 9  ;;  %v4420_v34 = vrot.slane %v8388_v59, 5  ;;  %v3880_v11 = vshll.u32 %v8491_v24, 16  ;;  %v3884_v35 = vshrl.u32 %v8491_v24, 16 }
 0x12e   : > { %v5922_v37 = vpop.f32.mrf.mxu1  ;;  %6125 = vmatmul.mubr.msk.bf16.vlgmr.msra.gmra.mxu1 %vm675_vm3, %v8093_v57  ;;  %v8511_v48 = vcombine.low %v3835_v6, %v3845_v22  ;;  %v8513_v18 = vrot.slane %v3853_v39, 4  ;;  %v3864_v32 = vrot.slane %v3863_v9, 4  ;;  %v3868_v38 = vrot.slane %v3866_v27, 5  ;;  %v5582_v22 = vld [vmem:[%s6613_s9 + $0xa8] sm:$0xf] }
 0x12f   : > { %v1063_v45 = vadd.f32 %v5922_v37, %v7989_v5  ;;  %v5957_v2 = vpop.f32.mrf.mxu0  ;;  %6128 = vmatprep.mubr.msk.bf16.mxu1 %vm675_vm3, %v8240_v23  ;;  %v3873_v29 = vrot.slane %v3871_v54, 4  ;;  %v3876_v59 = vrot.slane %v3874_v15, 5  ;;  %v4423_v6 = vrot.slane %v8460_v13, 5  ;;  %v8539_v27 = vld [vmem:[%s6613_s9 + $0xac] sm:$0xf] }
 0x130   : > { %v1054_v57 = vpop.f32.mrf.mxu1  ;;  %v3886_v9 = vrot.slane %v3884_v35, 4  ;;  %v9614_v35 = vld [vmem:[#allocation11_spill] sm:$0xff] }
 0x131   : > { %v8508_v5 = vadd.f32 %v5956_v56, %v1063_v45  ;;  %v1055_v23 = vadd.f32 %v1054_v57, %v8013_v20  ;;  %v1482_v30 = vpop.f32.mrf.mxu0  ;;  %v9611_v45 = vcombine.low %v8181_v63, %v8207_v52  ;;  %v8524_v20 = vsel %vm6943_vm7, %v4415_v62, %v4416_v49  ;;  %v5638_v62 = vld [vmem:[%s6613_s9 + $0x9c] sm:$0xe] }
 0x132   : > { %v5923_v14 = vpop.f32.mrf.mxu1  ;;  %v4422_v63 = vrot.slane %v4420_v34, 4  ;;  %v8536_v52 = vrot.slane %v3880_v11, 5  ;;  %v4427_v49 = vrot.slane %v8491_v24, 5  ;;  %v3904_v24 = vshll.u32 %v8539_v27, 16 }
 0x133   : > { %v8515_v37 = vadd.f32 %v1479_v33, %v1055_v23  ;;  %v1066_v40 = vadd.f32 %v5923_v14, %v8032_v53  ;;  %v5960_v56 = vpop.f32.mrf.mxu0  ;;  %6163 = vmatmul.mubr.msk.bf16.gmra.mxu0 %vm675_vm3, %v9611_v45  ;;  %v9612_v33 = vcombine.low %v8246_v21, %v8250_v1  ;;  %v8534_v53 = vsel %vm6943_vm7, %v5653_v16, %v4420_v34  ;;  %v5581_v1 = vld [vmem:[%s6613_s9 + $0xa4] sm:$0x1]  ;;  %v9613_v16 = vld [vmem:[#allocation14_spill] sm:$0xff] }
 0x134   : > { %v1057_v39 = vpop.f32.mrf.mxu1  ;;  %v3859_v21 = vsel %vm6657_vm4, %v8513_v18, %v8448_v51  ;;  %v3895_v34 = vshrl.u32 %v5582_v22, 16  ;;  %v9615_v51 = vld [vmem:[#allocation19_spill] sm:$0xff]  ;;  %v3908_v18 = vshrl.u32 %v8539_v27, 16 }
 0x135   : > { %6166 = vmatprep.mubr.msk.bf16.mxu0 %vm675_vm3, %v9612_v33  ;;  %v8541_v54 = vadd.f32 %v5957_v2, %v1066_v40  ;;  %v1058_v13 = vadd.f32 %v1057_v39, %v8077_v12  ;;  %v1495_v15 = vpop.f32.mrf.mxu0  ;;  %v3869_v40 = vsel %vm6657_vm4, %v3864_v32, %v3868_v38  ;;  %v3877_v2 = vor.u32 %v3876_v59, %v3873_v29  ;;  %v9616_v59 = vld [vmem:[#allocation15_spill] sm:$0xff] }
 0x136   : > { %v5926_v57 = vpop.f32.mrf.mxu1  ;;  %6129 = vmatmul.mubr.msk.bf16.gmra.mxu1 %vm675_vm3, %v9613_v16  ;;  %v3898_v12 = vshll.u32 %v5582_v22, 16  ;;  %v8564_v39 = vsel %vm6943_vm7, %v4422_v63, %v4423_v6  ;;  %v3887_v32 = vor.u32 %v3886_v9, %v8536_v52  ;;  %v3890_v38 = vshll.u32 %v5581_v1, 16 }
 0x137   : > { %v8555_v11 = vadd.f32 %v1482_v30, %v1058_v13  ;;  %v1079_v23 = vadd.f32 %v5926_v57, %v9614_v35  ;;  %v5961_v14 = vpop.f32.mrf.mxu0  ;;  %6132 = vmatprep.mubr.msk.bf16.mxu1 %vm675_vm3, %v9615_v51  ;;  %v5654_v30 = vrot.slane %v5638_v62, 9  ;;  %v4429_v13 = vrot.slane %v4427_v49, 4 }
 0x138   : > { %v1070_v45 = vpop.f32.mrf.mxu1  ;;  %v4430_v57 = vrot.slane %v5581_v1, 5  ;;  %v8572_v51 = vrot.slane %v3877_v2, 4  ;;  %v3897_v6 = vrot.slane %v3895_v34, 4  ;;  %v3900_v63 = vrot.slane %v3898_v12, 5  ;;  %v8582_v1 = vld [vmem:[%s6613_s9 + $0xb0] sm:$0x1] }
 0x139   : > { %v8567_v29 = vadd.f32 %v5960_v56, %v1079_v23  ;;  %v1071_v22 = vadd.f32 %v1070_v45, %v9616_v59  ;;  %v1498_v33 = vpop.f32.mrf.mxu0  ;;  %v8584_v23 = vrot.slane %v3904_v24, 5  ;;  %v3910_v2 = vrot.slane %v3908_v18, 4  ;;  %v9618_v12 = vld [vmem:[#allocation17_spill] sm:$0xff] }
 0x13a   : > { %v5927_v16 = vpop.f32.mrf.mxu1  ;;  %v8594_v43 = vrot.slane %v3887_v32, 4  ;;  %v8596_v17 = vrot.slane %v3890_v38, 5  ;;  %v8604_v58 = vsel %vm6943_vm7, %v5654_v30, %v4427_v49  ;;  %v8608_v36 = vsel %vm6943_vm7, %v4429_v13, %v4430_v57  ;;  %v8620_v30 = vld [vmem:[%s6613_s9 + $0xb8] sm:$0xf] }
 0x13b   : > { %v8574_v9 = vadd.f32 %v1495_v15, %v1071_v22  ;;  %v1082_v62 = vadd.f32 %v5927_v16, %v9617_v4  ;;  %v5964_v56 = vpop.f32.mrf.mxu0  ;;  %6167 = vmatmul.mubr.msk.bf16.gmra.mxu0 %vm675_vm3, %v5665_v10  ;;  %v8590_v15 = vcombine.low %v3859_v21, %v3869_v40  ;;  %v5639_v10 = vld [vmem:[%s6613_s9 + $0xa8] sm:$0xe]  ;;  %v3901_v32 = vor.u32 %v3900_v63, %v3897_v6  ;;  %v9620_v22 = vld [vmem:[#allocation12_spill] sm:$0xff] }
 0x13c   : > { %v1073_v45 = vpop.f32.mrf.mxu1  ;;  %6170 = vmatprep.mubr.msk.bf16.mxu0 %vm675_vm3, %v5666_v41  ;;  %v5585_v41 = vld [vmem:[%s6613_s9 + $0xb4] sm:$0xf]  ;;  %v9619_v40 = vld [vmem:[#allocation22_spill] sm:$0xff]  ;;  %v3914_v38 = vshll.u32 %v8582_v1, 16  ;;  %v4434_v49 = vrot.slane %v8539_v27, 5  ;;  %v3911_v16 = vor.u32 %v3910_v2, %v8584_v23  ;;  %v3893_v27 = vsel %vm6657_vm4, %v8594_v43, %v8596_v17 }
 0x13d   : > { %v8599_v34 = vadd.f32 %v5961_v14, %v1082_v62  ;;  %v1074_v24 = vadd.f32 %v1073_v45, %v9618_v12  ;;  %v1511_v18 = vpop.f32.mrf.mxu0  ;;  %v5655_v62 = vrot.slane %v5639_v10, 9  ;;  %v3919_v6 = vshrl.u32 %v5585_v41, 16 }
 0x13e   : > { %v5930_v21 = vpop.f32.mrf.mxu1  ;;  %6133 = vmatmul.mubr.msk.bf16.gmra.mxu1 %vm675_vm3, %v9619_v40  ;;  %v3922_v63 = vshll.u32 %v5585_v41, 16  ;;  %v3928_v2 = vshll.u32 %v8620_v30, 16  ;;  %v3932_v10 = vshrl.u32 %v8620_v30, 16  ;;  %v5588_v40 = vld [vmem:[%s6613_s9 + $0xc0] sm:$0xf]  ;;  %v3902_v4 = vrot.slane %v3901_v32, 4 }
 0x13f   : > { %v8622_v59 = vadd.f32 %v1498_v33, %v1074_v24  ;;  %v1095_v13 = vadd.f32 %v5930_v21, %v9620_v22  ;;  %v5965_v57 = vpop.f32.mrf.mxu0  ;;  %6136 = vmatprep.mubr.msk.bf16.mxu1 %vm675_vm3, %v8474_v46  ;;  %v9622_v24 = vld [vmem:[#allocation21_spill] sm:$0xff]  ;;  %v3916_v43 = vrot.slane %v3914_v38, 5  ;;  %v4436_v17 = vrot.slane %v4434_v49, 4 }
 0x140   : > { %v1086_v45 = vpop.f32.mrf.mxu1  ;;  %v4437_v33 = vrot.slane %v8582_v1, 5  ;;  %v8650_v14 = vsel %vm6943_vm7, %v5655_v62, %v4434_v49  ;;  %v8653_v32 = vld [vmem:[%s6613_s9 + $0xc4] sm:$0xf]  ;;  %v9626_v1 = vcombine.low %v8432_v25, %v8436_v50  ;;  %v8665_v62 = vrot.slane %v3928_v2, 5 }
 0x141   : > { %v8634_v12 = vadd.f32 %v5964_v56, %v1095_v13  ;;  %v1087_v21 = vadd.f32 %v1086_v45, %v9622_v24  ;;  %v1514_v46 = vpop.f32.mrf.mxu0  ;;  %v9624_v56 = vld [vmem:[#allocation24_spill] sm:$0xff]  ;;  %v9625_v45 = vcombine.low %v8420_v47, %v8424_v7  ;;  %v3912_v24 = vrot.slane %v3911_v16, 4  ;;  %v9627_v16 = vld [vmem:[#allocation26_spill] sm:$0xff] }
 0x142   : > { %v5931_v22 = vpop.f32.mrf.mxu1  ;;  %v3943_v47 = vshrl.u32 %v5588_v40, 16  ;;  %v3946_v7 = vshll.u32 %v5588_v40, 16  ;;  %v3907_v25 = vsel %vm6657_vm4, %v3902_v4, %v8584_v23  ;;  %v8674_v50 = vsel %vm6943_vm7, %v4436_v17, %v4437_v33  ;;  %v5640_v40 = vld [vmem:[%s6613_s9 + $0xb4] sm:$0xe] }
 0x143   : > { %9621 = vst [vmem:[#allocation14_spill] sm:$0xff] %v8634_v12  ;;  %v8641_v35 = vadd.f32 %v1511_v18, %v1087_v21  ;;  %v1098_v41 = vadd.f32 %v5931_v22, %v9624_v56  ;;  %v5968_v13 = vpop.f32.mrf.mxu0  ;;  %6171 = vmatmul.mubr.msk.bf16.gmra.mxu0 %vm675_vm3, %v9625_v45  ;;  %v8660_v18 = vld [vmem:[%s6613_s9 + $0xbc] sm:$0x1]  ;;  %v3921_v21 = vrot.slane %v3919_v6, 4  ;;  %v3924_v22 = vrot.slane %v3922_v63, 5 }
 0x144   : > { %v1089_v38 = vpop.f32.mrf.mxu1  ;;  %6174 = vmatprep.mubr.msk.bf16.mxu0 %vm675_vm3, %v9626_v1  ;;  %v3956_v6 = vshrl.u32 %v8653_v32, 16  ;;  %v3938_v23 = vshll.u32 %v8660_v18, 16  ;;  %v4441_v17 = vrot.slane %v8620_v30, 5  ;;  %v9628_v1 = vld [vmem:[#allocation28_spill] sm:$0xff] }
 0x145   : > { %9623 = vst [vmem:[#allocation11_spill] sm:$0xff] %v8641_v35  ;;  %v8662_v56 = vadd.f32 %v5965_v57, %v1098_v41  ;;  %v1090_v45 = vadd.f32 %v1089_v38, %v9627_v16  ;;  %v1527_v49 = vpop.f32.mrf.mxu0  ;;  %v3934_v35 = vrot.slane %v3932_v10, 4  ;;  %v3952_v57 = vshll.u32 %v8653_v32, 16 }
 0x146   : > { %v5934_v12 = vpop.f32.mrf.mxu1  ;;  %6137 = vmatmul.mubr.msk.bf16.gmra.mxu1 %vm675_vm3, %v8476_v61  ;;  %v3917_v61 = vsel %vm6657_vm4, %v3912_v24, %v3916_v43  ;;  %v3925_v33 = vor.u32 %v3924_v22, %v3921_v21  ;;  %v3945_v41 = vrot.slane %v3943_v47, 4  ;;  %v3948_v38 = vrot.slane %v3946_v7, 5 }
 0x147   : > { %v8678_v63 = vadd.f32 %v1514_v46, %v1090_v45  ;;  %v1111_v2 = vadd.f32 %v5934_v12, %v8384_v28  ;;  %v5969_v10 = vpop.f32.mrf.mxu0  ;;  %6140 = vmatprep.mubr.msk.bf16.mxu1 %vm675_vm3, %v8482_v60  ;;  %v9629_v60 = vsel %vm6657_vm4, %v8572_v51, %v8536_v52  ;;  %v3935_v24 = vor.u32 %v3934_v35, %v8665_v62 }
 0x148   : > { %v1102_v4 = vpop.f32.mrf.mxu1  ;;  %v8696_v43 = vcombine.low %v9629_v60, %v3893_v27  ;;  %v8699_v30 = vcombine.low %v3907_v25, %v3917_v61  ;;  %v8703_v22 = vrot.slane %v3952_v57, 5  ;;  %v3958_v47 = vrot.slane %v3956_v6, 4  ;;  %v5590_v27 = vld [vmem:[%s6613_s9 + $0xc8] sm:$0x1] }
 0x149   : > { %v8688_v46 = vadd.f32 %v5968_v13, %v1111_v2  ;;  %v1103_v28 = vadd.f32 %v1102_v4, %v9628_v1  ;;  %v1530_v12 = vpop.f32.mrf.mxu0  ;;  %v5672_v13 = vcombine.low %v8650_v14, %v8674_v50  ;;  %v9630_v52 = vcombine.low %v8502_v3, %v8524_v20  ;;  %v5591_v14 = vld [vmem:[%s6613_s9 + $0xcc] sm:$0xf]  ;;  %v8724_v20 = vld [vmem:[%s6613_s9 + $0xd0] sm:$0xf]  ;;  %v5641_v4 = vld [vmem:[%s6613_s9 + $0xc0] sm:$0xe] }
 0x14a   : > { %v5935_v21 = vpop.f32.mrf.mxu1  ;;  %v8712_v35 = vrot.slane %v3938_v23, 5  ;;  %v5656_v51 = vrot.slane %v5640_v40, 9  ;;  %v9631_v50 = vcombine.low %v8534_v53, %v8564_v39  ;;  %v4444_v57 = vrot.slane %v8660_v18, 5 }
 0x14b   : > { %v8705_v7 = vadd.f32 %v1527_v49, %v1103_v28  ;;  %v1114_v16 = vadd.f32 %v5935_v21, %v8407_v19  ;;  %v5972_v45 = vpop.f32.mrf.mxu0  ;;  %6175 = vmatmul.mubr.msk.bf16.gmra.mxu0 %vm675_vm3, %v9630_v52  ;;  %v8720_v49 = vrot.slane %v3925_v33, 4  ;;  %v4443_v19 = vrot.slane %v4441_v17, 4 }
 0x14c   : > { %v1105_v25 = vpop.f32.mrf.mxu1  ;;  %6178 = vmatprep.mubr.msk.bf16.mxu0 %vm675_vm3, %v9631_v50  ;;  %v3949_v3 = vor.u32 %v3948_v38, %v3945_v41  ;;  %v8729_v23 = vrot.slane %v3935_v24, 4  ;;  %v4448_v53 = vrot.slane %v8653_v32, 5  ;;  %v3959_v33 = vor.u32 %v3958_v47, %v8703_v22 }
 0x14d   : > { %v8726_v6 = vadd.f32 %v5969_v10, %v1114_v16  ;;  %v1106_v2 = vadd.f32 %v1105_v25, %v8439_v26  ;;  %v1543_v61 = vpop.f32.mrf.mxu0  ;;  %v3962_v18 = vshll.u32 %v5590_v27, 16  ;;  %v3967_v40 = vshrl.u32 %v5591_v14, 16  ;;  %v9634_v10 = vld [vmem:[#allocation7_spill] sm:$0xff]  ;;  %v9635_v16 = vld [vmem:[#allocation6_spill] sm:$0xff] }
 0x14e   : > { %v5938_v39 = vpop.f32.mrf.mxu1  ;;  %6141 = vmatmul.mubr.msk.bf16.gmra.mxu1 %vm675_vm3, %v8511_v48  ;;  %v3970_v41 = vshll.u32 %v5591_v14, 16  ;;  %v3976_v28 = vshll.u32 %v8724_v20, 16  ;;  %v3980_v32 = vshrl.u32 %v8724_v20, 16  ;;  %v4442_v48 = vsel %vm6943_vm7, %v5656_v51, %v4441_v17  ;;  %v9636_v17 = vld [vmem:[#allocation9_spill] sm:$0xff] }
 0x14f   : > { %9632 = vst [vmem:[#allocation19_spill] sm:$0xff] %v8726_v6  ;;  %v8736_v38 = vadd.f32 %v1530_v12, %v1106_v2  ;;  %v1127_v1 = vadd.f32 %v5938_v39, %v9634_v10  ;;  %v5973_v26 = vpop.f32.mrf.mxu0  ;;  %6144 = vmatprep.mubr.msk.bf16.mxu1 %vm675_vm3, %v8590_v15  ;;  %v4445_v24 = vsel %vm6943_vm7, %v4443_v19, %v4444_v57  ;;  %v3950_v21 = vrot.slane %v3949_v3, 4 }
 0x150   : > { %v1118_v60 = vpop.f32.mrf.mxu1  ;;  %v5657_v12 = vrot.slane %v5641_v4, 9  ;;  %v4450_v25 = vrot.slane %v4448_v53, 4  ;;  %v4451_v15 = vrot.slane %v5590_v27, 5  ;;  %v3960_v2 = vrot.slane %v3959_v33, 4  ;;  %v5593_v33 = vld [vmem:[%s6613_s9 + $0xd4] sm:$0x1] }
 0x151   : > { %9633 = vst [vmem:[#allocation15_spill] sm:$0xff] %v8736_v38  ;;  %v8747_v47 = vadd.f32 %v5972_v45, %v1127_v1  ;;  %v1119_v52 = vadd.f32 %v1118_v60, %v9635_v16  ;;  %v1546_v14 = vpop.f32.mrf.mxu0  ;;  %v3964_v39 = vrot.slane %v3962_v18, 5  ;;  %v3969_v10 = vrot.slane %v3967_v40, 4  ;;  %v9638_v18 = vld [vmem:[#allocation8_spill] sm:$0xff] }
 0x152   : > { %v5939_v50 = vpop.f32.mrf.mxu1  ;;  %v3972_v38 = vrot.slane %v3970_v41, 5  ;;  %v9637_v45 = vcombine.low %v8604_v58, %v8608_v36  ;;  %v8757_v57 = vrot.slane %v3976_v28, 5  ;;  %v3982_v27 = vrot.slane %v3980_v32, 4 }
 0x153   : > { %v8750_v6 = vadd.f32 %v1543_v61, %v1119_v52  ;;  %v1130_v51 = vadd.f32 %v5939_v50, %v9636_v17  ;;  %v5976_v19 = vpop.f32.mrf.mxu0  ;;  %v3931_v61 = vsel %vm6657_vm4, %v8720_v49, %v8665_v62  ;;  %v3941_v4 = vsel %vm6657_vm4, %v8729_v23, %v8712_v35  ;;  %v5642_v62 = vld [vmem:[%s6613_s9 + $0xcc] sm:$0xe]  ;;  %s9260_s9 = scalar_lea.vmem [#allocation2], %s9235_s8 }
 0x154   : > { %6179 = vmatmul.mubr.msk.bf16.gmra.mxu0 %vm675_vm3, %v9637_v45  ;;  %v1121_v3 = vpop.f32.mrf.mxu1  ;;  %v4455_v58 = vrot.slane %v8724_v20, 5  ;;  %v4452_v1 = vsel %vm6943_vm7, %v4450_v25, %v4451_v15  ;;  %v5673_v35 = vcombine.low %v4442_v48, %v4445_v24  ;;  %v3955_v20 = vsel %vm6657_vm4, %v3950_v21, %v8703_v22  ;;  %v9640_v25 = vld [vmem:[#allocation13_spill] sm:$0xff]  ;;  %s5066_s11 = sshll.u32 %s9260_s9, 4  ;;  %s9404_s11 = int_to_ptr.vmem [resolvable:$true] %s5066_s11 }
 0x155   : > { %6182 = vmatprep.mubr.msk.bf16.mxu0 %vm675_vm3, %v5672_v13  ;;  %v8770_v36 = vadd.f32 %v5973_v26, %v1130_v51  ;;  %v1122_v40 = vadd.f32 %v1121_v3, %v9638_v18  ;;  %v1559_v41 = vpop.f32.mrf.mxu0  ;;  %v4449_v13 = vsel %vm6943_vm7, %v5657_v12, %v4448_v53  ;;  %v3965_v23 = vsel %vm6657_vm4, %v3960_v2, %v3964_v39  ;;  %v9639_v53 = vld [vmem:[#allocation10_spill] sm:$0xff]  ;;  %s6438_s23 = scalar_lea.vmem %s9404_s11, 4096  ;;  %p6445_p1 = scmp.lt.s32.totalorder %s9404_s11, %s6443_s27 }
 0x156   : > { %v5942_v49 = vpop.f32.mrf.mxu1  ;;  %6145 = vmatmul.mubr.msk.bf16.gmra.mxu1 %vm675_vm3, %v8696_v43  ;;  %v3973_v26 = vor.u32 %v3972_v38, %v3969_v10  ;;  %v3983_v12 = vor.u32 %v3982_v27, %v8757_v57  ;;  %v3986_v43 = vshll.u32 %v5593_v33, 16  ;;  %v5674_v24 = vcombine.low %v4449_v13, %v4452_v1  ;;  %p6439_p12 = scmp.ne.s32.totalorder %s9404_s11, %s6438_s23  ;;  %p6446_p2 = scmp.lt.s32.totalorder %s6444_s28, %s6438_s23 }
 0x157   : > { %v8785_v28 = vadd.f32 %v1546_v14, %v1122_v40  ;;  %v1143_v32 = vadd.f32 %v5942_v49, %v9639_v53  ;;  %v5977_v60 = vpop.f32.mrf.mxu0  ;;  %6148 = vmatprep.mubr.msk.bf16.mxu1 %vm675_vm3, %v8699_v30  ;;  %v5658_v16 = vrot.slane %v5642_v62, 9  ;;  %v4457_v52 = vrot.slane %v4455_v58, 4  ;;  %v9641_v30 = vld [vmem:[#allocation16_spill] sm:$0xff] }
 0x158   : > { %v1134_v48 = vpop.f32.mrf.mxu1  ;;  %v4458_v22 = vrot.slane %v5593_v33, 5  ;;  %v5608_v50 = vcombine.low %v3931_v61, %v3941_v4  ;;  %v5609_v2 = vcombine.low %v3955_v20, %v3965_v23  ;;  %v3974_v39 = vrot.slane %v3973_v26, 4  ;;  %v9642_v33 = vld [vmem:[#allocation18_spill] sm:$0xff]  ;;  %v9643_v62 = vld [vmem:[#allocation20_spill] sm:$0xff]  ;;  %v9644_v26 = vld [vmem:[#allocation23_spill] sm:$0xff]  ;;  %p6440_p13 = pnand %p6439_p12, %p6579_p4  ;;  %p6447_p3 = por %p6446_p2, %p6445_p1 }
 0x159   : > { %v8791_v21 = vadd.f32 %v5976_v19, %v1143_v32  ;;  %v1135_v38 = vadd.f32 %v1134_v48, %v9640_v25  ;;  %v1562_v14 = vpop.f32.mrf.mxu0  ;;  %v3984_v45 = vrot.slane %v3983_v12, 4  ;;  %v3988_v27 = vrot.slane %v3986_v43, 5  ;;  %v9645_v43 = vld [vmem:[#allocation25_spill] sm:$0xff] }
 0x15a   : > { %v5943_v15 = vpop.f32.mrf.mxu1  ;;  %v4456_v19 = vsel %vm6943_vm7, %v5658_v16, %v4455_v58  ;;  %v4459_v61 = vsel %vm6943_vm7, %v4457_v52, %v4458_v22  ;;  %v3979_v13 = vsel %vm6657_vm4, %v3974_v39, %v8757_v57  ;;  %p6441_p0 = pneg %p6440_p13 }
 0x15b   : > { %v8794_v10 = vadd.f32 %v1559_v41, %v1135_v38  ;;  %v1146_v17 = vadd.f32 %v5943_v15, %v9641_v30  ;;  %v5980_v51 = vpop.f32.mrf.mxu0  ;;  %v3989_v0 = vsel %vm6657_vm4, %v3984_v45, %v3988_v27 }
 0x15c   : > { %6183 = vmatmul.mubr.msk.bf16.gmra.mxu0 %vm675_vm3, %v5673_v35  ;;  %v1137_v3 = vpop.f32.mrf.mxu1  ;;  %v5675_v35 = vcombine.low %v4456_v19, %v4459_v61  ;;  %v5610_v12 = vcombine.low %v3979_v13, %v3989_v0  ;;  %p6448_p5 = pnand %p6447_p3, %p6441_p0 }
 0x15d   : > { %6186 = vmatprep.mubr.msk.bf16.mxu0 %vm675_vm3, %v5674_v24  ;;  %v8803_v4 = vadd.f32 %v5977_v60, %v1146_v17  ;;  %v1138_v18 = vadd.f32 %v1137_v3, %v9642_v33  ;;  %v1575_v40 = vpop.f32.mrf.mxu0 }
 0x15e   : > { %v5946_v41 = vpop.f32.mrf.mxu1  ;;  %6149 = vmatmul.mubr.msk.bf16.gmra.mxu1 %vm675_vm3, %v5608_v50 }
 0x15f   : > { %v8810_v1 = vadd.f32 %v1562_v14, %v1138_v18  ;;  %v1159_v49 = vadd.f32 %v5946_v41, %v9643_v62  ;;  %v5981_v58 = vpop.f32.mrf.mxu0  ;;  %6152 = vmatprep.mubr.msk.bf16.mxu1 %vm675_vm3, %v5609_v2 }
 0x160   : > { %v1150_v20 = vpop.f32.mrf.mxu1 }
 0x161   : > { %v8816_v23 = vadd.f32 %v5980_v51, %v1159_v49  ;;  %v1151_v53 = vadd.f32 %v1150_v20, %v9644_v26  ;;  %v1578_v32 = vpop.f32.mrf.mxu0 }
 0x162   : > { %v5947_v60 = vpop.f32.mrf.mxu1 }
 0x163   : > { %v8819_v57 = vadd.f32 %v1575_v40, %v1151_v53  ;;  %v1162_v48 = vadd.f32 %v5947_v60, %v9645_v43  ;;  %v5984_v24 = vpop.f32.mrf.mxu0 }
 0x164   : > { %6187 = vmatmul.mubr.msk.bf16.gmra.mxu0 %vm675_vm3, %v5675_v35  ;;  %v1153_v16 = vpop.f32.mrf.mxu1 }
 0x165   : > { %v8823_v52 = vadd.f32 %v5981_v58, %v1162_v48  ;;  %v1154_v22 = vadd.f32 %v1153_v16, %v9646_v31  ;;  %v1591_v25 = vpop.f32.mrf.mxu0 }
 0x166   : > { %v5950_v38 = vpop.f32.mrf.mxu1  ;;  %6153 = vmatmul.mubr.msk.bf16.gmra.mxu1 %vm675_vm3, %v5610_v12 }
 0x167   : > { %v8827_v14 = vadd.f32 %v1578_v32, %v1154_v22  ;;  %v1175_v15 = vadd.f32 %v5950_v38, %v8399_v42  ;;  %v5985_v50 = vpop.f32.mrf.mxu0 }
 0x168   : > { %v1166_v2 = vpop.f32.mrf.mxu1 }
 0x169   : > { %v8830_v39 = vadd.f32 %v5984_v24, %v1175_v15  ;;  %v1167_v30 = vadd.f32 %v1166_v2, %v8426_v44  ;;  %v1594_v17 = vpop.f32.mrf.mxu0 }
 0x16a   : > { %v5951_v51 = vpop.f32.mrf.mxu1 }
 0x16b   : > { %v8833_v45 = vadd.f32 %v1591_v25, %v1167_v30  ;;  %v1178_v27 = vadd.f32 %v5951_v51, %v8441_v8  ;;  %v6024_v3 = vpop.f32.mrf.mxu0  ;;  %v9647_v30 = vld [vmem:[#allocation14_spill] sm:$0xff] }
 0x16c   : > { %v1169_v19 = vpop.f32.mrf.mxu1 }
 0x16d   : > { %v8836_v61 = vadd.f32 %v5985_v50, %v1178_v27  ;;  %v1170_v33 = vadd.f32 %v1169_v19, %v8463_v55  ;;  %v2567_v18 = vpop.f32.mrf.mxu0 }
 0x16e   : > { %v5990_v42 = vpop.f32.mrf.mxu1 }
 0x16f   : > { %v8839_v40 = vadd.f32 %v1594_v17, %v1170_v33  ;;  %v1970_v41 = vadd.f32 %v5990_v42, %v8508_v5  ;;  %v6025_v13 = vpop.f32.mrf.mxu0 }
 0x170   : > { %v1841_v44 = vpop.f32.mrf.mxu1 }
 0x171   : > { %v8842_v62 = vadd.f32 %v6024_v3, %v1970_v41  ;;  %v1968_v49 = vadd.f32 %v1841_v44, %v8515_v37  ;;  %v2570_v58 = vpop.f32.mrf.mxu0  ;;  %v9648_v3 = vld [vmem:[#allocation11_spill] sm:$0xff] }
 0x172   : > { %v5991_v8 = vpop.f32.mrf.mxu1 }
 0x173   : > { %v8845_v0 = vadd.f32 %v2567_v18, %v1968_v49  ;;  %v1971_v35 = vadd.f32 %v5991_v8, %v8541_v54  ;;  %v6028_v20 = vpop.f32.mrf.mxu0 }
 0x174   : > { %v1844_v55 = vpop.f32.mrf.mxu1 }
 0x175   : > { %v8848_v26 = vadd.f32 %v6025_v13, %v1971_v35  ;;  %v1969_v53 = vadd.f32 %v1844_v55, %v8555_v11  ;;  %v2583_v32 = vpop.f32.mrf.mxu0 }
 0x176   : > { %v5994_v5 = vpop.f32.mrf.mxu1 }
 0x177   : > { %v8851_v60 = vadd.f32 %v2570_v58, %v1969_v53  ;;  %v1974_v12 = vadd.f32 %v5994_v5, %v8567_v29  ;;  %v6029_v43 = vpop.f32.mrf.mxu0 }
 0x178   : > { %v1857_v37 = vpop.f32.mrf.mxu1 }
 0x179   : > { %v8854_v48 = vadd.f32 %v6028_v20, %v1974_v12  ;;  %v1972_v24 = vadd.f32 %v1857_v37, %v8574_v9  ;;  %v2586_v16 = vpop.f32.mrf.mxu0 }
 0x17a   : > { %v5995_v54 = vpop.f32.mrf.mxu1 }
 0x17b   : > { %v8857_v31 = vadd.f32 %v2583_v32, %v1972_v24  ;;  %v1975_v22 = vadd.f32 %v5995_v54, %v8599_v34  ;;  %v6032_v25 = vpop.f32.mrf.mxu0  ;;  %v9650_v54 = vld [vmem:[#allocation15_spill] sm:$0xff] }
 0x17c   : > { %v1860_v11 = vpop.f32.mrf.mxu1 }
 0x17d   : > { %v8860_v38 = vadd.f32 %v6029_v43, %v1975_v22  ;;  %v1973_v15 = vadd.f32 %v1860_v11, %v8622_v59  ;;  %v2599_v50 = vpop.f32.mrf.mxu0  ;;  %v9649_v43 = vld [vmem:[#allocation19_spill] sm:$0xff] }
 0x17e   : > { %v5998_v29 = vpop.f32.mrf.mxu1 }
 0x17f   : > { %v8863_v2 = vadd.f32 %v2586_v16, %v1973_v15  ;;  %v1978_v17 = vadd.f32 %v5998_v29, %v9647_v30  ;;  %v6033_v51 = vpop.f32.mrf.mxu0 }
 0x180   : > { %v1873_v9 = vpop.f32.mrf.mxu1 }
 0x181   : > { %v8866_v27 = vadd.f32 %v6032_v25, %v1978_v17  ;;  %v1976_v19 = vadd.f32 %v1873_v9, %v9648_v3  ;;  %v2602_v33 = vpop.f32.mrf.mxu0 }
 0x182   : > { %v5999_v34 = vpop.f32.mrf.mxu1 }
 0x183   : > { %v8869_v18 = vadd.f32 %v2599_v50, %v1976_v19  ;;  %v1979_v42 = vadd.f32 %v5999_v34, %v8662_v56  ;;  %v6036_v41 = vpop.f32.mrf.mxu0 }
 0x184   : > { %v1876_v59 = vpop.f32.mrf.mxu1 }
 0x185   : > { %v8872_v13 = vadd.f32 %v6033_v51, %v1979_v42  ;;  %v1977_v44 = vadd.f32 %v1876_v59, %v8678_v63  ;;  %v2615_v49 = vpop.f32.mrf.mxu0 }
 0x186   : > { %v6002_v58 = vpop.f32.mrf.mxu1 }
 0x187   : > { %v8875_v8 = vadd.f32 %v2602_v33, %v1977_v44  ;;  %v1982_v35 = vadd.f32 %v6002_v58, %v8688_v46  ;;  %v6037_v20 = vpop.f32.mrf.mxu0 }
 0x188   : > { %v1889_v55 = vpop.f32.mrf.mxu1 }
 0x189   : > { %v8878_v53 = vadd.f32 %v6036_v41, %v1982_v35  ;;  %v1980_v32 = vadd.f32 %v1889_v55, %v8705_v7  ;;  %v2618_v5 = vpop.f32.mrf.mxu0 }
 0x18a   : > { %v6003_v56 = vpop.f32.mrf.mxu1 }
 0x18b   : > { %v8881_v12 = vadd.f32 %v2615_v49, %v1980_v32  ;;  %v1983_v37 = vadd.f32 %v6003_v56, %v9649_v43  ;;  %v6040_v24 = vpop.f32.mrf.mxu0 }
 0x18c   : > { %v1892_v63 = vpop.f32.mrf.mxu1 }
 0x18d   : > { %v8884_v16 = vadd.f32 %v6037_v20, %v1983_v37  ;;  %v1981_v22 = vadd.f32 %v1892_v63, %v9650_v54  ;;  %v2631_v25 = vpop.f32.mrf.mxu0 }
 0x18e   : > { %v6006_v46 = vpop.f32.mrf.mxu1 }
 0x18f   : > { %v8887_v11 = vadd.f32 %v2618_v5, %v1981_v22  ;;  %v1986_v15 = vadd.f32 %v6006_v46, %v8747_v47  ;;  %v6041_v50 = vpop.f32.mrf.mxu0 }
 0x190   : > { %v1905_v7 = vpop.f32.mrf.mxu1 }
 0x191   : > { %v8890_v29 = vadd.f32 %v6040_v24, %v1986_v15  ;;  %v1984_v30 = vadd.f32 %v1905_v7, %v8750_v6  ;;  %v2634_v17 = vpop.f32.mrf.mxu0 }
 0x192   : > { %v6007_v51 = vpop.f32.mrf.mxu1 }
 0x193   : > { %v8893_v9 = vadd.f32 %v2631_v25, %v1984_v30  ;;  %v1987_v3 = vadd.f32 %v6007_v51, %v8770_v36  ;;  %v6044_v19 = vpop.f32.mrf.mxu0 }
 0x194   : > { %v1908_v33 = vpop.f32.mrf.mxu1 }
 0x195   : > { %v8896_v34 = vadd.f32 %v6041_v50, %v1987_v3  ;;  %v1985_v42 = vadd.f32 %v1908_v33, %v8785_v28  ;;  %v2647_v41 = vpop.f32.mrf.mxu0 }
 0x196   : > { %v6010_v47 = vpop.f32.mrf.mxu1 }
 0x197   : > { %v8899_v59 = vadd.f32 %v2634_v17, %v1985_v42  ;;  %v1990_v44 = vadd.f32 %v6010_v47, %v8791_v21  ;;  %v6045_v49 = vpop.f32.mrf.mxu0 }
 0x198   : > { %v1921_v6 = vpop.f32.mrf.mxu1 }
 0x199   : > { %9651 = vst [vmem:[#allocation5_spill] sm:$0xff] %v8899_v59  ;;  %v8902_v58 = vadd.f32 %v6044_v19, %v1990_v44  ;;  %v1988_v35 = vadd.f32 %v1921_v6, %v8794_v10  ;;  %v2650_v20 = vpop.f32.mrf.mxu0 }
 0x19a   : > { %v6011_v36 = vpop.f32.mrf.mxu1 }
 0x19b   : > { %9652 = vst [vmem:[#allocation17_spill] sm:$0xff] %v8902_v58  ;;  %v8905_v55 = vadd.f32 %v2647_v41, %v1988_v35  ;;  %v1991_v32 = vadd.f32 %v6011_v36, %v8803_v4  ;;  %v6048_v5 = vpop.f32.mrf.mxu0 }
 0x19c   : > { %v1924_v28 = vpop.f32.mrf.mxu1 }
 0x19d   : > { %9653 = vst [vmem:[#allocation22_spill] sm:$0xff] %v8905_v55  ;;  %v8908_v56 = vadd.f32 %v6045_v49, %v1991_v32  ;;  %v1989_v43 = vadd.f32 %v1924_v28, %v8810_v1  ;;  %v2663_v37 = vpop.f32.mrf.mxu0 }
 0x19e   : > { %v6014_v21 = vpop.f32.mrf.mxu1 }
 0x19f   : > { %9654 = vst [vmem:[#allocation12_spill] sm:$0xff] %v8908_v56  ;;  %v8911_v24 = vadd.f32 %v2650_v20, %v1989_v43  ;;  %v1994_v63 = vadd.f32 %v6014_v21, %v8816_v23  ;;  %v6049_v54 = vpop.f32.mrf.mxu0 }
 0x1a0   : > { %v1937_v10 = vpop.f32.mrf.mxu1 }
 0x1a1   : > { %9655 = vst [vmem:[#allocation21_spill] sm:$0xff] %v8911_v24  ;;  %v8914_v22 = vadd.f32 %v6048_v5, %v1994_v63  ;;  %v1992_v25 = vadd.f32 %v1937_v10, %v8819_v57  ;;  %v2666_v46 = vpop.f32.mrf.mxu0 }
 0x1a2   : > { %v6015_v4 = vpop.f32.mrf.mxu1 }
 0x1a3   : > { %9656 = vst [vmem:[#allocation24_spill] sm:$0xff] %v8914_v22  ;;  %v8917_v15 = vadd.f32 %v2663_v37, %v1992_v25  ;;  %v1995_v50 = vadd.f32 %v6015_v4, %v8823_v52  ;;  %v6052_v7 = vpop.f32.mrf.mxu0 }
 0x1a4   : > { %v1940_v1 = vpop.f32.mrf.mxu1 }
 0x1a5   : > { %9657 = vst [vmem:[#allocation26_spill] sm:$0xff] %v8917_v15  ;;  %v8920_v30 = vadd.f32 %v6049_v54, %v1995_v50  ;;  %v1993_v17 = vadd.f32 %v1940_v1, %v8827_v14  ;;  %v2679_v51 = vpop.f32.mrf.mxu0 }
 0x1a6   : > { %v6018_v23 = vpop.f32.mrf.mxu1 }
 0x1a7   : > { %9658 = vst [vmem:[#allocation28_spill] sm:$0xff] %v8920_v30  ;;  %v8923_v3 = vadd.f32 %v2666_v46, %v1993_v17  ;;  %v1998_v19 = vadd.f32 %v6018_v23, %v8830_v39  ;;  %v6053_v33 = vpop.f32.mrf.mxu0 }
 0x1a8   : > { %v1953_v57 = vpop.f32.mrf.mxu1 }
 0x1a9   : > { %9659 = vst [vmem:[#allocation7_spill] sm:$0xff] %v8923_v3  ;;  %v8926_v42 = vadd.f32 %v6052_v7, %v1998_v19  ;;  %v1996_v41 = vadd.f32 %v1953_v57, %v8833_v45  ;;  %v2682_v47 = vpop.f32.mrf.mxu0 }
 0x1aa   : > { %v6019_v52 = vpop.f32.mrf.mxu1 }
 0x1ab   : > { %9660 = vst [vmem:[#allocation6_spill] sm:$0xff] %v8926_v42  ;;  %v8929_v44 = vadd.f32 %v2679_v51, %v1996_v41  ;;  %v1999_v49 = vadd.f32 %v6019_v52, %v8836_v61  ;;  %v8932_v6 = vpop.f32.mrf.mxu0 }
 0x1ac   : > { %v1956_v14 = vpop.f32.mrf.mxu1 }
 0x1ad   : > { %9661 = vst [vmem:[#allocation9_spill] sm:$0xff] %v8929_v44  ;;  %v8934_v35 = vadd.f32 %v6053_v33, %v1999_v49  ;;  %v1997_v20 = vadd.f32 %v1956_v14, %v8839_v40  ;;  %v8937_v39 = vpop.f32.mrf.mxu0 }
 0x1ae   : > { %v6058_v36 = vpop.f32.mrf.mxu1 }
 0x1af   : > { %9662 = vst [vmem:[#allocation8_spill] sm:$0xff] %v8934_v35  ;;  %v8939_v32 = vadd.f32 %v2682_v47, %v1997_v20  ;;  %v8941_v5 = vpop.f32.mrf.mxu0 }
 0x1b0   : > { %v3037_v45 = vpop.f32.mrf.mxu1 }
 0x1b1   : > { %v8943_v28 = vpop.f32.mrf.mxu0 }
 0x1b2   : > { %v6059_v43 = vpop.f32.mrf.mxu1 }
 0x1b3   : > { %v8945_v37 = vpop.f32.mrf.mxu0 }
 0x1b4   : > { %v3040_v61 = vpop.f32.mrf.mxu1 }
 0x1b5   : > { %v8947_v21 = vpop.f32.mrf.mxu0 }
 0x1b6   : > { %v6062_v63 = vpop.f32.mrf.mxu1 }
 0x1b7   : > { %v8949_v54 = vpop.f32.mrf.mxu0 }
 0x1b8   : > { %v3053_v40 = vpop.f32.mrf.mxu1 }
 0x1b9   : > { %v8951_v10 = vpop.f32.mrf.mxu0 }
 0x1ba   : > { %v6063_v25 = vpop.f32.mrf.mxu1 }
 0x1bb   : > { %v8953_v46 = vpop.f32.mrf.mxu0 }
 0x1bc   : > { %v3056_v4 = vpop.f32.mrf.mxu1 }
 0x1bd   : > { %v8955_v50 = vpop.f32.mrf.mxu0 }
 0x1be   : > { %v8957_v7 = vpop.f32.mrf.mxu1 }
 0x1bf   : > { %v8959_v1 = vpop.f32.mrf.mxu0 }
 0x1c0   : > { %v8961_v17 = vpop.f32.mrf.mxu1 }
 0x1c1   : > { %v8963_v51 = vpop.f32.mrf.mxu0 }
 0x1c2   : > { %v6067_v23 = vpop.f32.mrf.mxu1 }
 0x1c3   : > { %v8965_v19 = vpop.f32.mrf.mxu0 }
 0x1c4   : > { %v3072_v33 = vpop.f32.mrf.mxu1 }
 0x1c5   : > { %v8967_v57 = vpop.f32.mrf.mxu0 }
 0x1c6   : > { %v8969_v41 = vpop.f32.mrf.mxu1 }
 0x1c7   : > { %v8971_v47 = vpop.f32.mrf.mxu0 }
 0x1c8   : > { %9663 = vst [vmem:[#allocation10_spill] sm:$0xff] %v8971_v47  ;;  %v8973_v52 = vpop.f32.mrf.mxu1 }
 0x1c9   : > { %v8975_v49 = vpop.f32.mrf.mxu0 }
 0x1ca   : > { %9664 = vst [vmem:[#allocation13_spill] sm:$0xff] %v8975_v49  ;;  %v8977_v14 = vpop.f32.mrf.mxu1 }
 0x1cb   : > { %v8979_v20 = vpop.f32.mrf.mxu0 }
 0x1cc   : > { %9665 = vst [vmem:[#allocation16_spill] sm:$0xff] %v8979_v20  ;;  %v8981_v35 = vpop.f32.mrf.mxu1 }
 0x1cd   : > { %v8983_v44 = vpop.f32.mrf.mxu0 }
 0x1ce   : > { %9666 = vst [vmem:[#allocation18_spill] sm:$0xff] %v8983_v44  ;;  %v8985_v42 = vpop.f32.mrf.mxu1 }
 0x1cf   : > { %v8987_v3 = vpop.f32.mrf.mxu0 }
 0x1d0   : > { %9667 = vst [vmem:[#allocation20_spill] sm:$0xff] %v8987_v3  ;;  %v8989_v30 = vpop.f32.mrf.mxu1 }
 0x1d1   : > { %v8991_v15 = vpop.f32.mrf.mxu0 }
 0x1d2   : > { %9668 = vst [vmem:[#allocation23_spill] sm:$0xff] %v8991_v15  ;;  %v8993_v22 = vpop.f32.mrf.mxu1 }
 0x1d3   : > { %9669 = vst [vmem:[#allocation25_spill] sm:$0xff] %v8993_v22  ;;  %v8995_v24 = vpop.f32.mrf.mxu0 }
 0x1d4   : > { %9670 = vst [vmem:[#allocation27_spill] sm:$0xff] %v8995_v24  ;;  %v8997_v56 = vpop.f32.mrf.mxu1 }
 0x1d5   : > { %9671 = vst [vmem:[#allocation14_spill] sm:$0xff] %v8997_v56  ;;  %v8999_v55 = vpop.f32.mrf.mxu0 }
 0x1d6   : > { %9672 = vst [vmem:[#allocation11_spill] sm:$0xff] %v8999_v55  ;;  %v9001_v58 = vpop.f32.mrf.mxu1 }
 0x1d7   : > { %9673 = vst [vmem:[#allocation19_spill] sm:$0xff] %v9001_v58  ;;  %v9003_v20 = vpop.f32.mrf.mxu0 }
 0x1d8   : > { %9674 = vst [vmem:[#allocation15_spill] sm:$0xff] %v9003_v20  ;;  %v9005_v44 = vpop.f32.mrf.mxu1 }
 0x1d9   : > { %9675 = vst [vmem:[#allocation29_spill] sm:$0xff] %v9005_v44  ;;  %v9007_v59 = vpop.f32.mrf.mxu0 }
 0x1da   : > { %9676 = vst [vmem:[#allocation30_spill] sm:$0xff] %v9007_v59  ;;  %v9009_v3 = vpop.f32.mrf.mxu1 }
 0x1db   : > { %9677 = vst [vmem:[#allocation31_spill] sm:$0xff] %v9009_v3  ;;  %v9011_v49 = vpop.f32.mrf.mxu0 }
 0x1dc   : > { %9678 = vst [vmem:[#allocation32_spill] sm:$0xff] %v9011_v49  ;;  %v9013_v15 = vpop.f32.mrf.mxu1 }
 0x1dd   : > { %9679 = vst [vmem:[#allocation33_spill] sm:$0xff] %v9013_v15  ;;  %v9015_v47 = vpop.f32.mrf.mxu0 }
 0x1de   : > { %9680 = vst [vmem:[#allocation34_spill] sm:$0xff] %v9015_v47  ;;  %v9017_v24 = vpop.f32.mrf.mxu1 }
 0x1df   : > { %9681 = vst [vmem:[#allocation35_spill] sm:$0xff] %v9017_v24  ;;  %v9019_v56 = vpop.f32.mrf.mxu0 }
 0x1e0   : > { %9682 = vst [vmem:[#allocation36_spill] sm:$0xff] %v9019_v56  ;;  %v9021_v55 = vpop.f32.mrf.mxu1  ;;  %v3166_v56 = vadd.f32 %v6058_v36, %v8842_v62  ;;  %v3168_v36 = vadd.f32 %v3053_v40, %v8857_v31  ;;  %v3173_v31 = vadd.f32 %v3072_v33, %v8875_v8  ;;  %v3176_v8 = vadd.f32 %v8973_v52, %v8881_v12 }
 0x1e1   : > { %9683 = vst [vmem:[#allocation37_spill] sm:$0xff] %v9021_v55  ;;  %v9023_v58 = vpop.f32.mrf.mxu0  ;;  %v3164_v55 = vadd.f32 %v3037_v45, %v8845_v0  ;;  %v3171_v0 = vadd.f32 %v6063_v25, %v8860_v38  ;;  %v9064_v38 = vld [vmem:[%s9457_s2] ss:$0 sm:$0xff] }
 0x1e2   : > { %9684 = vst [vmem:[#allocation38_spill] sm:$0xff] %v9023_v58  ;;  %v9025_v20 = vpop.f32.mrf.mxu1 }
 0x1e3   : > { %9685 = vst [vmem:[#allocation39_spill] sm:$0xff] %v9025_v20  ;;  %v9027_v44 = vpop.f32.mrf.mxu0  ;;  %v3167_v20 = vadd.f32 %v6059_v43, %v8848_v26  ;;  %v3526_v62 = vadd.f32 %v8937_v39, %v3164_v55  ;;  %v3169_v43 = vadd.f32 %v3056_v4, %v8863_v2  ;;  %v3175_v55 = vadd.f32 %v6067_v23, %v8872_v13 }
 0x1e4   : > { %9686 = vst [vmem:[#allocation40_spill] sm:$0xff] %v9027_v44  ;;  %v9029_v59 = vpop.f32.mrf.mxu1  ;;  %v3530_v39 = vadd.f32 %v8947_v21, %v3168_v36  ;;  %v3178_v13 = vadd.f32 %v8969_v41, %v8878_v53  ;;  %v9086_v53 = vadd.f32 %v8963_v51, %v3173_v31 }
 0x1e5   : > { %9687 = vst [vmem:[#allocation41_spill] sm:$0xff] %v9029_v59  ;;  %v9031_v3 = vpop.f32.mrf.mxu0  ;;  %v3528_v59 = vadd.f32 %v8932_v6, %v3166_v56  ;;  %v3529_v26 = vadd.f32 %v8941_v5, %v3167_v20  ;;  %v3531_v5 = vadd.f32 %v8951_v10, %v3169_v43 }
 0x1e6   : > { %9688 = vst [vmem:[#allocation42_spill] sm:$0xff] %v9031_v3  ;;  %v9033_v49 = vpop.f32.mrf.mxu1  ;;  %v3165_v3 = vadd.f32 %v3040_v61, %v8851_v60 }
 0x1e7   : > { %9689 = vst [vmem:[#allocation43_spill] sm:$0xff] %v9033_v49  ;;  %v9035_v15 = vpop.f32.mrf.mxu0  ;;  %v3170_v49 = vadd.f32 %v6062_v63, %v8854_v48  ;;  %v3174_v48 = vadd.f32 %v8957_v7, %v8866_v27  ;;  %v9083_v63 = vadd.f32 %v8959_v1, %v3175_v55  ;;  %v3179_v7 = vadd.f32 %v8977_v14, %v8884_v16  ;;  %v9693_v16 = vld [vmem:[#allocation25_spill] sm:$0xff]  ;;  %v9699_v55 = vld [vmem:[#allocation18_spill] sm:$0xff] }
 0x1e8   : > { %9690 = vst [vmem:[#allocation44_spill] sm:$0xff] %v9035_v15  ;;  %v9037_v47 = vpop.f32.mrf.mxu1  ;;  %v3177_v1 = vadd.f32 %v8981_v35, %v8887_v11 }
 0x1e9   : > { %9691 = vst [vmem:[#allocation45_spill] sm:$0xff] %v9037_v47  ;;  %v3514_v24 = vpop.f32.mrf.mxu0  ;;  %v3536_v61 = vadd.f32 %v8953_v46, %v3174_v48  ;;  %v9093_v46 = vadd.f32 %v8965_v19, %v3178_v13  ;;  %v3182_v19 = vadd.f32 %v8985_v42, %v8890_v29  ;;  %v9695_v29 = vld [vmem:[#allocation13_spill] sm:$0xff]  ;;  %v9698_v48 = vld [vmem:[#allocation16_spill] sm:$0xff]  ;;  %v9701_v13 = vld [vmem:[#allocation23_spill] sm:$0xff] }
 0x1ea   : > { %v9041_v58 = vpop.f32.mrf.mxu1  ;;  %v9120_v42 = vadd.f32 %v9695_v29, %v3177_v1  ;;  %v9712_v29 = vld [vmem:[#allocation27_spill] sm:$0xff] }
 0x1eb   : > { %9692 = vst [vmem:[#allocation46_spill] sm:$0xff] %v9041_v58  ;;  %v6160_v44 = vpop.f32.mrf.mxu0 }
 0x1ec   : > { %v3152_v22 = vpop.f32.mrf.mxu1 }
 0x1ed   : > { %v3193_v15 = vadd.f32 %v3152_v22, %v8939_v32  ;;  %v4595_v47 = vpop.f32.mrf.mxu0  ;;  %v3172_v22 = vadd.f32 %v8961_v17, %v8869_v18  ;;  %v3533_v18 = vadd.f32 %v8949_v54, %v3171_v0 }
 0x1ee   : > { %v6126_v45 = vpop.f32.mrf.mxu1 }
 0x1ef   : > { %v9053_v58 = vadd.f32 %v3514_v24, %v3193_v15  ;;  %v4254_v56 = vadd.f32 %v6126_v45, %v3528_v59  ;;  %v6161_v60 = vpop.f32.mrf.mxu0  ;;  %v3527_v24 = vadd.f32 %v8943_v28, %v3165_v3  ;;  %v3532_v59 = vadd.f32 %v8945_v37, %v3170_v49 }
 0x1f0   : > { %v4125_v2 = vpop.f32.mrf.mxu1  ;;  %v9080_v21 = vadd.f32 %v8955_v50, %v3172_v22  ;;  %v9096_v50 = vadd.f32 %v8967_v57, %v3176_v8  ;;  %v3180_v57 = vadd.f32 %v8989_v30, %v8893_v9  ;;  %v9696_v9 = vld [vmem:[#allocation5_spill] sm:$0xff]  ;;  %v9697_v30 = vld [vmem:[#allocation14_spill] sm:$0xff]  ;;  %v9126_v22 = vadd.f32 %v9698_v48, %v3182_v19 }
 0x1f1   : > { %v4724_v15 = vadd.f32 %v6160_v44, %v4254_v56  ;;  %v4252_v6 = vadd.f32 %v4125_v2, %v3526_v62  ;;  %v4598_v27 = vpop.f32.mrf.mxu0  ;;  %v9694_v62 = vld [vmem:[#allocation10_spill] sm:$0xff]  ;;  %v3181_v0 = vadd.f32 %v9697_v30, %v9696_v9  ;;  %v9700_v2 = vld [vmem:[#allocation20_spill] sm:$0xff]  ;;  %v9708_v19 = vld [vmem:[#allocation21_spill] sm:$0xff] }
 0x1f2   : > { %v6127_v32 = vpop.f32.mrf.mxu1  ;;  %v9117_v36 = vadd.f32 %v9694_v62, %v3179_v7  ;;  %v9129_v31 = vadd.f32 %v9699_v55, %v3180_v57  ;;  %v9709_v57 = vld [vmem:[#allocation33_spill] sm:$0xff]  ;;  %v9713_v30 = vld [vmem:[#allocation11_spill] sm:$0xff] }
 0x1f3   : > { %v9076_v3 = vadd.f32 %v9064_v38, %v4724_v15  ;;  %v4722_v28 = vadd.f32 %v4595_v47, %v4252_v6  ;;  %v4255_v44 = vadd.f32 %v6127_v32, %v3529_v26  ;;  %v6164_v37 = vpop.f32.mrf.mxu0  ;;  %v3183_v47 = vadd.f32 %v9693_v16, %v8896_v34  ;;  %v9702_v32 = vld [vmem:[#allocation17_spill] sm:$0xff] }
 0x1f4   : > { %v4128_v12 = vpop.f32.mrf.mxu1  ;;  %v9141_v8 = vadd.f32 %v9701_v13, %v3181_v0  ;;  %v3185_v16 = vadd.f32 %v9709_v57, %v9708_v19  ;;  %v9717_v13 = vld [vmem:[#allocation30_spill] sm:$0xff] }
 0x1f5   : > { %v5695_v54 = vmul.f32 -1.442695, %v9076_v3  ;;  %v9090_v40 = vadd.f32 %v9064_v38, %v4722_v28  ;;  %v4725_v10 = vadd.f32 %v6161_v60, %v4255_v44  ;;  %v4253_v25 = vadd.f32 %v4128_v12, %v3527_v24  ;;  %v4611_v4 = vpop.f32.mrf.mxu0  ;;  %v9703_v28 = vld [vmem:[#allocation19_spill] sm:$0xff]  ;;  %v9705_v12 = vld [vmem:[#allocation29_spill] sm:$0xff] }
 0x1f6   : > { %v6130_v17 = vpop.f32.mrf.mxu1  ;;  %v9132_v24 = vadd.f32 %v9700_v2, %v3183_v47  ;;  %v3186_v44 = vadd.f32 %v9703_v28, %v9702_v32  ;;  %v9710_v47 = vld [vmem:[#allocation24_spill] sm:$0xff]  ;;  %v9180_v32 = vadd.f32 %v9717_v13, %v3185_v16 }
 0x1f7   : > { %6308 = vpow2.f32 %v5695_v54  ;;  %v5693_v51 = vmul.f32 -1.442695, %v9090_v40  ;;  %v9104_v23 = vadd.f32 %v9064_v38, %v4725_v10  ;;  %v4723_v33 = vadd.f32 %v4598_v27, %v4253_v25  ;;  %v6165_v41 = vpop.f32.mrf.mxu0  ;;  %v9718_v28 = vld [vmem:[#allocation32_spill] sm:$0xff] }
 0x1f8   : > { %v4258_v52 = vadd.f32 %v6130_v17, %v3532_v59  ;;  %v4141_v11 = vpop.f32.mrf.mxu1  ;;  %v9163_v9 = vadd.f32 %v9712_v29, %v3186_v44 }
 0x1f9   : > { %6310 = vpow2.f32 %v5693_v51  ;;  %v5696_v35 = vmul.f32 -1.442695, %v9104_v23  ;;  %v9114_v49 = vadd.f32 %v9064_v38, %v4723_v33  ;;  %v4256_v14 = vadd.f32 %v4141_v11, %v3530_v39  ;;  %v4614_v20 = vpop.f32.mrf.mxu0  ;;  %v9706_v51 = vld [vmem:[#allocation12_spill] sm:$0xff]  ;;  %v9707_v33 = vld [vmem:[#allocation31_spill] sm:$0xff] }
 0x1fa   : > { %v4728_v34 = vadd.f32 %v6164_v37, %v4258_v52  ;;  %v6131_v45 = vpop.f32.mrf.mxu1  ;;  %v9704_v37 = vld [vmem:[#allocation22_spill] sm:$0xff]  ;;  %v9711_v52 = vld [vmem:[#allocation35_spill] sm:$0xff] }
 0x1fb   : > { %6312 = vpow2.f32 %v5696_v35  ;;  %v5694_v26 = vmul.f32 -1.442695, %v9114_v49  ;;  %v4726_v43 = vadd.f32 %v4611_v4, %v4256_v14  ;;  %v4259_v56 = vadd.f32 %v6131_v45, %v3533_v18  ;;  %v6168_v60 = vpop.f32.mrf.mxu0  ;;  %v9715_v45 = vld [vmem:[#allocation37_spill] sm:$0xff] }
 0x1fc   : > { %v9135_v59 = vadd.f32 %v9064_v38, %v4728_v34  ;;  %v4144_v15 = vpop.f32.mrf.mxu1  ;;  %v3184_v54 = vadd.f32 %v9705_v12, %v9704_v37  ;;  %v3190_v11 = vadd.f32 %v9711_v52, %v9710_v47  ;;  %v9714_v34 = vld [vmem:[#allocation26_spill] sm:$0xff] }
 0x1fd   : > { %6314 = vpow2.f32 %v5694_v26  ;;  %v9138_v6 = vadd.f32 %v9064_v38, %v4726_v43  ;;  %v4729_v27 = vadd.f32 %v6165_v41, %v4259_v56  ;;  %v4257_v39 = vadd.f32 %v4144_v15, %v3531_v5  ;;  %v4627_v18 = vpop.f32.mrf.mxu0 }
 0x1fe   : > { %v5699_v10 = vmul.f32 -1.442695, %v9135_v59  ;;  %v6134_v25 = vpop.f32.mrf.mxu1  ;;  %v3187_v41 = vadd.f32 %v9707_v33, %v9706_v51  ;;  %v9166_v0 = vadd.f32 %v9713_v30, %v3184_v54  ;;  %v3188_v26 = vadd.f32 %v9715_v45, %v9714_v34  ;;  %v9721_v51 = vld [vmem:[#allocation39_spill] sm:$0xff] }
 0x1ff   : > { %v5697_v4 = vmul.f32 -1.442695, %v9138_v6  ;;  %v9150_v7 = vadd.f32 %v9064_v38, %v4729_v27  ;;  %v4727_v1 = vadd.f32 %v4614_v20, %v4257_v39  ;;  %v4262_v5 = vadd.f32 %v6134_v25, %v3536_v61  ;;  %v6169_v17 = vpop.f32.mrf.mxu0  ;;  %v9716_v27 = vld [vmem:[#allocation15_spill] sm:$0xff] }
 0x200   : > { %6316 = vpow2.f32 %v5699_v10  ;;  %v4157_v35 = vpop.f32.mrf.mxu1  ;;  %v9177_v39 = vadd.f32 %v9716_v27, %v3187_v41  ;;  %v9183_v44 = vadd.f32 %v9718_v28, %v3190_v11  ;;  %v9722_v11 = vld [vmem:[#allocation7_spill] sm:$0xff]  ;;  %v9725_v28 = vld [vmem:[#allocation38_spill] sm:$0xff] }
 0x201   : > { %6318 = vpow2.f32 %v5697_v4  ;;  %v5700_v14 = vmul.f32 -1.442695, %v9150_v7  ;;  %v9160_v62 = vadd.f32 %v9064_v38, %v4727_v1  ;;  %v4732_v20 = vadd.f32 %v6168_v60, %v4262_v5  ;;  %v4630_v61 = vpop.f32.mrf.mxu0  ;;  %v9719_v4 = vld [vmem:[#allocation34_spill] sm:$0xff]  ;;  %v9720_v5 = vld [vmem:[#allocation28_spill] sm:$0xff] }
 0x202   : > { %v4260_v43 = vadd.f32 %v4157_v35, %v9080_v21  ;;  %v6135_v56 = vpop.f32.mrf.mxu1  ;;  %v9187_v1 = vadd.f32 %v9719_v4, %v3188_v26  ;;  %v3191_v33 = vadd.f32 %v9721_v51, %v9720_v5  ;;  %v9723_v35 = vld [vmem:[#allocation41_spill] sm:$0xff] }
 0x203   : > { %6320 = vpow2.f32 %v5700_v14  ;;  %v5698_v48 = vmul.f32 -1.442695, %v9160_v62  ;;  %v9173_v55 = vadd.f32 %v9064_v38, %v4732_v20  ;;  %v4263_v60 = vadd.f32 %v6135_v56, %v9083_v63  ;;  %v6172_v2 = vpop.f32.mrf.mxu0  ;;  %v9724_v56 = vld [vmem:[#allocation36_spill] sm:$0xff] }
 0x204   : > { %v6309_v15 = vpop.eup %6308  ;;  %v4730_v21 = vadd.f32 %v4627_v18, %v4260_v43  ;;  %v4160_v37 = vpop.f32.mrf.mxu1  ;;  %v3189_v14 = vadd.f32 %v9723_v35, %v9722_v11  ;;  %v9728_v35 = vld [vmem:[#allocation9_spill] sm:$0xff] }
 0x205   : > { %v4891_v12 = vadd.f32 1.0, %v6309_v15  ;;  %6322 = vpow2.f32 %v5698_v48  ;;  %v5703_v54 = vmul.f32 -1.442695, %v9173_v55  ;;  %v4733_v10 = vadd.f32 %v6169_v17, %v4263_v60  ;;  %v4643_v25 = vpop.f32.mrf.mxu0 }
 0x206   : > { %v6311_v63 = vpop.eup %6310  ;;  %v9192_v41 = vadd.f32 %v9064_v38, %v4730_v21  ;;  %v4261_v19 = vadd.f32 %v4160_v37, %v9086_v53  ;;  %v6138_v18 = vpop.f32.mrf.mxu1  ;;  %v9204_v48 = vadd.f32 %v9724_v56, %v3191_v33  ;;  %v9215_v21 = vadd.f32 %v9725_v28, %v3189_v14  ;;  %v9726_v33 = vld [vmem:[#allocation6_spill] sm:$0xff]  ;;  %v9729_v14 = vld [vmem:[#allocation45_spill] sm:$0xff] }
 0x207   : > { %6324 = vrcp.f32 %v4891_v12  ;;  %v4889_v57 = vadd.f32 1.0, %v6311_v63  ;;  %v9196_v16 = vadd.f32 %v9064_v38, %v4733_v10  ;;  %v4266_v17 = vadd.f32 %v6138_v18, %v9093_v46  ;;  %v6173_v47 = vpop.f32.mrf.mxu0 }
 0x208   : > { %v6313_v52 = vpop.eup %6312  ;;  %6326 = vpow2.f32 %v5703_v54  ;;  %v5701_v20 = vmul.f32 -1.442695, %v9192_v41  ;;  %v4731_v29 = vadd.f32 %v4630_v61, %v4261_v19  ;;  %v4173_v30 = vpop.f32.mrf.mxu1 }
 0x209   : > { %6328 = vrcp.f32 %v4889_v57  ;;  %v4892_v53 = vadd.f32 1.0, %v6313_v52  ;;  %v5704_v34 = vmul.f32 -1.442695, %v9196_v16  ;;  %v4736_v45 = vadd.f32 %v6172_v2, %v4266_v17  ;;  %v4646_v26 = vpop.f32.mrf.mxu0 }
 0x20a   : > { %v6315_v43 = vpop.eup %6314  ;;  %6330 = vpow2.f32 %v5701_v20  ;;  %v9207_v46 = vadd.f32 %v9064_v38, %v4731_v29  ;;  %v4264_v60 = vadd.f32 %v4173_v30, %v9096_v50  ;;  %v6139_v15 = vpop.f32.mrf.mxu1  ;;  %v3192_v20 = vadd.f32 %v9729_v14, %v9728_v35 }
 0x20b   : > { %6332 = vrcp.f32 %v4892_v53  ;;  %v4890_v61 = vadd.f32 1.0, %v6315_v43  ;;  %v9211_v27 = vadd.f32 %v9064_v38, %v4736_v45  ;;  %v4267_v2 = vadd.f32 %v6139_v15, %v9117_v36  ;;  %v6176_v13 = vpop.f32.mrf.mxu0  ;;  %v9727_v36 = vld [vmem:[#allocation43_spill] sm:$0xff] }
 0x20c   : > { %6334 = vpow2.f32 %v5704_v34  ;;  %v5702_v37 = vmul.f32 -1.442695, %v9207_v46  ;;  %v4734_v12 = vadd.f32 %v4643_v25, %v4264_v60  ;;  %v4176_v54 = vpop.f32.mrf.mxu1  ;;  %v3194_v19 = vadd.f32 %v9727_v36, %v9726_v33  ;;  %v9730_v60 = vld [vmem:[#allocation40_spill] sm:$0xff] }
 0x20d   : > { %v6317_v10 = vpop.eup %6316  ;;  %6336 = vrcp.f32 %v4890_v61  ;;  %v5707_v50 = vmul.f32 -1.442695, %v9211_v27  ;;  %v4737_v63 = vadd.f32 %v6173_v47, %v4267_v2  ;;  %v4265_v4 = vadd.f32 %v4176_v54, %v9120_v42  ;;  %v4659_v5 = vpop.f32.mrf.mxu0 }
 0x20e   : > { %v6319_v51 = vpop.eup %6318  ;;  %v4895_v18 = vadd.f32 1.0, %v6317_v10  ;;  %6338 = vpow2.f32 %v5702_v37  ;;  %v9224_v57 = vadd.f32 %v9064_v38, %v4734_v12  ;;  %v6142_v25 = vpop.f32.mrf.mxu1  ;;  %v9242_v15 = vadd.f32 %v9730_v60, %v3194_v19 }
 0x20f   : > { %v4893_v17 = vadd.f32 1.0, %v6319_v51  ;;  %6340 = vpow2.f32 %v5707_v50  ;;  %v9227_v52 = vadd.f32 %v9064_v38, %v4737_v63  ;;  %v4735_v47 = vadd.f32 %v4646_v26, %v4265_v4  ;;  %v6177_v42 = vpop.f32.mrf.mxu0  ;;  %v9731_v50 = vld [vmem:[#allocation42_spill] sm:$0xff] }
 0x210   : > { %v6321_v11 = vpop.eup %6320  ;;  %6342 = vrcp.f32 %v4895_v18  ;;  %v5705_v29 = vmul.f32 -1.442695, %v9224_v57  ;;  %v4270_v30 = vadd.f32 %v6142_v25, %v9126_v22  ;;  %v4189_v53 = vpop.f32.mrf.mxu1  ;;  %v9248_v63 = vadd.f32 %v9731_v50, %v3192_v20 }
 0x211   : > { %6344 = vrcp.f32 %v4893_v17  ;;  %v4896_v34 = vadd.f32 1.0, %v6321_v11  ;;  %v5708_v45 = vmul.f32 -1.442695, %v9227_v52  ;;  %v9239_v26 = vadd.f32 %v9064_v38, %v4735_v47  ;;  %v4662_v43 = vpop.f32.mrf.mxu0 }
 0x212   : > { %v6323_v56 = vpop.eup %6322  ;;  %6346 = vpow2.f32 %v5705_v29  ;;  %v4740_v61 = vadd.f32 %v6176_v13, %v4270_v30  ;;  %v4268_v22 = vadd.f32 %v4189_v53, %v9129_v31  ;;  %v6143_v2 = vpop.f32.mrf.mxu1  ;;  %v9732_v29 = vld [vmem:[#allocation8_spill] sm:$0xff]  ;;  %v9733_v30 = vld [vmem:[#allocation46_spill] sm:$0xff] }
 0x213   : > { %6348 = vrcp.f32 %v4896_v34  ;;  %v4894_v28 = vadd.f32 1.0, %v6323_v56  ;;  %v5706_v37 = vmul.f32 -1.442695, %v9239_v26  ;;  %v4271_v12 = vadd.f32 %v6143_v2, %v9132_v24 }
 0x214   : > { %v6180_v54 = vpop.f32.mrf.mxu0  ;;  %v6325_v10 = vpop.eup %6324  ;;  %6350 = vpow2.f32 %v5708_v45  ;;  %v9251_v4 = vadd.f32 %v9064_v38, %v4740_v61  ;;  %v4738_v13 = vadd.f32 %v4659_v5, %v4268_v22  ;;  %v9270_v53 = vadd.f32 %v9733_v30, %v9732_v29 }
 0x215   : > { %v4192_v51 = vpop.f32.mrf.mxu1  ;;  %v6327_v31 = vpop.eup %6326  ;;  %v4987_v33 = vmul.f32 %v6325_v10, %v9076_v3  ;;  %6352 = vrcp.f32 %v4894_v28  ;;  %v4741_v36 = vadd.f32 %v6177_v42, %v4271_v12 }
 0x216   : > { %v4269_v19 = vadd.f32 %v4192_v51, %v9141_v8  ;;  %v4675_v24 = vpop.f32.mrf.mxu0  ;;  %v6329_v18 = vpop.eup %6328  ;;  %v4899_v25 = vadd.f32 1.0, %v6327_v31  ;;  %6354 = vpow2.f32 %v5706_v37  ;;  %v5711_v17 = vmul.f32 -1.442695, %v9251_v4 }
 0x217   : > { %v9257_v47 = vadd.f32 %v9064_v38, %v4738_v13  ;;  %v6146_v11 = vpop.f32.mrf.mxu1  ;;  %v6331_v35 = vpop.eup %6330  ;;  %5019 = vst [vmem:[%s9260_s9 + $0x10] sm:$0xff] %v4987_v33  ;;  %v4985_v3 = vmul.f32 %v6329_v18, %v9090_v40  ;;  %v9265_v8 = vadd.f32 %v9064_v38, %v4741_v36 }
 0x218   : > { %v4739_v5 = vadd.f32 %v4662_v43, %v4269_v19  ;;  %v4274_v42 = vadd.f32 %v6146_v11, %v9163_v9  ;;  %v6181_v14 = vpop.f32.mrf.mxu0  ;;  %v6333_v20 = vpop.eup %6332  ;;  %6356 = vrcp.f32 %v4899_v25  ;;  %v4897_v34 = vadd.f32 1.0, %v6331_v35 }
 0x219   : > { %v5709_v45 = vmul.f32 -1.442695, %v9257_v47  ;;  %v4205_v56 = vpop.f32.mrf.mxu1  ;;  %v6335_v60 = vpop.eup %6334  ;;  %5017 = vst [vmem:[%s9260_s9] sm:$0xff] %v4985_v3  ;;  %v4988_v40 = vmul.f32 %v6333_v20, %v9104_v23  ;;  %6358 = vpow2.f32 %v5711_v17  ;;  %v5712_v43 = vmul.f32 -1.442695, %v9265_v8 }
 0x21a   : > { %v9277_v9 = vadd.f32 %v9064_v38, %v4739_v5  ;;  %v4678_v61 = vpop.f32.mrf.mxu0  ;;  %v6337_v22 = vpop.eup %6336  ;;  %6360 = vrcp.f32 %v4897_v34  ;;  %v4900_v2 = vadd.f32 1.0, %v6335_v60  ;;  %v4744_v28 = vadd.f32 %v6180_v54, %v4274_v42 }
 0x21b   : > { %v4272_v37 = vadd.f32 %v4205_v56, %v9166_v0  ;;  %v6147_v12 = vpop.f32.mrf.mxu1  ;;  %v6339_v10 = vpop.eup %6338  ;;  %5020 = vst [vmem:[%s9260_s9 + $0x18] sm:$0xff] %v4988_v40  ;;  %v4986_v50 = vmul.f32 %v6337_v22, %v9114_v49  ;;  %6362 = vpow2.f32 %v5709_v45 }
 0x21c   : > { %v5710_v23 = vmul.f32 -1.442695, %v9277_v9  ;;  %v4275_v13 = vadd.f32 %v6147_v12, %v9177_v39  ;;  %v6184_v51 = vpop.f32.mrf.mxu0  ;;  %v6341_v31 = vpop.eup %6340  ;;  %6364 = vrcp.f32 %v4900_v2  ;;  %v4898_v33 = vadd.f32 1.0, %v6339_v10 }
 0x21d   : > { %v9285_v36 = vadd.f32 %v9064_v38, %v4744_v28  ;;  %v4742_v54 = vadd.f32 %v4675_v24, %v4272_v37  ;;  %v4208_v0 = vpop.f32.mrf.mxu1  ;;  %v6343_v19 = vpop.eup %6342  ;;  %5018 = vst [vmem:[%s9260_s9 + $0x8] sm:$0xff] %v4986_v50  ;;  %v4903_v18 = vadd.f32 1.0, %v6341_v31  ;;  %6366 = vpow2.f32 %v5712_v43 }
 0x21e   : > { %v4745_v25 = vadd.f32 %v6181_v14, %v4275_v13  ;;  %v4273_v49 = vadd.f32 %v4208_v0, %v9180_v32  ;;  %v4691_v17 = vpop.f32.mrf.mxu0  ;;  %v6345_v11 = vpop.eup %6344  ;;  %v4991_v39 = vmul.f32 %v6343_v19, %v9135_v59  ;;  %6368 = vrcp.f32 %v4898_v33  ;;  %v9734_v33 = vld [vmem:[#allocation44_spill] sm:$0xff] }
 0x21f   : > { %v5715_v35 = vmul.f32 -1.442695, %v9285_v36  ;;  %v9292_v3 = vadd.f32 %v9064_v38, %v4742_v54  ;;  %v6150_v24 = vpop.f32.mrf.mxu1  ;;  %v6347_v5 = vpop.eup %6346  ;;  %v4989_v42 = vmul.f32 %v6345_v11, %v9138_v6  ;;  %6370 = vrcp.f32 %v4903_v18 }
 0x220   : > { %v9296_v14 = vadd.f32 %v9064_v38, %v4745_v25  ;;  %v4743_v32 = vadd.f32 %v4678_v61, %v4273_v49  ;;  %v6185_v20 = vpop.f32.mrf.mxu0  ;;  %v6349_v29 = vpop.eup %6348  ;;  %5023 = vst [vmem:[%s9260_s9 + $0x30] sm:$0xff] %v4991_v39  ;;  %v4901_v59 = vadd.f32 1.0, %v6347_v5  ;;  %6372 = vpow2.f32 %v5710_v23 }
 0x221   : > { %v5713_v30 = vmul.f32 -1.442695, %v9292_v3  ;;  %v4278_v34 = vadd.f32 %v6150_v24, %v9183_v44  ;;  %v4221_v45 = vpop.f32.mrf.mxu1  ;;  %v6351_v56 = vpop.eup %6350  ;;  %5021 = vst [vmem:[%s9260_s9 + $0x20] sm:$0xff] %v4989_v42  ;;  %v4992_v6 = vmul.f32 %v6349_v29, %v9150_v7  ;;  %6374 = vpow2.f32 %v5715_v35 }
 0x222   : > { %v5716_v60 = vmul.f32 -1.442695, %v9296_v14  ;;  %v9305_v40 = vadd.f32 %v9064_v38, %v4743_v32  ;;  %v4694_v43 = vpop.f32.mrf.mxu0  ;;  %v6353_v61 = vpop.eup %6352  ;;  %6376 = vrcp.f32 %v4901_v59  ;;  %v4904_v22 = vadd.f32 1.0, %v6351_v56 }
 0x223   : > { %v4748_v2 = vadd.f32 %v6184_v51, %v4278_v34  ;;  %v4276_v28 = vadd.f32 %v4221_v45, %v9187_v1  ;;  %v6151_v44 = vpop.f32.mrf.mxu1  ;;  %v6355_v37 = vpop.eup %6354  ;;  %5024 = vst [vmem:[%s9260_s9 + $0x38] sm:$0xff] %v4992_v6  ;;  %v4990_v12 = vmul.f32 %v6353_v61, %v9160_v62  ;;  %6378 = vpow2.f32 %v5713_v30 }
 0x224   : > { %v5714_v7 = vmul.f32 -1.442695, %v9305_v40  ;;  %v4279_v10 = vadd.f32 %v6151_v44, %v9204_v48  ;;  %v6188_v50 = vpop.f32.mrf.mxu0  ;;  %6380 = vrcp.f32 %v4904_v22  ;;  %v4902_v23 = vadd.f32 1.0, %v6355_v37 }
 0x225   : > { %v9313_v13 = vadd.f32 %v9064_v38, %v4748_v2  ;;  %v4746_v51 = vadd.f32 %v4691_v17, %v4276_v28  ;;  %v4224_v31 = vpop.f32.mrf.mxu1  ;;  %v6357_v1 = vpop.eup %6356  ;;  %v3557_v54 = vadd.f32 %v9734_v33, %v9270_v53  ;;  %5022 = vst [vmem:[%s9260_s9 + $0x28] sm:$0xff] %v4990_v12  ;;  %6382 = vpow2.f32 %v5716_v60 }
 0x226   : > { %v4749_v62 = vadd.f32 %v6185_v20, %v4279_v10  ;;  %v4277_v0 = vadd.f32 %v4224_v31, %v9215_v21  ;;  %v6359_v19 = vpop.eup %6358  ;;  %v4995_v48 = vmul.f32 %v6357_v1, %v9173_v55  ;;  %6384 = vrcp.f32 %v4902_v23  ;;  %v4707_v17 = vpop.f32.mrf.mxu0 }
 0x227   : > { %v5719_v18 = vmul.f32 -1.442695, %v9313_v13  ;;  %v9322_v25 = vadd.f32 %v9064_v38, %v4746_v51  ;;  %v6154_v49 = vpop.f32.mrf.mxu1  ;;  %v6361_v11 = vpop.eup %6360  ;;  %v4907_v39 = vadd.f32 1.0, %v6359_v19  ;;  %6386 = vpow2.f32 %v5714_v7 }
 0x228   : > { %v9325_v53 = vadd.f32 %v9064_v38, %v4749_v62  ;;  %v4747_v35 = vadd.f32 %v4694_v43, %v4277_v0  ;;  %v6363_v21 = vpop.eup %6362  ;;  %5027 = vst [vmem:[%s9260_s9 + $0x50] sm:$0xff] %v4995_v48  ;;  %v4993_v55 = vmul.f32 %v6361_v11, %v9192_v41  ;;  %v4282_v5 = vadd.f32 %v6154_v49, %v9242_v15  ;;  %v6189_v15 = vpop.f32.mrf.mxu0 }
 0x229   : > { %6388 = vpow2.f32 %v5719_v18  ;;  %v5717_v24 = vmul.f32 -1.442695, %v9322_v25  ;;  %v4237_v42 = vpop.f32.mrf.mxu1  ;;  %v6365_v32 = vpop.eup %6364  ;;  %v4905_v20 = vadd.f32 1.0, %v6363_v21 }
 0x22a   : > { %6390 = vrcp.f32 %v4907_v39  ;;  %v5720_v29 = vmul.f32 -1.442695, %v9325_v53  ;;  %v9333_v59 = vadd.f32 %v9064_v38, %v4747_v35  ;;  %v6367_v30 = vpop.eup %6366  ;;  %5025 = vst [vmem:[%s9260_s9 + $0x40] sm:$0xff] %v4993_v55  ;;  %v4996_v34 = vmul.f32 %v6365_v32, %v9196_v16  ;;  %v4710_v51 = vpop.f32.mrf.mxu0 }
 0x22b   : > { %6392 = vpow2.f32 %v5717_v24  ;;  %v4752_v41 = vadd.f32 %v6188_v50, %v4282_v5  ;;  %v4280_v45 = vadd.f32 %v4237_v42, %v9248_v63  ;;  %v6155_v56 = vpop.f32.mrf.mxu1  ;;  %v6369_v6 = vpop.eup %6368  ;;  %v4908_v60 = vadd.f32 1.0, %v6367_v30 }
 0x22c   : > { %6394 = vrcp.f32 %v4905_v20  ;;  %v5718_v43 = vmul.f32 -1.442695, %v9333_v59  ;;  %v4283_v61 = vadd.f32 %v6155_v56, %v3557_v54  ;;  %v6371_v22 = vpop.eup %6370  ;;  %5028 = vst [vmem:[%s9260_s9 + $0x58] sm:$0xff] %v4996_v34  ;;  %v4994_v2 = vmul.f32 %v6369_v6, %v9207_v46 }
 0x22d   : > { %6396 = vpow2.f32 %v5720_v29  ;;  %v9342_v16 = vadd.f32 %v9064_v38, %v4752_v41  ;;  %v4750_v28 = vadd.f32 %v4707_v17, %v4280_v45  ;;  %v4240_v63 = vpop.f32.mrf.mxu1  ;;  %v6373_v44 = vpop.eup %6372  ;;  %v4999_v37 = vmul.f32 %v6371_v22, %v9211_v27 }
 0x22e   : > { %6398 = vrcp.f32 %v4908_v60  ;;  %v4753_v12 = vadd.f32 %v6189_v15, %v4283_v61  ;;  %v4281_v7 = vadd.f32 %v4240_v63, %v9053_v58  ;;  %v6375_v10 = vpop.eup %6374  ;;  %5026 = vst [vmem:[%s9260_s9 + $0x48] sm:$0xff] %v4994_v2  ;;  %v4906_v50 = vadd.f32 1.0, %v6373_v44 }
 0x22f   : > { %6400 = vpow2.f32 %v5718_v43  ;;  %v5723_v46 = vmul.f32 -1.442695, %v9342_v16  ;;  %v9349_v23 = vadd.f32 %v9064_v38, %v4750_v28  ;;  %v6377_v31 = vpop.eup %6376  ;;  %5031 = vst [vmem:[%s9260_s9 + $0x70] sm:$0xff] %v4999_v37  ;;  %v4911_v1 = vadd.f32 1.0, %v6375_v10 }
 0x230   : > { %v9353_v27 = vadd.f32 %v9064_v38, %v4753_v12  ;;  %v4751_v33 = vadd.f32 %v4710_v51, %v4281_v7  ;;  %v6379_v54 = vpop.eup %6378  ;;  %v4997_v58 = vmul.f32 %v6377_v31, %v9224_v57  ;;  %6402 = vrcp.f32 %v4906_v50 }
 0x231   : > { %v5721_v62 = vmul.f32 -1.442695, %v9349_v23  ;;  %v6381_v0 = vpop.eup %6380  ;;  %6404 = vrcp.f32 %v4911_v1  ;;  %v4909_v19 = vadd.f32 1.0, %v6379_v54 }
 0x232   : > { %v9358_v48 = vadd.f32 %v9064_v38, %v4751_v33  ;;  %v6383_v18 = vpop.eup %6382  ;;  %5029 = vst [vmem:[%s9260_s9 + $0x60] sm:$0xff] %v4997_v58  ;;  %v5000_v49 = vmul.f32 %v6381_v0, %v9227_v52  ;;  %6406 = vpow2.f32 %v5723_v46  ;;  %v5724_v17 = vmul.f32 -1.442695, %v9353_v27 }
 0x233   : > { %v6385_v11 = vpop.eup %6384  ;;  %6408 = vrcp.f32 %v4909_v19  ;;  %v4912_v57 = vadd.f32 1.0, %v6383_v18 }
 0x234   : > { %v6387_v39 = vpop.eup %6386  ;;  %5032 = vst [vmem:[%s9260_s9 + $0x78] sm:$0xff] %v5000_v49  ;;  %v4998_v35 = vmul.f32 %v6385_v11, %v9239_v26  ;;  %6410 = vpow2.f32 %v5721_v62  ;;  %v5722_v55 = vmul.f32 -1.442695, %v9358_v48 }
 0x235   : > { %6412 = vrcp.f32 %v4912_v57  ;;  %v4910_v38 = vadd.f32 1.0, %v6387_v39 }
 0x236   : > { %v6389_v21 = vpop.eup %6388  ;;  %5030 = vst [vmem:[%s9260_s9 + $0x68] sm:$0xff] %v4998_v35  ;;  %6414 = vpow2.f32 %v5724_v17 }
 0x237   : > { %v6391_v24 = vpop.eup %6390  ;;  %v4915_v52 = vadd.f32 1.0, %v6389_v21  ;;  %6416 = vrcp.f32 %v4910_v38 }
 0x238   : > { %v6393_v5 = vpop.eup %6392  ;;  %v5003_v42 = vmul.f32 %v6391_v24, %v9251_v4 }
 0x239   : > { %v6395_v32 = vpop.eup %6394  ;;  %6418 = vrcp.f32 %v4915_v52  ;;  %v4913_v26 = vadd.f32 1.0, %v6393_v5 }
 0x23a   : > { %v6397_v20 = vpop.eup %6396  ;;  %5035 = vst [vmem:[%s9260_s9 + $0x90] sm:$0xff] %v5003_v42  ;;  %v5001_v29 = vmul.f32 %v6395_v32, %v9257_v47  ;;  %6420 = vpow2.f32 %v5722_v55 }
 0x23b   : > { %v6399_v30 = vpop.eup %6398  ;;  %6422 = vrcp.f32 %v4913_v26  ;;  %v4916_v34 = vadd.f32 1.0, %v6397_v20 }
 0x23c   : > { %v6401_v41 = vpop.eup %6400  ;;  %5033 = vst [vmem:[%s9260_s9 + $0x80] sm:$0xff] %v5001_v29  ;;  %v5004_v45 = vmul.f32 %v6399_v30, %v9265_v8 }
 0x23d   : > { %6424 = vrcp.f32 %v4916_v34  ;;  %v4914_v4 = vadd.f32 1.0, %v6401_v41  ;;  %v6403_v56 = vpop.eup %6402 }
 0x23e   : > { %5036 = vst [vmem:[%s9260_s9 + $0x98] sm:$0xff] %v5004_v45  ;;  %v6405_v15 = vpop.eup %6404  ;;  %v5002_v6 = vmul.f32 %v6403_v56, %v9277_v9 }
 0x23f   : > { %6426 = vrcp.f32 %v4914_v4  ;;  %v6407_v47 = vpop.eup %6406  ;;  %v5007_v60 = vmul.f32 %v6405_v15, %v9285_v36 }
 0x240   : > { %v6409_v43 = vpop.eup %6408  ;;  %5034 = vst [vmem:[%s9260_s9 + $0x88] sm:$0xff] %v5002_v6  ;;  %v4919_v61 = vadd.f32 1.0, %v6407_v47 }
 0x241   : > { %v6411_v22 = vpop.eup %6410  ;;  %5039 = vst [vmem:[%s9260_s9 + $0xb0] sm:$0xff] %v5007_v60  ;;  %v5005_v8 = vmul.f32 %v6409_v43, %v9292_v3 }
 0x242   : > { %v6413_v2 = vpop.eup %6412  ;;  %6428 = vrcp.f32 %v4919_v61  ;;  %v4917_v28 = vadd.f32 1.0, %v6411_v22 }
 0x243   : > { %v6415_v63 = vpop.eup %6414  ;;  %5037 = vst [vmem:[%s9260_s9 + $0xa0] sm:$0xff] %v5005_v8  ;;  %v5008_v9 = vmul.f32 %v6413_v2, %v9296_v14 }
 0x244   : > { %v6417_v44 = vpop.eup %6416  ;;  %6430 = vrcp.f32 %v4917_v28  ;;  %v4920_v36 = vadd.f32 1.0, %v6415_v63 }
 0x245   : > { %5040 = vst [vmem:[%s9260_s9 + $0xb8] sm:$0xff] %v5008_v9  ;;  %v5006_v12 = vmul.f32 %v6417_v44, %v9305_v40 }
 0x246   : > { %v6419_v37 = vpop.eup %6418  ;;  %6432 = vrcp.f32 %v4920_v36 }
 0x247   : > { %v6421_v3 = vpop.eup %6420  ;;  %v5011_v7 = vmul.f32 %v6419_v37, %v9313_v13  ;;  %5038 = vst [vmem:[%s9260_s9 + $0xa8] sm:$0xff] %v5006_v12 }
 0x248   : > { %v6423_v10 = vpop.eup %6422  ;;  %v4918_v50 = vadd.f32 1.0, %v6421_v3 }
 0x249   : > { %5043 = vst [vmem:[%s9260_s9 + $0xd0] sm:$0xff] %v5011_v7  ;;  %v5009_v14 = vmul.f32 %v6423_v10, %v9322_v25 }
 0x24a   : > { %v6425_v46 = vpop.eup %6424  ;;  %6434 = vrcp.f32 %v4918_v50 }
 0x24b   : > { %5041 = vst [vmem:[%s9260_s9 + $0xc0] sm:$0xff] %v5009_v14  ;;  %v5012_v40 = vmul.f32 %v6425_v46, %v9325_v53 }
 0x24c   : > { %v6427_v51 = vpop.eup %6426 }
 0x24d   : > { %5044 = vst [vmem:[%s9260_s9 + $0xd8] sm:$0xff] %v5012_v40  ;;  %v5010_v13 = vmul.f32 %v6427_v51, %v9333_v59 }
 0x24f   : > { %5042 = vst [vmem:[%s9260_s9 + $0xc8] sm:$0xff] %v5010_v13  ;;  %v6429_v31 = vpop.eup %6428 }
 0x250   : > { %v5015_v1 = vmul.f32 %v6429_v31, %v9342_v16 }
 0x251   : > { %v6431_v33 = vpop.eup %6430 }
 0x252   : > { %5047 = vst [vmem:[%s9260_s9 + $0xf0] sm:$0xff] %v5015_v1  ;;  %v5013_v25 = vmul.f32 %v6431_v33, %v9349_v23 }
 0x253   : > { %v6433_v54 = vpop.eup %6432 }
 0x254   : > { %5045 = vst [vmem:[%s9260_s9 + $0xe0] sm:$0xff] %v5013_v25  ;;  %v5016_v53 = vmul.f32 %v6433_v54, %v9353_v27 }
 0x256   : > { %5048 = vst [vmem:[%s9260_s9 + $0xf8] sm:$0xff] %v5016_v53 }
 0x257   : > { %v6435_v58 = vpop.eup %6434 }
 0x258   : > { %v5014_v59 = vmul.f32 %v6435_v58, %v9358_v48 }
 0x25a   : > { %5046 = vst [vmem:[%s9260_s9 + $0xe8] sm:$0xff] %v5014_v59 }
 0x25b   : > { %6451 = shalt.err (!%p6448_p5)
}
 0x25c   : > { %s6452_s29 = scalar_lea.hbm %s9402_s21, 4096  ;;  %s6456_s5 = scalar_lea.hbm %s9458_s3, 8192 }
 0x25d   : > { %p6453_p6 = scmp.ne.s32.totalorder %s9402_s21, %s6452_s29  ;;  %p6457_p10 = scmp.lt.s32.totalorder %s9402_s21, %s9458_s3 }
 0x25e   : > { %p6458_p11 = scmp.lt.s32.totalorder %s6456_s5, %s6452_s29 }
 0x25f   : > { %p6454_p7 = pnand %p6453_p6, %p6579_p4 }
 0x260   : > { %p6459_p12 = por %p6458_p11, %p6457_p10 }
 0x261   : > { %p6455_p9 = pneg %p6454_p7 }
 0x263   : > { %p6460_p13 = pnand %p6459_p12, %p6455_p9 }
 0x265   : > { %6463 = shalt.err (!%p6460_p13)
}
 0x266   : > { %s6517_s8 = smov 128   ;;  %s6518_s9 = smov 8  }
 0x267   : > { %6203 = dma.vmem_to_hbm [thread:$0]  (%p6579_p4), %s9404_s11, 4096, %s9402_s21, %s9410_s15, %s6517_s8, %s6517_s8, %s6518_s9  }
 0x268 PF: > { %p6209_p0 = scmp.ge.s32.totalorder %s6514_s17, 2  ;;  %s5081_s10 = sand.u32 1, %s6494_s12  }
 0x269   : > { %s5082_s18 = scalar_lea.sflag [#allocation3], %s5081_s10 }
 0x26a   : > { %p6206_p1 = pnand %p6209_p0, %p6586_p8 }
 0x26c   : > { %p6207_p2 = pneg %p6206_p1 }
 0x26e   : > { %6489 = dma.done.wait (%p6207_p2), %s5082_s18, 4096  }
 0x26f   : > { %6491 = vsyncadd (%p6207_p2), %s5082_s18, 4294963200  ;;  %s16_s17 = sadd.s32 1, %s6514_s17   ;;  %s9735_s12 = smov %s6498_s13 }
 0x270   : > { %p13_p3 = scmp.ge.s32.totalorder %s16_s17, 4   ;;  %s9736_s13 = smov %s6502_s14 }
 0x271   : > { %s9737_s14 = smov %s6592_s25  ;;  %s9738_s15 = smov %s6510_s16 }
 0x272   : > { %s9739_s16 = smov %s9741_s20  ;;  %15 = sbr.rel (!%p13_p3) target bundleno = 4 (0x4), region = 78 }
 0x277   :  { %5087 = vsyncpa [#allocation3], 1 }
 0x278   :  { %5089 = vsyncpa [#allocation3 + $0x1], 1 }

</bundles_post_ra>
